<compile_context>
chip_gen: v7x
topology: tpu7x:2x2x1
jax: 0.10.0
libtpu: 0.0.40
codegen_flags: <defaults>
</compile_context>

<pallas_src>
import jax
import jax.numpy as jnp
from jax.experimental import pallas as pl
from jax.experimental.pallas import tpu as pltpu

F_IN = 10003   # fc1 in_features (PyTorch spec)
H1 = 128
H2 = 32
OUT = 2

F_ALIGN = 256   # pad the fc1 contraction dim to a lane/MXU-friendly multiple
TB_MAX = 256    # max batch tile: x block = tb * F_pad * 2 B = 5.3 MB at 256 (fits all gens)


def net1_kernel(x_ref, w1_ref, b1_ref, w2_ref, b2_ref, w3_ref, b3_ref, o_ref):
    # fc1 + relu: (tb, F_pad) bf16 @ (F_pad, H1) bf16 -> f32 accumulate on the MXU.
    h1 = jnp.dot(x_ref[...], w1_ref[...], preferred_element_type=jnp.float32)
    h1 = jnp.maximum(h1 + b1_ref[...], 0.0)
    # fc2 + relu
    h2 = jnp.dot(h1, w2_ref[...], preferred_element_type=jnp.float32)
    h2 = jnp.maximum(h2 + b2_ref[...], 0.0)
    # fc3 + softmax over the last dim (exact division; runs once per batch tile)
    logits = jnp.dot(h2, w3_ref[...], preferred_element_type=jnp.float32) + b3_ref[...]
    m = jnp.max(logits, axis=-1, keepdims=True)
    e = jnp.exp(logits - m)
    o_ref[...] = (e / jnp.sum(e, axis=-1, keepdims=True)).astype(o_ref.dtype)


def net1_forward(x, w1, b1, w2, b2, w3, b3):
    B, T, F = x.shape
    assert F == F_IN and w1.shape == (F_IN, H1)

    # Hoist the mean over T out of the kernel; XLA fuses it with the pad + bf16 cast, so
    # the large input is touched once in HBM and the kernel streams a T-times-smaller
    # (B, F_pad) bf16 slab.  Zero padding contributes nothing to the fc1 dot.
    xm = jnp.mean(x, axis=1)                              # (B, F) f32
    f_pad = pl.cdiv(F, F_ALIGN) * F_ALIGN                 # 10003 -> 10240
    x_p = jnp.pad(xm, ((0, 0), (0, f_pad - F))).astype(jnp.bfloat16)
    w1_p = jnp.pad(w1, ((0, f_pad - F), (0, 0))).astype(jnp.bfloat16)

    tb = min(B, TB_MAX)
    gb = pl.cdiv(B, tb)     # single grid axis: batch tiles ("parallel")
    # Partial last batch tile (B % tb != 0) relies on Pallas edge-block handling; only
    # discarded padded output rows may contain garbage.

    const2 = lambda b: (0, 0)

    # Derive the VMEM cap from the actual double-buffered block sizes; cap < v7x's
    # 64 MiB physical (and trivially within v5e/v6e's 128 MiB).
    x_blk = tb * f_pad * 2
    w1_blk = f_pad * H1 * 2
    vmem_limit = int(min(max(2 * x_blk + 2 * w1_blk + (1 << 20), 16 << 20), 48 << 20))

    # TODO(synk): for B <= tb on v7x only one TensorCore is used; a dual-core K-split of
    # the fc1 contraction (partial accumulators combined via CMEM) could ~halve the
    # per-core W1 DMA but is not worth the complexity at these sizes.
    return pl.pallas_call(
        net1_kernel,
        out_shape=jax.ShapeDtypeStruct((B, OUT), jnp.float32),
        grid_spec=pltpu.PrefetchScalarGridSpec(
            num_scalar_prefetch=0,
            grid=(gb,),
            in_specs=[
                pl.BlockSpec((tb, f_pad), lambda b: (b, 0)),   # x (mean-reduced): streamed
                pl.BlockSpec((f_pad, H1), const2),             # W1: VMEM-resident (one DMA)
                pl.BlockSpec((1, H1), const2),                 # b1: resident
                pl.BlockSpec((H1, H2), const2),                # W2: resident
                pl.BlockSpec((1, H2), const2),                 # b2: resident
                pl.BlockSpec((H2, OUT), const2),               # W3: resident
                pl.BlockSpec((1, OUT), const2),                # b3: resident
            ],
            out_specs=pl.BlockSpec((tb, OUT), lambda b: (b, 0)),
        ),
        compiler_params=pltpu.CompilerParams(
            dimension_semantics=("parallel",),
            vmem_limit_bytes=vmem_limit,
        ),
    )(x_p, w1_p, b1, w2, b2, w3, b3)


def init_params(key):
    # Deterministic, PyTorch-Linear-style (uniform +/- 1/sqrt(fan_in)) init.
    ks = jax.random.split(key, 6)

    def linear(kw, kb, fan_in, fan_out):
        bound = 1.0 / jnp.sqrt(fan_in)
        w = jax.random.uniform(kw, (fan_in, fan_out), jnp.float32, -bound, bound)
        b = jax.random.uniform(kb, (1, fan_out), jnp.float32, -bound, bound)
        return w, b

    w1, b1 = linear(ks[0], ks[1], F_IN, H1)
    w2, b2 = linear(ks[2], ks[3], H1, H2)
    w3, b3 = linear(ks[4], ks[5], H2, OUT)
    return w1, b1, w2, b2, w3, b3


def net1_reference(x, w1, b1, w2, b2, w3, b3):
    xm = jnp.mean(x, axis=1)
    h1 = jax.nn.relu(xm @ w1 + b1)
    h2 = jax.nn.relu(h1 @ w2 + b2)
    return jax.nn.softmax(h2 @ w3 + b3, axis=-1)


if __name__ == "__main__":
    B, T = 2, 8
    root = jax.random.PRNGKey(0)
    kx, kp = jax.random.split(root)
    x = jax.random.normal(kx, (B, T, F_IN), jnp.float32)
    params = init_params(kp)

    out = net1_forward(x, *params)
    out = jax.block_until_ready(out)

    ref = net1_reference(x, *params)   # f32 reference
    assert out.shape == (B, OUT)
    # bf16 fc1 inputs -> loosened tolerances vs the pure-f32 reference.
    assert jnp.allclose(out, ref, atol=2e-2, rtol=2e-2), (out, ref)
    assert jnp.allclose(jnp.sum(out, axis=-1), 1.0, atol=1e-3)

    print("KERNEL_OK")
</pallas_src>

<mosaic_0001>
module attributes {stable_mosaic.version = 11 : i64} {
  func.func @net1_kernel(%arg0: i32, %arg1: memref<2x10240xbf16, #tpu.memory_space<vmem>>, %arg2: memref<10240x128xbf16, #tpu.memory_space<vmem>>, %arg3: memref<1x128xf32, #tpu.memory_space<vmem>>, %arg4: memref<128x32xf32, #tpu.memory_space<vmem>>, %arg5: memref<1x32xf32, #tpu.memory_space<vmem>>, %arg6: memref<32x2xf32, #tpu.memory_space<vmem>>, %arg7: memref<1x2xf32, #tpu.memory_space<vmem>>, %arg8: memref<2x2xf32, #tpu.memory_space<vmem>>) attributes {dimension_semantics = [#tpu.dimension_semantics<parallel>], iteration_bounds = array<i64: 1>, scalar_prefetch = 0 : i64, scratch_operands = 0 : i64, tpu.core_type = #tpu.core_type<tc>, window_params = [{transform_indices = @transform_0, window_bounds = array<i64: 2, 10240>}, {pipeline_mode = #tpu.pipeline_mode<synchronous>, transform_indices = @transform_1, window_bounds = array<i64: 10240, 128>}, {pipeline_mode = #tpu.pipeline_mode<synchronous>, transform_indices = @transform_2, window_bounds = array<i64: 1, 128>}, {pipeline_mode = #tpu.pipeline_mode<synchronous>, transform_indices = @transform_3, window_bounds = array<i64: 128, 32>}, {pipeline_mode = #tpu.pipeline_mode<synchronous>, transform_indices = @transform_4, window_bounds = array<i64: 1, 32>}, {pipeline_mode = #tpu.pipeline_mode<synchronous>, transform_indices = @transform_5, window_bounds = array<i64: 32, 2>}, {pipeline_mode = #tpu.pipeline_mode<synchronous>, transform_indices = @transform_6, window_bounds = array<i64: 1, 2>}, {transform_indices = @transform_7, window_bounds = array<i64: 2, 2>}]} {
    %c0 = arith.constant 0 : index
    %c0_0 = arith.constant 0 : index
    %0 = vector.load %arg1[%c0, %c0_0] : memref<2x10240xbf16, #tpu.memory_space<vmem>>, vector<2x10240xbf16>
    %c0_1 = arith.constant 0 : index
    %c0_2 = arith.constant 0 : index
    %1 = vector.load %arg2[%c0_1, %c0_2] : memref<10240x128xbf16, #tpu.memory_space<vmem>>, vector<10240x128xbf16>
    %cst = arith.constant dense<0.000000e+00> : vector<2x128xf32>
    %2 = tpu.matmul %0, %1, %cst {dimension_numbers = #tpu.dot_dimension_numbers<[1], [0], [0], [1], [0, 0, 1, 1], [], []>} : vector<2x10240xbf16>, vector<10240x128xbf16>, vector<2x128xf32> -> vector<2x128xf32>
    %c0_3 = arith.constant 0 : index
    %c0_4 = arith.constant 0 : index
    %3 = vector.load %arg3[%c0_3, %c0_4] : memref<1x128xf32, #tpu.memory_space<vmem>>, vector<1x128xf32>
    %4 = vector.broadcast %3 : vector<1x128xf32> to vector<2x128xf32>
    %5 = arith.addf %2, %4 : vector<2x128xf32>
    %cst_5 = arith.constant 0.000000e+00 : f32
    %6 = vector.broadcast %cst_5 : f32 to vector<2x128xf32>
    %7 = arith.maximumf %5, %6 : vector<2x128xf32>
    %c0_6 = arith.constant 0 : index
    %c0_7 = arith.constant 0 : index
    %8 = vector.load %arg4[%c0_6, %c0_7] : memref<128x32xf32, #tpu.memory_space<vmem>>, vector<128x32xf32>
    %cst_8 = arith.constant dense<0.000000e+00> : vector<2x32xf32>
    %9 = tpu.matmul %7, %8, %cst_8 {dimension_numbers = #tpu.dot_dimension_numbers<[1], [0], [0], [1], [0, 0, 1, 1], [], []>} : vector<2x128xf32>, vector<128x32xf32>, vector<2x32xf32> -> vector<2x32xf32>
    %c0_9 = arith.constant 0 : index
    %c0_10 = arith.constant 0 : index
    %10 = vector.load %arg5[%c0_9, %c0_10] : memref<1x32xf32, #tpu.memory_space<vmem>>, vector<1x32xf32>
    %11 = vector.broadcast %10 : vector<1x32xf32> to vector<2x32xf32>
    %12 = arith.addf %9, %11 : vector<2x32xf32>
    %cst_11 = arith.constant 0.000000e+00 : f32
    %13 = vector.broadcast %cst_11 : f32 to vector<2x32xf32>
    %14 = arith.maximumf %12, %13 : vector<2x32xf32>
    %c0_12 = arith.constant 0 : index
    %c0_13 = arith.constant 0 : index
    %15 = vector.load %arg6[%c0_12, %c0_13] : memref<32x2xf32, #tpu.memory_space<vmem>>, vector<32x2xf32>
    %cst_14 = arith.constant dense<0.000000e+00> : vector<2x2xf32>
    %16 = tpu.matmul %14, %15, %cst_14 {dimension_numbers = #tpu.dot_dimension_numbers<[1], [0], [0], [1], [0, 0, 1, 1], [], []>} : vector<2x32xf32>, vector<32x2xf32>, vector<2x2xf32> -> vector<2x2xf32>
    %c0_15 = arith.constant 0 : index
    %c0_16 = arith.constant 0 : index
    %17 = vector.load %arg7[%c0_15, %c0_16] : memref<1x2xf32, #tpu.memory_space<vmem>>, vector<1x2xf32>
    %18 = vector.broadcast %17 : vector<1x2xf32> to vector<2x2xf32>
    %19 = arith.addf %16, %18 : vector<2x2xf32>
    %cst_17 = arith.constant dense<0xFF800000> : vector<2xf32>
    %20 = vector.multi_reduction <maximumf>, %19, %cst_17 [1] : vector<2x2xf32> to vector<2xf32>
    %21 = vector.shape_cast %20 : vector<2xf32> to vector<2x1xf32>
    %22 = vector.broadcast %21 : vector<2x1xf32> to vector<2x2xf32>
    %23 = arith.subf %19, %22 : vector<2x2xf32>
    %24 = math.exp %23 : vector<2x2xf32>
    %cst_18 = arith.constant dense<0.000000e+00> : vector<2xf32>
    %25 = vector.multi_reduction <add>, %24, %cst_18 [1] : vector<2x2xf32> to vector<2xf32>
    %26 = vector.shape_cast %25 : vector<2xf32> to vector<2x1xf32>
    %27 = vector.broadcast %26 : vector<2x1xf32> to vector<2x2xf32>
    %28 = arith.divf %24, %27 : vector<2x2xf32>
    %c0_19 = arith.constant 0 : index
    %c0_20 = arith.constant 0 : index
    %29 = vector.load %arg8[%c0_19, %c0_20] : memref<2x2xf32, #tpu.memory_space<vmem>>, vector<2x2xf32>
    tpu.vector_store %arg8[%c0_19, %c0_20], %28 {strides = array<i32>} : memref<2x2xf32, #tpu.memory_space<vmem>>, vector<2x2xf32>,
    return
  }
  func.func @transform_0(%arg0: i32) -> (i32, i32) {
    %c0_i32 = arith.constant 0 : i32
    %c0_i32_0 = arith.constant 0 : i32
    return %arg0, %c0_i32 : i32, i32
  }
  func.func @transform_1(%arg0: i32) -> (i32, i32) {
    %c0_i32 = arith.constant 0 : i32
    %c0_i32_0 = arith.constant 0 : i32
    %c0_i32_1 = arith.constant 0 : i32
    return %c0_i32, %c0_i32_0 : i32, i32
  }
  func.func @transform_2(%arg0: i32) -> (i32, i32) {
    %c0_i32 = arith.constant 0 : i32
    %c0_i32_0 = arith.constant 0 : i32
    %c0_i32_1 = arith.constant 0 : i32
    return %c0_i32, %c0_i32_0 : i32, i32
  }
  func.func @transform_3(%arg0: i32) -> (i32, i32) {
    %c0_i32 = arith.constant 0 : i32
    %c0_i32_0 = arith.constant 0 : i32
    %c0_i32_1 = arith.constant 0 : i32
    return %c0_i32, %c0_i32_0 : i32, i32
  }
  func.func @transform_4(%arg0: i32) -> (i32, i32) {
    %c0_i32 = arith.constant 0 : i32
    %c0_i32_0 = arith.constant 0 : i32
    %c0_i32_1 = arith.constant 0 : i32
    return %c0_i32, %c0_i32_0 : i32, i32
  }
  func.func @transform_5(%arg0: i32) -> (i32, i32) {
    %c0_i32 = arith.constant 0 : i32
    %c0_i32_0 = arith.constant 0 : i32
    %c0_i32_1 = arith.constant 0 : i32
    return %c0_i32, %c0_i32_0 : i32, i32
  }
  func.func @transform_6(%arg0: i32) -> (i32, i32) {
    %c0_i32 = arith.constant 0 : i32
    %c0_i32_0 = arith.constant 0 : i32
    %c0_i32_1 = arith.constant 0 : i32
    return %c0_i32, %c0_i32_0 : i32, i32
  }
  func.func @transform_7(%arg0: i32) -> (i32, i32) {
    %c0_i32 = arith.constant 0 : i32
    %c0_i32_0 = arith.constant 0 : i32
    return %arg0, %c0_i32 : i32, i32
  }
}

</mosaic_0001>

<bundles_post_ra>
// kernel: tpu_custom_call.1
= control target key start
LH: loop header
LB: loop body
LE: loop exit
PB: predicated region body
PF: predicated region fallthrough
CT: control target
= control target key end

     0   :  { %12 = vsyncpa [#allocation3], 0  ;;  %s10378_s0 = inlined_call_operand.hbm [shape: bf16[2,10240], index: 0, kind: input, shape index: {}]   ;;  %s10379_s1 = inlined_call_operand.hbm [shape: bf16[10240,128], index: 1, kind: input, shape index: {}]   ;;  %s10380_s2 = inlined_call_operand.hbm [shape: f32[1,128], index: 2, kind: input, shape index: {}]   ;;  %s10381_s3 = inlined_call_operand.vmem [shape: f32[128,32], index: 3, kind: input, shape index: {}]   ;;  %s10382_s4 = inlined_call_operand.hbm [shape: f32[1,32], index: 4, kind: input, shape index: {}]   ;;  %s10383_s5 = inlined_call_operand.vmem [shape: f32[32,2], index: 5, kind: input, shape index: {}]   ;;  %s10384_s6 = inlined_call_operand.hbm [shape: f32[1,2], index: 6, kind: input, shape index: {}]   ;;  %s10385_s7 = inlined_call_operand.hbm [shape: f32[2,2], index: 7, kind: output, shape index: {}]  }
   0x1   :  { %13 = vsyncpa [#allocation6], 0 }
   0x2   :  { %14 = vsyncpa [#allocation9], 0 }
   0x3   :  { %15 = vsyncpa [#allocation4], 0  ;;  %s10043_s24 = smov [#allocation5]   ;;  %s9903_s28 = scalar_lea.hbm %s10379_s1, 81920 }
   0x4   :  { %s31_s25 = sshll.u32 %s10043_s24, 4  ;;  %p9904_p0 = scmp.ne.s32.totalorder %s10379_s1, %s9903_s28  ;;  %s32_s25 = int_to_ptr.vmem [resolvable:$true] %s31_s25 }
   0x5   :  { %p9907_p1 = scmp.lt.u32.totalorder %s9903_s28, %s10379_s1 }
   0x7   :  { %p9909_p2 = pnand %p9907_p1, %p9904_p0 }
   0x9   :  { %9912 = shalt.err (!%p9909_p2)
}
   0xa   :  { %s9913_s10 = scalar_lea.vmem %s32_s25, 81920  ;;  %p9918_p4 = scmp.lt.s32.totalorder %s32_s25, %s32_s25 }
   0xb   :  { %p9914_p3 = scmp.ne.s32.totalorder %s32_s25, %s9913_s10  ;;  %p9919_p5 = scmp.lt.s32.totalorder %s9913_s10, %s9913_s10 }
   0xd   :  { %p9920_p6 = por %p9919_p5, %p9918_p4 }
   0xf   :  { %p9921_p7 = pnand %p9920_p6, %p9914_p3 }
  0x11   :  { %9924 = shalt.err (!%p9921_p7)
}
  0x12   :  { %s10044_s11 = smov 64   ;;  %s10045_s12 = smov 4  }
  0x13   :  { %37 = dma.hbm_to_vmem [thread:$0]  %s10379_s1, 81920, %s32_s25, [#allocation6], %s10044_s11, %s10044_s11, %s10045_s12  }
  0x14   :  { %s10046_s15 = smov [#allocation8]   ;;  %s10047_s17 = smov [#allocation2]  }
  0x15   :  { %s56_s16 = sshll.u32 %s10046_s15, 4  ;;  %s22_s18 = sshll.u32 %s10047_s17, 4  ;;  %s57_s16 = int_to_ptr.vmem [resolvable:$true] %s56_s16  ;;  %s23_s18 = int_to_ptr.vmem [resolvable:$true] %s22_s18 }
  0x16   :  { %s9925_s21 = scalar_lea.hbm %s10382_s4, 16 }
  0x17   :  { %p9926_p8 = scmp.ne.s32.totalorder %s10382_s4, %s9925_s21  ;;  %p9929_p9 = scmp.lt.u32.totalorder %s9925_s21, %s10382_s4 }
  0x19   :  { %p9931_p10 = pnand %p9929_p9, %p9926_p8 }
  0x1b   :  { %9934 = shalt.err (!%p9931_p10)
}
  0x1c   :  { %s9935_s1 = scalar_lea.vmem %s57_s16, 16  ;;  %s9939_s25 = scalar_lea.vmem %s57_s16, 32 }
  0x1d   :  { %p9936_p11 = scmp.ne.s32.totalorder %s57_s16, %s9935_s1  ;;  %p9940_p12 = scmp.lt.s32.totalorder %s57_s16, %s57_s16 }
  0x1e   :  { %p9941_p13 = scmp.lt.s32.totalorder %s9939_s25, %s9935_s1 }
  0x20   :  { %p9942_p0 = por %p9941_p13, %p9940_p12 }
  0x22   :  { %p9943_p1 = pnand %p9942_p0, %p9936_p11 }
  0x24   :  { %9946 = shalt.err (!%p9943_p1)
}
  0x25   :  { %59 = dma.hbm_to_vmem [thread:$0]  %s10382_s4, 16, %s57_s16, [#allocation9]  }
  0x26   :  { %s9947_s8 = scalar_lea.hbm %s10378_s0, 1280 }
  0x27   :  { %p9948_p2 = scmp.ne.s32.totalorder %s10378_s0, %s9947_s8  ;;  %p9951_p3 = scmp.lt.u32.totalorder %s9947_s8, %s10378_s0 }
  0x29   :  { %p9953_p4 = pnand %p9951_p3, %p9948_p2 }
  0x2b   :  { %9956 = shalt.err (!%p9953_p4)
}
  0x2c   :  { %s9957_s13 = scalar_lea.vmem %s23_s18, 1280  ;;  %p9962_p6 = scmp.lt.s32.totalorder %s23_s18, %s23_s18 }
  0x2d   :  { %p9958_p5 = scmp.ne.s32.totalorder %s23_s18, %s9957_s13  ;;  %p9963_p7 = scmp.lt.s32.totalorder %s9957_s13, %s9957_s13 }
  0x2f   :  { %p9964_p8 = por %p9963_p7, %p9962_p6 }
  0x31   :  { %p9965_p9 = pnand %p9964_p8, %p9958_p5 }
  0x33   :  { %9968 = shalt.err (!%p9965_p9)
}
  0x34   :  { %25 = dma.hbm_to_vmem [thread:$0]  %s10378_s0, 1280, %s23_s18, [#allocation3]  }
  0x35   :  { %s10048_s15 = smov [#allocation7]   ;;  %s10049_s17 = smov [#allocation10]  }
  0x36   :  { %s44_s16 = sshll.u32 %s10048_s15, 4  ;;  %s68_s19 = sshll.u32 %s10049_s17, 4  ;;  %s45_s16 = int_to_ptr.vmem [resolvable:$true] %s44_s16  ;;  %s69_s19 = int_to_ptr.vmem [resolvable:$true] %s68_s19 }
  0x37   :  { %s9969_s22 = scalar_lea.hbm %s10380_s2, 16 }
  0x38   :  { %p9970_p10 = scmp.ne.s32.totalorder %s10380_s2, %s9969_s22  ;;  %p9973_p11 = scmp.lt.u32.totalorder %s9969_s22, %s10380_s2 }
  0x3a   :  { %p9975_p12 = pnand %p9973_p11, %p9970_p10 }
  0x3c   :  { %9978 = shalt.err (!%p9975_p12)
}
  0x3d   :  { %s9979_s0 = scalar_lea.vmem %s45_s16, 16  ;;  %s9983_s18 = scalar_lea.vmem %s45_s16, 32 }
  0x3e   :  { %p9980_p13 = scmp.ne.s32.totalorder %s45_s16, %s9979_s0  ;;  %p9984_p0 = scmp.lt.s32.totalorder %s45_s16, %s45_s16 }
  0x3f   :  { %p9985_p1 = scmp.lt.s32.totalorder %s9983_s18, %s9979_s0 }
  0x41   :  { %p9986_p2 = por %p9985_p1, %p9984_p0 }
  0x43   :  { %p9987_p3 = pnand %p9986_p2, %p9980_p13 }
  0x45   :  { %9990 = shalt.err (!%p9987_p3)
}
  0x46   :  { %47 = dma.hbm_to_vmem [thread:$0]  %s10380_s2, 16, %s45_s16, [#allocation6]  }
  0x47   :  { %s9991_s30 = scalar_lea.hbm %s10384_s6, 16 }
  0x48   :  { %p9992_p4 = scmp.ne.s32.totalorder %s10384_s6, %s9991_s30  ;;  %p9995_p5 = scmp.lt.u32.totalorder %s9991_s30, %s10384_s6 }
  0x4a   :  { %p9997_p6 = pnand %p9995_p5, %p9992_p4 }
  0x4c   :  { %10000 = shalt.err (!%p9997_p6)
}
  0x4d   :  { %s10001_s12 = scalar_lea.vmem %s69_s19, 16  ;;  %s10005_s13 = scalar_lea.vmem %s69_s19, 32 }
  0x4e   :  { %p10002_p7 = scmp.ne.s32.totalorder %s69_s19, %s10001_s12  ;;  %p10006_p8 = scmp.lt.s32.totalorder %s69_s19, %s69_s19 }
  0x4f   :  { %p10007_p9 = scmp.lt.s32.totalorder %s10005_s13, %s10001_s12 }
  0x51   :  { %p10008_p10 = por %p10007_p9, %p10006_p8 }
  0x53   :  { %p10009_p11 = pnand %p10008_p10, %p10002_p7 }
  0x55   :  { %10012 = shalt.err (!%p10009_p11)
}
  0x56   :  { %71 = dma.hbm_to_vmem [thread:$0]  %s10384_s6, 16, %s69_s19, [#allocation9]  }
  0x57   :  { %10035 = dma.done.wait [#allocation3], 1280  }
  0x58   :  { %10036 = vsyncadd [#allocation3], 4294966016 }
  0x59   :  { %10037 = dma.done.wait [#allocation6], 81936  }
  0x5a   :  { %10038 = vsyncadd [#allocation6], 4294885360 }
  0x5b   :  { %10039 = dma.done.wait [#allocation9], 32  }
  0x5c   :  { %10040 = vsyncadd [#allocation9], 4294967264  ;;  %v9249_v0 = vld [vmem:[#allocation5 + $0x40] sm:$0xff]   ;;  %v9253_v4 = vld [vmem:[#allocation5 + $0x48] sm:$0xff]   ;;  %v10050_v22 = vmov 1966171168   ;;  %v1399_v24 = vlaneseq }
  0x5d   :  { %v9250_v1 = vld [vmem:[#allocation5 + $0xc0] sm:$0xff]   ;;  %8259 = vmatprep.subr.bf16.mxu0 %v9249_v0  ;;  %v9254_v5 = vld [vmem:[#allocation5 + $0xc8] sm:$0xff]   ;;  %v9257_v8 = vld [vmem:[#allocation5 + $0x50] sm:$0xff]   ;;  %v1397_v23 = vunpack.c.l.s4 %v10050_v22  ;;  %vm10052_vm0 = vmmov 0   ;;  %vm7511_vm1 = vcmask 261120   ;;  %vm7585_vm2 = vcmask 9216  }
  0x5e   :  { %v9251_v2 = vld [vmem:[#allocation5] sm:$0xff]   ;;  %8281 = vmatprep.subr.bf16.mxu1 %v9250_v1  ;;  %v9255_v6 = vld [vmem:[#allocation5 + $0x8] sm:$0xff]   ;;  %v9258_v9 = vld [vmem:[#allocation5 + $0xd0] sm:$0xff]   ;;  %v1400_v30 = vshrl.u32 %v1399_v24, 7 }
  0x5f   :  { %v9252_v3 = vld [vmem:[#allocation5 + $0x80] sm:$0xff]   ;;  %8260 = vmatpush3.bf16.msra.mxu0 %v9251_v2  ;;  %v9256_v7 = vld [vmem:[#allocation5 + $0x88] sm:$0xff]   ;;  %v9259_v10 = vld [vmem:[#allocation5 + $0x10] sm:$0xff]   ;;  %v1398_v29 = vunpack.c.0.s8 %v1397_v23 }
  0x60   :  { %8282 = vmatpush3.bf16.msra.mxu1 %v9252_v3  ;;  %8261 = vmatprep.subr.bf16.mxu0 %v9253_v4  ;;  %v9260_v11 = vld [vmem:[#allocation5 + $0x90] sm:$0xff]   ;;  %v9261_v12 = vld [vmem:[#allocation5 + $0x58] sm:$0xff]   ;;  %v9265_v16 = vld [vmem:[#allocation5 + $0x60] sm:$0xff]  }
  0x61   :  { %8283 = vmatprep.subr.bf16.mxu1 %v9254_v5  ;;  %v9262_v13 = vld [vmem:[#allocation5 + $0xd8] sm:$0xff]   ;;  %v9266_v17 = vld [vmem:[#allocation5 + $0xe0] sm:$0xff]   ;;  %v9269_v20 = vld [vmem:[#allocation5 + $0x68] sm:$0xff]   ;;  %v10155_v35 = vsub.s32 %v1398_v29, %v1400_v30 }
  0x62   :  { %v9263_v14 = vld [vmem:[#allocation5 + $0x18] sm:$0xff]   ;;  %v9267_v18 = vld [vmem:[#allocation5 + $0x20] sm:$0xff]   ;;  %v9270_v21 = vld [vmem:[#allocation5 + $0xe8] sm:$0xff]  }
  0x63   :  { %8262 = vmatpush3.bf16.msra.mxu0 %v9255_v6  ;;  %v9264_v15 = vld [vmem:[#allocation5 + $0x98] sm:$0xff]   ;;  %v9268_v19 = vld [vmem:[#allocation5 + $0xa0] sm:$0xff]   ;;  %v9271_v25 = vld [vmem:[#allocation5 + $0x28] sm:$0xff]  }
  0x64   :  { %8284 = vmatpush3.bf16.msra.mxu1 %v9256_v7  ;;  %8263 = vmatprep.subr.bf16.mxu0 %v9257_v8  ;;  %v9272_v26 = vld [vmem:[#allocation5 + $0xa8] sm:$0xff]   ;;  %v9273_v27 = vld [vmem:[#allocation5 + $0x70] sm:$0xff]   ;;  %v9277_v33 = vld [vmem:[#allocation5 + $0x78] sm:$0xff]  }
  0x65   :  { %8285 = vmatprep.subr.bf16.mxu1 %v9258_v9  ;;  %v9274_v28 = vld [vmem:[#allocation5 + $0xf0] sm:$0xff]   ;;  %v9278_v34 = vld [vmem:[#allocation5 + $0xf8] sm:$0xff]   ;;  %v9282_v41 = vld [vmem:[#allocation5 + $0x140] sm:$0xff]  }
  0x66   :  { %v9275_v31 = vld [vmem:[#allocation5 + $0x30] sm:$0xff]   ;;  %v9279_v36 = vld [vmem:[#allocation5 + $0x38] sm:$0xff]   ;;  %v9283_v42 = vld [vmem:[#allocation5 + $0x1c0] sm:$0xff]  }
  0x67   :  { %8264 = vmatpush3.bf16.msra.mxu0 %v9259_v10  ;;  %v9276_v32 = vld [vmem:[#allocation5 + $0xb0] sm:$0xff]   ;;  %v9280_v37 = vld [vmem:[#allocation5 + $0xb8] sm:$0xff]   ;;  %v9284_v46 = vld [vmem:[#allocation5 + $0x100] sm:$0xff]  }
  0x68   :  { %8286 = vmatpush3.bf16.msra.mxu1 %v9260_v11  ;;  %8265 = vmatprep.subr.bf16.mxu0 %v9261_v12  ;;  %v88_v38 = vld [vmem:[#allocation2] sm:$0xff]  ;;  %v9285_v48 = vld [vmem:[#allocation5 + $0x180] sm:$0xff]   ;;  %v9286_v51 = vld [vmem:[#allocation5 + $0x148] sm:$0xff]  }
  0x69   :  { %8287 = vmatprep.subr.bf16.mxu1 %v9262_v13  ;;  %v1395_v39 = vcombine.high %v88_v38, %v88_v38  ;;  %v1402_v40 = vrot.slane %v88_v38, %v10155_v35  ;;  %v9287_v53 = vld [vmem:[#allocation5 + $0x1c8] sm:$0xff]   ;;  %v9290_v58 = vld [vmem:[#allocation5 + $0x150] sm:$0xff]   ;;  %v9294_v62 = vld [vmem:[#allocation5 + $0x158] sm:$0xff]  }
  0x6a   :  { %v9288_v55 = vld [vmem:[#allocation5 + $0x108] sm:$0xff]   ;;  %v9291_v59 = vld [vmem:[#allocation5 + $0x1d0] sm:$0xff]   ;;  %v9295_v63 = vld [vmem:[#allocation5 + $0x1d8] sm:$0xff]  }
  0x6b   :  { %8266 = vmatpush3.bf16.msra.mxu0 %v9263_v14  ;;  %v1410_v43 = vcombine.high %v1402_v40, %v1402_v40  ;;  %v1418_v44 = vrot.slane %v1402_v40, %v10155_v35  ;;  %v10160_v45 = vrot.slane %v1395_v39, %v10155_v35  ;;  %v9289_v56 = vld [vmem:[#allocation5 + $0x188] sm:$0xff]   ;;  %v9292_v60 = vld [vmem:[#allocation5 + $0x110] sm:$0xff]   ;;  %v9296_v0 = vld [vmem:[#allocation5 + $0x118] sm:$0xff]  }
  0x6c   :  { %8288 = vmatpush3.bf16.msra.mxu1 %v9264_v15  ;;  %8267 = vmatprep.subr.bf16.mxu0 %v9265_v16  ;;  %v9293_v61 = vld [vmem:[#allocation5 + $0x190] sm:$0xff]   ;;  %v9297_v1 = vld [vmem:[#allocation5 + $0x198] sm:$0xff]   ;;  %v9298_v2 = vld [vmem:[#allocation5 + $0x160] sm:$0xff]  }
  0x6d   :  { %8289 = vmatprep.subr.bf16.mxu1 %v9266_v17  ;;  %v1432_v47 = vrot.slane %v1410_v43, %v10155_v35  ;;  %v1411_v49 = vcombine.high %v10160_v45, %v10160_v45  ;;  %v1440_v50 = vcombine.high %v1418_v44, %v1418_v44  ;;  %v9299_v3 = vld [vmem:[#allocation5 + $0x1e0] sm:$0xff]   ;;  %v9302_v6 = vld [vmem:[#allocation5 + $0x168] sm:$0xff]   ;;  %v9306_v10 = vld [vmem:[#allocation5 + $0x170] sm:$0xff]  }
  0x6e   :  { %v9300_v4 = vld [vmem:[#allocation5 + $0x120] sm:$0xff]   ;;  %v9303_v7 = vld [vmem:[#allocation5 + $0x1e8] sm:$0xff]   ;;  %v9307_v11 = vld [vmem:[#allocation5 + $0x1f0] sm:$0xff]  }
  0x6f   :  { %8268 = vmatpush3.bf16.msra.mxu0 %v9267_v18  ;;  %5837 = vmatprep.mubr.bf16.mxu0 %v1432_v47  ;;  %v1442_v52 = vcombine.high %v1432_v47, %v1432_v47  ;;  %v1439_v54 = vrot.slane %v1411_v49, %v10155_v35  ;;  %v9301_v5 = vld [vmem:[#allocation5 + $0x1a0] sm:$0xff]   ;;  %v9304_v8 = vld [vmem:[#allocation5 + $0x128] sm:$0xff]   ;;  %v9308_v12 = vld [vmem:[#allocation5 + $0x130] sm:$0xff]   ;;  %v1425_v18 = vrot.slane %v10160_v45, %v10155_v35 }
  0x70   :  { %8290 = vmatpush3.bf16.msra.mxu1 %v9268_v19  ;;  %8269 = vmatprep.subr.bf16.mxu0 %v9269_v20  ;;  %v9305_v9 = vld [vmem:[#allocation5 + $0x1a8] sm:$0xff]   ;;  %v9309_v13 = vld [vmem:[#allocation5 + $0x1b0] sm:$0xff]   ;;  %v9310_v14 = vld [vmem:[#allocation5 + $0x178] sm:$0xff]  }
  0x71   :  { %8291 = vmatprep.subr.bf16.mxu1 %v9270_v21  ;;  %5877 = vmatprep.mubr.bf16.mxu1 %v1442_v52  ;;  %v1443_v57 = vcombine.high %v1439_v54, %v1439_v54  ;;  %v9311_v15 = vld [vmem:[#allocation5 + $0x1f8] sm:$0xff]   ;;  %v9314_v19 = vld [vmem:[#allocation5 + $0x240] sm:$0xff]   ;;  %v1441_v23 = vcombine.high %v1425_v18, %v1425_v18  ;;  %v9318_v24 = vld [vmem:[#allocation5 + $0x248] sm:$0xff]  }
  0x72   :  { %v9312_v16 = vld [vmem:[#allocation5 + $0x138] sm:$0xff]   ;;  %v9315_v20 = vld [vmem:[#allocation5 + $0x2c0] sm:$0xff]   ;;  %v9323_v29 = vld [vmem:[#allocation5 + $0x2d0] sm:$0xff]  }
  0x73   :  { %8270 = vmatpush3.bf16.msra.mxu0 %v9271_v25  ;;  %v9313_v17 = vld [vmem:[#allocation5 + $0x1b8] sm:$0xff]   ;;  %v9316_v21 = vld [vmem:[#allocation5 + $0x200] sm:$0xff]   ;;  %v9319_v25 = vld [vmem:[#allocation5 + $0x2c8] sm:$0xff]  }
  0x74   :  { %8292 = vmatpush3.bf16.msra.mxu1 %v9272_v26  ;;  %8271 = vmatprep.subr.bf16.mxu0 %v9273_v27  ;;  %v9317_v22 = vld [vmem:[#allocation5 + $0x280] sm:$0xff]   ;;  %v9320_v26 = vld [vmem:[#allocation5 + $0x208] sm:$0xff]   ;;  %v9324_v30 = vld [vmem:[#allocation5 + $0x210] sm:$0xff]  }
  0x75   :  { %8293 = vmatprep.subr.bf16.mxu1 %v9274_v28  ;;  %v9321_v27 = vld [vmem:[#allocation5 + $0x288] sm:$0xff]   ;;  %v9322_v28 = vld [vmem:[#allocation5 + $0x250] sm:$0xff]   ;;  %v9331_v38 = vld [vmem:[#allocation5 + $0x2e0] sm:$0xff]  }
  0x76   :  { %v9332_v39 = vld [vmem:[#allocation5 + $0x220] sm:$0xff]   ;;  %v9336_v43 = vld [vmem:[#allocation5 + $0x228] sm:$0xff]   ;;  %v9338_v45 = vld [vmem:[#allocation5 + $0x270] sm:$0xff]  }
  0x77   :  { %8272 = vmatpush3.bf16.msra.mxu0 %v9275_v31  ;;  %v9325_v31 = vld [vmem:[#allocation5 + $0x290] sm:$0xff]   ;;  %v9333_v40 = vld [vmem:[#allocation5 + $0x2a0] sm:$0xff]   ;;  %v9342_v49 = vld [vmem:[#allocation5 + $0x278] sm:$0xff]  }
  0x78   :  { %8294 = vmatpush3.bf16.msra.mxu1 %v9276_v32  ;;  %8273 = vmatprep.subr.bf16.mxu0 %v9277_v33  ;;  %v9326_v32 = vld [vmem:[#allocation5 + $0x258] sm:$0xff]   ;;  %v9340_v47 = vld [vmem:[#allocation5 + $0x230] sm:$0xff]  }
  0x79   :  { %8295 = vmatprep.subr.bf16.mxu1 %v9278_v34  ;;  %v9327_v33 = vld [vmem:[#allocation5 + $0x2d8] sm:$0xff]  }
  0x7a   :  { %v9328_v34 = vld [vmem:[#allocation5 + $0x218] sm:$0xff]  }
  0x7b   :  { %8274 = vmatpush3.bf16.msra.mxu0 %v9279_v36  ;;  %v9329_v36 = vld [vmem:[#allocation5 + $0x298] sm:$0xff]  }
  0x7c   :  { %8296 = vmatpush3.bf16.msra.mxu1 %v9280_v37  ;;  %8303 = vmatprep.subr.bf16.mxu0 %v9282_v41  ;;  %v9330_v37 = vld [vmem:[#allocation5 + $0x260] sm:$0xff]   ;;  %v9334_v41 = vld [vmem:[#allocation5 + $0x268] sm:$0xff]   ;;  %v89_v52 = vld [vmem:[#allocation2 + $0x8] sm:$0xff] }
  0x7d   :  { %8325 = vmatprep.subr.bf16.mxu1 %v9283_v42  ;;  %v9335_v42 = vld [vmem:[#allocation5 + $0x2e8] sm:$0xff]  }
  0x7e   :  { %5838 = vmatmul.mubr.bf16.vlgmr.msra.gmra.mrb[0].mxu0 %v1418_v44  ;;  %v9337_v44 = vld [vmem:[#allocation5 + $0x2a8] sm:$0xff]  }
  0x7f   :  { %8304 = vmatpush3.bf16.msra.mxu0 %v9284_v46  ;;  %5878 = vmatmul.mubr.bf16.vlgmr.msra.gmra.mrb[0].mxu1 %v1440_v50  ;;  %v9339_v46 = vld [vmem:[#allocation5 + $0x2f0] sm:$0xff]   ;;  %v9343_v50 = vld [vmem:[#allocation5 + $0x2f8] sm:$0xff]  }
  0x80   :  { %8305 = vmatprep.subr.bf16.mxu0 %v9286_v51  ;;  %8326 = vmatpush3.bf16.msra.mxu1 %v9285_v48  ;;  %v9341_v48 = vld [vmem:[#allocation5 + $0x2b0] sm:$0xff]   ;;  %v9344_v51 = vld [vmem:[#allocation5 + $0x238] sm:$0xff]  }
  0x81   :  { %5917 = vmatprep.mubr.bf16.mxu0 %v1439_v54  ;;  %8327 = vmatprep.subr.bf16.mxu1 %v9287_v53  ;;  %v9345_v53 = vld [vmem:[#allocation5 + $0x2b8] sm:$0xff]   ;;  %v1451_v54 = vrot.slane %v89_v52, %v10155_v35 }
  0x82   :  { %5957 = vmatprep.mubr.bf16.mxu1 %v1443_v57 }
  0x83   :  { %8306 = vmatpush3.bf16.msra.mxu0 %v9288_v55  ;;  %v1444_v55 = vcombine.high %v89_v52, %v89_v52  ;;  %v1459_v57 = vcombine.high %v1451_v54, %v1451_v54  ;;  %v9395_v52 = vld [vmem:[#allocation5 + $0x460] sm:$0xff]  }
  0x84   :  { %8307 = vmatprep.subr.bf16.mxu0 %v9290_v58  ;;  %8328 = vmatpush3.bf16.msra.mxu1 %v9289_v56  ;;  %v9346_v56 = vld [vmem:[#allocation5 + $0x340] sm:$0xff]   ;;  %v1467_v58 = vrot.slane %v1451_v54, %v10155_v35 }
  0x85   :  { %8329 = vmatprep.subr.bf16.mxu1 %v9291_v59  ;;  %v9347_v59 = vld [vmem:[#allocation5 + $0x3c0] sm:$0xff]  }
  0x86   :  { %v9397_v54 = vld [vmem:[#allocation5 + $0x420] sm:$0xff]  }
  0x87   :  { %8308 = vmatpush3.bf16.msra.mxu0 %v9292_v60  ;;  %v10171_v60 = vrot.slane %v1444_v55, %v10155_v35  ;;  %v9398_v55 = vld [vmem:[#allocation5 + $0x4a0] sm:$0xff]  }
  0x88   :  { %8309 = vmatprep.subr.bf16.mxu0 %v9294_v62  ;;  %8330 = vmatpush3.bf16.msra.mxu1 %v9293_v61  ;;  %v9348_v61 = vld [vmem:[#allocation5 + $0x300] sm:$0xff]   ;;  %v1481_v62 = vrot.slane %v1459_v57, %v10155_v35  ;;  %v9400_v57 = vld [vmem:[#allocation5 + $0x4e8] sm:$0xff]  }
  0x89   :  { %8331 = vmatprep.subr.bf16.mxu1 %v9295_v63  ;;  %v9349_v63 = vld [vmem:[#allocation5 + $0x380] sm:$0xff]  }
  0x8b   :  { %8310 = vmatpush3.bf16.msra.mxu0 %v9296_v0  ;;  %v1460_v0 = vcombine.high %v10171_v60, %v10171_v60 }
  0x8c   :  { %8311 = vmatprep.subr.bf16.mxu0 %v9298_v2  ;;  %8332 = vmatpush3.bf16.msra.mxu1 %v9297_v1  ;;  %v1489_v1 = vcombine.high %v1467_v58, %v1467_v58  ;;  %v9350_v2 = vld [vmem:[#allocation5 + $0x348] sm:$0xff]  }
  0x8d   :  { %8333 = vmatprep.subr.bf16.mxu1 %v9299_v3  ;;  %v1491_v3 = vcombine.high %v1481_v62, %v1481_v62 }
  0x8f   :  { %8312 = vmatpush3.bf16.msra.mxu0 %v9300_v4  ;;  %v9351_v4 = vld [vmem:[#allocation5 + $0x3c8] sm:$0xff]  }
  0x90   :  { %8313 = vmatprep.subr.bf16.mxu0 %v9302_v6  ;;  %8334 = vmatpush3.bf16.msra.mxu1 %v9301_v5  ;;  %v1488_v5 = vrot.slane %v1460_v0, %v10155_v35  ;;  %v9352_v6 = vld [vmem:[#allocation5 + $0x308] sm:$0xff]   ;;  %v9407_v0 = vld [vmem:[#allocation5 + $0x478] sm:$0xff]  }
  0x91   :  { %8335 = vmatprep.subr.bf16.mxu1 %v9303_v7  ;;  %v9353_v7 = vld [vmem:[#allocation5 + $0x388] sm:$0xff]  }
  0x93   :  { %8314 = vmatpush3.bf16.msra.mxu0 %v9304_v8  ;;  %v1492_v8 = vcombine.high %v1488_v5, %v1488_v5 }
  0x94   :  { %8315 = vmatprep.subr.bf16.mxu0 %v9306_v10  ;;  %8336 = vmatpush3.bf16.msra.mxu1 %v9305_v9  ;;  %v9354_v9 = vld [vmem:[#allocation5 + $0x350] sm:$0xff]  }
  0x95   :  { %8337 = vmatprep.subr.bf16.mxu1 %v9307_v11  ;;  %v9355_v10 = vld [vmem:[#allocation5 + $0x3d0] sm:$0xff]  }
  0x96   :  { %v9356_v11 = vld [vmem:[#allocation5 + $0x310] sm:$0xff]  }
  0x97   :  { %8316 = vmatpush3.bf16.msra.mxu0 %v9308_v12  ;;  %v9357_v12 = vld [vmem:[#allocation5 + $0x390] sm:$0xff]  }
  0x98   :  { %8317 = vmatprep.subr.bf16.mxu0 %v9310_v14  ;;  %8338 = vmatpush3.bf16.msra.mxu1 %v9309_v13  ;;  %v9358_v13 = vld [vmem:[#allocation5 + $0x358] sm:$0xff]  }
  0x99   :  { %8339 = vmatprep.subr.bf16.mxu1 %v9311_v15  ;;  %v9359_v14 = vld [vmem:[#allocation5 + $0x3d8] sm:$0xff]  }
  0x9a   :  { %v9360_v15 = vld [vmem:[#allocation5 + $0x318] sm:$0xff]  }
  0x9b   :  { %8318 = vmatpush3.bf16.msra.mxu0 %v9312_v16  ;;  %v9361_v16 = vld [vmem:[#allocation5 + $0x398] sm:$0xff]  }
  0x9c   :  { %8347 = vmatprep.subr.bf16.mxu0 %v9314_v19  ;;  %8340 = vmatpush3.bf16.msra.mxu1 %v9313_v17  ;;  %v9362_v17 = vld [vmem:[#allocation5 + $0x360] sm:$0xff]  }
  0x9d   :  { %8369 = vmatprep.subr.bf16.mxu1 %v9315_v20  ;;  %v9364_v19 = vld [vmem:[#allocation5 + $0x320] sm:$0xff]  }
  0x9e   :  { %5918 = vmatmul.mubr.bf16.vlgmr.msra.gmra.mrb[4].mxu0 %v1425_v18  ;;  %v9363_v18 = vld [vmem:[#allocation5 + $0x3e0] sm:$0xff]  }
  0x9f   :  { %8348 = vmatpush3.bf16.msra.mxu0 %v9316_v21  ;;  %5958 = vmatmul.mubr.bf16.vlgmr.msra.gmra.mrb[4].mxu1 %v1441_v23  ;;  %v9365_v20 = vld [vmem:[#allocation5 + $0x3a0] sm:$0xff]   ;;  %v9366_v21 = vld [vmem:[#allocation5 + $0x368] sm:$0xff]  }
  0xa0   :  { %8349 = vmatprep.subr.bf16.mxu0 %v9318_v24  ;;  %8370 = vmatpush3.bf16.msra.mxu1 %v9317_v22  ;;  %v9367_v22 = vld [vmem:[#allocation5 + $0x3e8] sm:$0xff]  }
  0xa1   :  { %8371 = vmatprep.subr.bf16.mxu1 %v9319_v25  ;;  %5997 = vmatprep.mubr.bf16.mxu0 %v1481_v62  ;;  %v9368_v23 = vld [vmem:[#allocation5 + $0x328] sm:$0xff]   ;;  %v9370_v25 = vld [vmem:[#allocation5 + $0x370] sm:$0xff]  }
  0xa2   :  { %6037 = vmatprep.mubr.bf16.mxu1 %v1491_v3  ;;  %v9369_v24 = vld [vmem:[#allocation5 + $0x3a8] sm:$0xff]   ;;  %v9405_v62 = vld [vmem:[#allocation5 + $0x430] sm:$0xff]   ;;  %v90_v3 = vld [vmem:[#allocation2 + $0x10] sm:$0xff] }
  0xa3   :  { %8350 = vmatpush3.bf16.msra.mxu0 %v9320_v26  ;;  %v9371_v26 = vld [vmem:[#allocation5 + $0x3f0] sm:$0xff]  }
  0xa4   :  { %8351 = vmatprep.subr.bf16.mxu0 %v9322_v28  ;;  %8372 = vmatpush3.bf16.msra.mxu1 %v9321_v27  ;;  %v9372_v27 = vld [vmem:[#allocation5 + $0x330] sm:$0xff]  }
  0xa5   :  { %8373 = vmatprep.subr.bf16.mxu1 %v9323_v29  ;;  %v9373_v28 = vld [vmem:[#allocation5 + $0x3b0] sm:$0xff]   ;;  %v9374_v29 = vld [vmem:[#allocation5 + $0x378] sm:$0xff]  }
  0xa7   :  { %8352 = vmatpush3.bf16.msra.mxu0 %v9324_v30  ;;  %v9375_v30 = vld [vmem:[#allocation5 + $0x3f8] sm:$0xff]  }
  0xa8   :  { %8353 = vmatprep.subr.bf16.mxu0 %v9326_v32  ;;  %8374 = vmatpush3.bf16.msra.mxu1 %v9325_v31  ;;  %v9376_v31 = vld [vmem:[#allocation5 + $0x338] sm:$0xff]  }
  0xa9   :  { %8375 = vmatprep.subr.bf16.mxu1 %v9327_v33  ;;  %v9377_v32 = vld [vmem:[#allocation5 + $0x3b8] sm:$0xff]   ;;  %v1474_v33 = vrot.slane %v10171_v60, %v10155_v35  ;;  %v9403_v60 = vld [vmem:[#allocation5 + $0x470] sm:$0xff]  }
  0xab   :  { %8354 = vmatpush3.bf16.msra.mxu0 %v9328_v34  ;;  %v9379_v34 = vld [vmem:[#allocation5 + $0x440] sm:$0xff]  }
  0xac   :  { %8355 = vmatprep.subr.bf16.mxu0 %v9330_v37  ;;  %8376 = vmatpush3.bf16.msra.mxu1 %v9329_v36  ;;  %v9380_v36 = vld [vmem:[#allocation5 + $0x4c0] sm:$0xff]  }
  0xad   :  { %8377 = vmatprep.subr.bf16.mxu1 %v9331_v38  ;;  %v9381_v37 = vld [vmem:[#allocation5 + $0x400] sm:$0xff]  }
  0xae   :  { %v9382_v38 = vld [vmem:[#allocation5 + $0x480] sm:$0xff]  }
  0xaf   :  { %8356 = vmatpush3.bf16.msra.mxu0 %v9332_v39  ;;  %v1490_v39 = vcombine.high %v1474_v33, %v1474_v33 }
  0xb0   :  { %8357 = vmatprep.subr.bf16.mxu0 %v9334_v41  ;;  %8378 = vmatpush3.bf16.msra.mxu1 %v9333_v40  ;;  %v9383_v40 = vld [vmem:[#allocation5 + $0x448] sm:$0xff]  }
  0xb1   :  { %8379 = vmatprep.subr.bf16.mxu1 %v9335_v42  ;;  %v9384_v41 = vld [vmem:[#allocation5 + $0x4c8] sm:$0xff]  }
  0xb2   :  { %v9385_v42 = vld [vmem:[#allocation5 + $0x408] sm:$0xff]  }
  0xb3   :  { %8358 = vmatpush3.bf16.msra.mxu0 %v9336_v43  ;;  %v9386_v43 = vld [vmem:[#allocation5 + $0x488] sm:$0xff]  }
  0xb4   :  { %8359 = vmatprep.subr.bf16.mxu0 %v9338_v45  ;;  %8380 = vmatpush3.bf16.msra.mxu1 %v9337_v44  ;;  %v9387_v44 = vld [vmem:[#allocation5 + $0x450] sm:$0xff]  }
  0xb5   :  { %8381 = vmatprep.subr.bf16.mxu1 %v9339_v46  ;;  %v9388_v45 = vld [vmem:[#allocation5 + $0x4d0] sm:$0xff]  }
  0xb6   :  { %v9389_v46 = vld [vmem:[#allocation5 + $0x410] sm:$0xff]  }
  0xb7   :  { %8360 = vmatpush3.bf16.msra.mxu0 %v9340_v47  ;;  %v9390_v47 = vld [vmem:[#allocation5 + $0x490] sm:$0xff]  }
  0xb8   :  { %8361 = vmatprep.subr.bf16.mxu0 %v9342_v49  ;;  %8382 = vmatpush3.bf16.msra.mxu1 %v9341_v48  ;;  %v9391_v48 = vld [vmem:[#allocation5 + $0x458] sm:$0xff]  }
  0xb9   :  { %8383 = vmatprep.subr.bf16.mxu1 %v9343_v50  ;;  %v9392_v49 = vld [vmem:[#allocation5 + $0x4d8] sm:$0xff]  }
  0xba   :  { %v9393_v50 = vld [vmem:[#allocation5 + $0x418] sm:$0xff]  }
  0xbb   :  { %8362 = vmatpush3.bf16.msra.mxu0 %v9344_v51  ;;  %v9394_v51 = vld [vmem:[#allocation5 + $0x498] sm:$0xff]  }
  0xbc   :  { %8391 = vmatprep.subr.bf16.mxu0 %v9346_v56  ;;  %8384 = vmatpush3.bf16.msra.mxu1 %v9345_v53  ;;  %v9396_v53 = vld [vmem:[#allocation5 + $0x4e0] sm:$0xff]   ;;  %v9399_v56 = vld [vmem:[#allocation5 + $0x468] sm:$0xff]  }
  0xbd   :  { %8413 = vmatprep.subr.bf16.mxu1 %v9347_v59  ;;  %v9402_v59 = vld [vmem:[#allocation5 + $0x4a8] sm:$0xff]  }
  0xbe   :  { %5998 = vmatmul.mubr.bf16.vlgmr.msra.gmra.mrb[8].mxu0 %v1467_v58  ;;  %v9401_v58 = vld [vmem:[#allocation5 + $0x428] sm:$0xff]  }
  0xbf   :  { %8392 = vmatpush3.bf16.msra.mxu0 %v9348_v61  ;;  %6038 = vmatmul.mubr.bf16.vlgmr.msra.gmra.mrb[8].mxu1 %v1489_v1  ;;  %v9404_v61 = vld [vmem:[#allocation5 + $0x4f0] sm:$0xff]   ;;  %v9408_v1 = vld [vmem:[#allocation5 + $0x4f8] sm:$0xff]  }
  0xc0   :  { %8393 = vmatprep.subr.bf16.mxu0 %v9350_v2  ;;  %8414 = vmatpush3.bf16.msra.mxu1 %v9349_v63  ;;  %v9406_v63 = vld [vmem:[#allocation5 + $0x4b0] sm:$0xff]   ;;  %v9409_v2 = vld [vmem:[#allocation5 + $0x438] sm:$0xff]  }
  0xc1   :  { %6077 = vmatprep.mubr.bf16.mxu0 %v1488_v5  ;;  %8415 = vmatprep.subr.bf16.mxu1 %v9351_v4  ;;  %v9410_v4 = vld [vmem:[#allocation5 + $0x4b8] sm:$0xff]   ;;  %v1500_v5 = vrot.slane %v90_v3, %v10155_v35 }
  0xc2   :  { %6117 = vmatprep.mubr.bf16.mxu1 %v1492_v8 }
  0xc3   :  { %8394 = vmatpush3.bf16.msra.mxu0 %v9352_v6  ;;  %v1493_v6 = vcombine.high %v90_v3, %v90_v3  ;;  %v1508_v8 = vcombine.high %v1500_v5, %v1500_v5  ;;  %v9460_v3 = vld [vmem:[#allocation5 + $0x660] sm:$0xff]  }
  0xc4   :  { %8395 = vmatprep.subr.bf16.mxu0 %v9354_v9  ;;  %8416 = vmatpush3.bf16.msra.mxu1 %v9353_v7  ;;  %v9411_v7 = vld [vmem:[#allocation5 + $0x540] sm:$0xff]   ;;  %v1516_v9 = vrot.slane %v1500_v5, %v10155_v35 }
  0xc5   :  { %8417 = vmatprep.subr.bf16.mxu1 %v9355_v10  ;;  %v9412_v10 = vld [vmem:[#allocation5 + $0x5c0] sm:$0xff]  }
  0xc6   :  { %v9462_v5 = vld [vmem:[#allocation5 + $0x620] sm:$0xff]  }
  0xc7   :  { %8396 = vmatpush3.bf16.msra.mxu0 %v9356_v11  ;;  %v10182_v11 = vrot.slane %v1493_v6, %v10155_v35  ;;  %v9463_v6 = vld [vmem:[#allocation5 + $0x6a0] sm:$0xff]  }
  0xc8   :  { %8397 = vmatprep.subr.bf16.mxu0 %v9358_v13  ;;  %8418 = vmatpush3.bf16.msra.mxu1 %v9357_v12  ;;  %v9413_v12 = vld [vmem:[#allocation5 + $0x500] sm:$0xff]   ;;  %v1530_v13 = vrot.slane %v1508_v8, %v10155_v35  ;;  %v9465_v8 = vld [vmem:[#allocation5 + $0x6e8] sm:$0xff]  }
  0xc9   :  { %8419 = vmatprep.subr.bf16.mxu1 %v9359_v14  ;;  %v9414_v14 = vld [vmem:[#allocation5 + $0x580] sm:$0xff]  }
  0xcb   :  { %8398 = vmatpush3.bf16.msra.mxu0 %v9360_v15  ;;  %v1509_v15 = vcombine.high %v10182_v11, %v10182_v11 }
  0xcc   :  { %8399 = vmatprep.subr.bf16.mxu0 %v9362_v17  ;;  %8420 = vmatpush3.bf16.msra.mxu1 %v9361_v16  ;;  %v1538_v16 = vcombine.high %v1516_v9, %v1516_v9  ;;  %v9415_v17 = vld [vmem:[#allocation5 + $0x548] sm:$0xff]  }
  0xcd   :  { %8421 = vmatprep.subr.bf16.mxu1 %v9363_v18  ;;  %v1540_v18 = vcombine.high %v1530_v13, %v1530_v13 }
  0xcf   :  { %8400 = vmatpush3.bf16.msra.mxu0 %v9364_v19  ;;  %v9416_v19 = vld [vmem:[#allocation5 + $0x5c8] sm:$0xff]  }
  0xd0   :  { %8401 = vmatprep.subr.bf16.mxu0 %v9366_v21  ;;  %8422 = vmatpush3.bf16.msra.mxu1 %v9365_v20  ;;  %v1537_v20 = vrot.slane %v1509_v15, %v10155_v35  ;;  %v9417_v21 = vld [vmem:[#allocation5 + $0x508] sm:$0xff]   ;;  %v9472_v15 = vld [vmem:[#allocation5 + $0x678] sm:$0xff]  }
  0xd1   :  { %8423 = vmatprep.subr.bf16.mxu1 %v9367_v22  ;;  %v9418_v22 = vld [vmem:[#allocation5 + $0x588] sm:$0xff]  }
  0xd3   :  { %8402 = vmatpush3.bf16.msra.mxu0 %v9368_v23  ;;  %v1541_v23 = vcombine.high %v1537_v20, %v1537_v20 }
  0xd4   :  { %8403 = vmatprep.subr.bf16.mxu0 %v9370_v25  ;;  %8424 = vmatpush3.bf16.msra.mxu1 %v9369_v24  ;;  %v9419_v24 = vld [vmem:[#allocation5 + $0x550] sm:$0xff]  }
  0xd5   :  { %8425 = vmatprep.subr.bf16.mxu1 %v9371_v26  ;;  %v9420_v25 = vld [vmem:[#allocation5 + $0x5d0] sm:$0xff]  }
  0xd6   :  { %v9421_v26 = vld [vmem:[#allocation5 + $0x510] sm:$0xff]  }
  0xd7   :  { %8404 = vmatpush3.bf16.msra.mxu0 %v9372_v27  ;;  %v9422_v27 = vld [vmem:[#allocation5 + $0x590] sm:$0xff]  }
  0xd8   :  { %8405 = vmatprep.subr.bf16.mxu0 %v9374_v29  ;;  %8426 = vmatpush3.bf16.msra.mxu1 %v9373_v28  ;;  %v9423_v28 = vld [vmem:[#allocation5 + $0x558] sm:$0xff]  }
  0xd9   :  { %8427 = vmatprep.subr.bf16.mxu1 %v9375_v30  ;;  %v9424_v29 = vld [vmem:[#allocation5 + $0x5d8] sm:$0xff]  }
  0xda   :  { %v9425_v30 = vld [vmem:[#allocation5 + $0x518] sm:$0xff]  }
  0xdb   :  { %8406 = vmatpush3.bf16.msra.mxu0 %v9376_v31  ;;  %v9426_v31 = vld [vmem:[#allocation5 + $0x598] sm:$0xff]  }
  0xdc   :  { %8435 = vmatprep.subr.bf16.mxu0 %v9379_v34  ;;  %8428 = vmatpush3.bf16.msra.mxu1 %v9377_v32  ;;  %v9427_v32 = vld [vmem:[#allocation5 + $0x560] sm:$0xff]  }
  0xdd   :  { %8457 = vmatprep.subr.bf16.mxu1 %v9380_v36  ;;  %v9429_v34 = vld [vmem:[#allocation5 + $0x520] sm:$0xff]  }
  0xde   :  { %6078 = vmatmul.mubr.bf16.vlgmr.msra.gmra.mrb[12].mxu0 %v1474_v33  ;;  %v9428_v33 = vld [vmem:[#allocation5 + $0x5e0] sm:$0xff]  }
  0xdf   :  { %8436 = vmatpush3.bf16.msra.mxu0 %v9381_v37  ;;  %6118 = vmatmul.mubr.bf16.vlgmr.msra.gmra.mrb[12].mxu1 %v1490_v39  ;;  %v9430_v36 = vld [vmem:[#allocation5 + $0x5a0] sm:$0xff]   ;;  %v9431_v37 = vld [vmem:[#allocation5 + $0x568] sm:$0xff]  }
  0xe0   :  { %8437 = vmatprep.subr.bf16.mxu0 %v9383_v40  ;;  %8458 = vmatpush3.bf16.msra.mxu1 %v9382_v38  ;;  %v9432_v38 = vld [vmem:[#allocation5 + $0x5e8] sm:$0xff]  }
  0xe1   :  { %8459 = vmatprep.subr.bf16.mxu1 %v9384_v41  ;;  %6157 = vmatprep.mubr.bf16.mxu0 %v1530_v13  ;;  %v9433_v39 = vld [vmem:[#allocation5 + $0x528] sm:$0xff]   ;;  %v9435_v41 = vld [vmem:[#allocation5 + $0x570] sm:$0xff]  }
  0xe2   :  { %6197 = vmatprep.mubr.bf16.mxu1 %v1540_v18  ;;  %v9434_v40 = vld [vmem:[#allocation5 + $0x5a8] sm:$0xff]   ;;  %v9470_v13 = vld [vmem:[#allocation5 + $0x630] sm:$0xff]  }
  0xe3   :  { %8438 = vmatpush3.bf16.msra.mxu0 %v9385_v42  ;;  %v9436_v42 = vld [vmem:[#allocation5 + $0x5f0] sm:$0xff]   ;;  %v91_v18 = vld [vmem:[#allocation2 + $0x18] sm:$0xff] }
  0xe4   :  { %8439 = vmatprep.subr.bf16.mxu0 %v9387_v44  ;;  %8460 = vmatpush3.bf16.msra.mxu1 %v9386_v43  ;;  %v9437_v43 = vld [vmem:[#allocation5 + $0x530] sm:$0xff]  }
  0xe5   :  { %8461 = vmatprep.subr.bf16.mxu1 %v9388_v45  ;;  %v9438_v44 = vld [vmem:[#allocation5 + $0x5b0] sm:$0xff]   ;;  %v9439_v45 = vld [vmem:[#allocation5 + $0x578] sm:$0xff]  }
  0xe7   :  { %8440 = vmatpush3.bf16.msra.mxu0 %v9389_v46  ;;  %v9440_v46 = vld [vmem:[#allocation5 + $0x5f8] sm:$0xff]  }
  0xe8   :  { %8441 = vmatprep.subr.bf16.mxu0 %v9391_v48  ;;  %8462 = vmatpush3.bf16.msra.mxu1 %v9390_v47  ;;  %v9441_v47 = vld [vmem:[#allocation5 + $0x538] sm:$0xff]  }
  0xe9   :  { %8463 = vmatprep.subr.bf16.mxu1 %v9392_v49  ;;  %v9442_v48 = vld [vmem:[#allocation5 + $0x5b8] sm:$0xff]   ;;  %v1523_v49 = vrot.slane %v10182_v11, %v10155_v35  ;;  %v9468_v11 = vld [vmem:[#allocation5 + $0x670] sm:$0xff]  }
  0xeb   :  { %8442 = vmatpush3.bf16.msra.mxu0 %v9393_v50  ;;  %v9444_v50 = vld [vmem:[#allocation5 + $0x640] sm:$0xff]  }
  0xec   :  { %8443 = vmatprep.subr.bf16.mxu0 %v9395_v52  ;;  %8464 = vmatpush3.bf16.msra.mxu1 %v9394_v51  ;;  %v9445_v51 = vld [vmem:[#allocation5 + $0x6c0] sm:$0xff]  }
  0xed   :  { %8465 = vmatprep.subr.bf16.mxu1 %v9396_v53  ;;  %v9446_v52 = vld [vmem:[#allocation5 + $0x600] sm:$0xff]  }
  0xee   :  { %v9447_v53 = vld [vmem:[#allocation5 + $0x680] sm:$0xff]  }
  0xef   :  { %8444 = vmatpush3.bf16.msra.mxu0 %v9397_v54  ;;  %v1539_v54 = vcombine.high %v1523_v49, %v1523_v49 }
  0xf0   :  { %8445 = vmatprep.subr.bf16.mxu0 %v9399_v56  ;;  %8466 = vmatpush3.bf16.msra.mxu1 %v9398_v55  ;;  %v9448_v55 = vld [vmem:[#allocation5 + $0x648] sm:$0xff]  }
  0xf1   :  { %8467 = vmatprep.subr.bf16.mxu1 %v9400_v57  ;;  %v9449_v56 = vld [vmem:[#allocation5 + $0x6c8] sm:$0xff]  }
  0xf2   :  { %v9450_v57 = vld [vmem:[#allocation5 + $0x608] sm:$0xff]  }
  0xf3   :  { %8446 = vmatpush3.bf16.msra.mxu0 %v9401_v58  ;;  %v9451_v58 = vld [vmem:[#allocation5 + $0x688] sm:$0xff]  }
  0xf4   :  { %8447 = vmatprep.subr.bf16.mxu0 %v9403_v60  ;;  %8468 = vmatpush3.bf16.msra.mxu1 %v9402_v59  ;;  %v9452_v59 = vld [vmem:[#allocation5 + $0x650] sm:$0xff]  }
  0xf5   :  { %8469 = vmatprep.subr.bf16.mxu1 %v9404_v61  ;;  %v9453_v60 = vld [vmem:[#allocation5 + $0x6d0] sm:$0xff]  }
  0xf6   :  { %v9454_v61 = vld [vmem:[#allocation5 + $0x610] sm:$0xff]  }
  0xf7   :  { %8448 = vmatpush3.bf16.msra.mxu0 %v9405_v62  ;;  %v9455_v62 = vld [vmem:[#allocation5 + $0x690] sm:$0xff]  }
  0xf8   :  { %8449 = vmatprep.subr.bf16.mxu0 %v9407_v0  ;;  %8470 = vmatpush3.bf16.msra.mxu1 %v9406_v63  ;;  %v9456_v63 = vld [vmem:[#allocation5 + $0x658] sm:$0xff]  }
  0xf9   :  { %8471 = vmatprep.subr.bf16.mxu1 %v9408_v1  ;;  %v9457_v0 = vld [vmem:[#allocation5 + $0x6d8] sm:$0xff]  }
  0xfa   :  { %v9458_v1 = vld [vmem:[#allocation5 + $0x618] sm:$0xff]  }
  0xfb   :  { %8450 = vmatpush3.bf16.msra.mxu0 %v9409_v2  ;;  %v9459_v2 = vld [vmem:[#allocation5 + $0x698] sm:$0xff]  }
  0xfc   :  { %8479 = vmatprep.subr.bf16.mxu0 %v9411_v7  ;;  %8472 = vmatpush3.bf16.msra.mxu1 %v9410_v4  ;;  %v9461_v4 = vld [vmem:[#allocation5 + $0x6e0] sm:$0xff]   ;;  %v9464_v7 = vld [vmem:[#allocation5 + $0x668] sm:$0xff]  }
  0xfd   :  { %8501 = vmatprep.subr.bf16.mxu1 %v9412_v10  ;;  %v9467_v10 = vld [vmem:[#allocation5 + $0x6a8] sm:$0xff]  }
  0xfe   :  { %6158 = vmatmul.mubr.bf16.vlgmr.msra.gmra.mrb[16].mxu0 %v1516_v9  ;;  %v9466_v9 = vld [vmem:[#allocation5 + $0x628] sm:$0xff]  }
  0xff   :  { %8480 = vmatpush3.bf16.msra.mxu0 %v9413_v12  ;;  %6198 = vmatmul.mubr.bf16.vlgmr.msra.gmra.mrb[16].mxu1 %v1538_v16  ;;  %v9469_v12 = vld [vmem:[#allocation5 + $0x6f0] sm:$0xff]   ;;  %v9473_v16 = vld [vmem:[#allocation5 + $0x6f8] sm:$0xff]  }
 0x100   :  { %8481 = vmatprep.subr.bf16.mxu0 %v9415_v17  ;;  %8502 = vmatpush3.bf16.msra.mxu1 %v9414_v14  ;;  %v9471_v14 = vld [vmem:[#allocation5 + $0x6b0] sm:$0xff]   ;;  %v9474_v17 = vld [vmem:[#allocation5 + $0x638] sm:$0xff]  }
 0x101   :  { %6237 = vmatprep.mubr.bf16.mxu0 %v1537_v20  ;;  %8503 = vmatprep.subr.bf16.mxu1 %v9416_v19  ;;  %v1549_v19 = vrot.slane %v91_v18, %v10155_v35  ;;  %v9476_v20 = vld [vmem:[#allocation5 + $0x740] sm:$0xff]  }
 0x102   :  { %6277 = vmatprep.mubr.bf16.mxu1 %v1541_v23 }
 0x103   :  { %8482 = vmatpush3.bf16.msra.mxu0 %v9417_v21  ;;  %v1542_v21 = vcombine.high %v91_v18, %v91_v18  ;;  %v1557_v23 = vcombine.high %v1549_v19, %v1549_v19 }
 0x104   :  { %8483 = vmatprep.subr.bf16.mxu0 %v9419_v24  ;;  %8504 = vmatpush3.bf16.msra.mxu1 %v9418_v22  ;;  %v9475_v22 = vld [vmem:[#allocation5 + $0x6b8] sm:$0xff]   ;;  %v1565_v24 = vrot.slane %v1549_v19, %v10155_v35  ;;  %v9513_v19 = vld [vmem:[#allocation5 + $0x848] sm:$0xff]  }
 0x105   :  { %8505 = vmatprep.subr.bf16.mxu1 %v9420_v25  ;;  %v9477_v25 = vld [vmem:[#allocation5 + $0x7c0] sm:$0xff]  }
 0x107   :  { %8484 = vmatpush3.bf16.msra.mxu0 %v9421_v26  ;;  %v10193_v26 = vrot.slane %v1542_v21, %v10155_v35  ;;  %v9515_v21 = vld [vmem:[#allocation5 + $0x808] sm:$0xff]  }
 0x108   :  { %8485 = vmatprep.subr.bf16.mxu0 %v9423_v28  ;;  %8506 = vmatpush3.bf16.msra.mxu1 %v9422_v27  ;;  %v1579_v27 = vrot.slane %v1557_v23, %v10155_v35  ;;  %v9478_v28 = vld [vmem:[#allocation5 + $0x700] sm:$0xff]   ;;  %v9517_v23 = vld [vmem:[#allocation5 + $0x850] sm:$0xff]  }
 0x109   :  { %8507 = vmatprep.subr.bf16.mxu1 %v9424_v29  ;;  %v1558_v29 = vcombine.high %v10193_v26, %v10193_v26 }
 0x10b   :  { %8486 = vmatpush3.bf16.msra.mxu0 %v9425_v30  ;;  %v1587_v30 = vcombine.high %v1565_v24, %v1565_v24 }
 0x10c   :  { %8487 = vmatprep.subr.bf16.mxu0 %v9427_v32  ;;  %8508 = vmatpush3.bf16.msra.mxu1 %v9426_v31  ;;  %v9480_v31 = vld [vmem:[#allocation5 + $0x748] sm:$0xff]   ;;  %v1589_v32 = vcombine.high %v1579_v27, %v1579_v27 }
 0x10d   :  { %8509 = vmatprep.subr.bf16.mxu1 %v9428_v33  ;;  %v9479_v33 = vld [vmem:[#allocation5 + $0x780] sm:$0xff]  }
 0x10f   :  { %8488 = vmatpush3.bf16.msra.mxu0 %v9429_v34  ;;  %v1586_v34 = vrot.slane %v1558_v29, %v10155_v35  ;;  %v9523_v29 = vld [vmem:[#allocation5 + $0x818] sm:$0xff]  }
 0x110   :  { %8489 = vmatprep.subr.bf16.mxu0 %v9431_v37  ;;  %8510 = vmatpush3.bf16.msra.mxu1 %v9430_v36  ;;  %v9481_v36 = vld [vmem:[#allocation5 + $0x7c8] sm:$0xff]  }
 0x111   :  { %8511 = vmatprep.subr.bf16.mxu1 %v9432_v38  ;;  %v9482_v37 = vld [vmem:[#allocation5 + $0x708] sm:$0xff]   ;;  %v1590_v38 = vcombine.high %v1586_v34, %v1586_v34 }
 0x113   :  { %8490 = vmatpush3.bf16.msra.mxu0 %v9433_v39  ;;  %v9484_v39 = vld [vmem:[#allocation5 + $0x750] sm:$0xff]  }
 0x114   :  { %8491 = vmatprep.subr.bf16.mxu0 %v9435_v41  ;;  %8512 = vmatpush3.bf16.msra.mxu1 %v9434_v40  ;;  %v9483_v40 = vld [vmem:[#allocation5 + $0x788] sm:$0xff]   ;;  %v9485_v41 = vld [vmem:[#allocation5 + $0x7d0] sm:$0xff]  }
 0x115   :  { %8513 = vmatprep.subr.bf16.mxu1 %v9436_v42  ;;  %v9486_v42 = vld [vmem:[#allocation5 + $0x710] sm:$0xff]  }
 0x117   :  { %8492 = vmatpush3.bf16.msra.mxu0 %v9437_v43  ;;  %v9488_v43 = vld [vmem:[#allocation5 + $0x758] sm:$0xff]  }
 0x118   :  { %8493 = vmatprep.subr.bf16.mxu0 %v9439_v45  ;;  %8514 = vmatpush3.bf16.msra.mxu1 %v9438_v44  ;;  %v9487_v44 = vld [vmem:[#allocation5 + $0x790] sm:$0xff]   ;;  %v9489_v45 = vld [vmem:[#allocation5 + $0x7d8] sm:$0xff]  }
 0x119   :  { %8515 = vmatprep.subr.bf16.mxu1 %v9440_v46  ;;  %v9490_v46 = vld [vmem:[#allocation5 + $0x718] sm:$0xff]  }
 0x11b   :  { %8494 = vmatpush3.bf16.msra.mxu0 %v9441_v47  ;;  %v9492_v47 = vld [vmem:[#allocation5 + $0x760] sm:$0xff]  }
 0x11c   :  { %8523 = vmatprep.subr.bf16.mxu0 %v9444_v50  ;;  %8516 = vmatpush3.bf16.msra.mxu1 %v9442_v48  ;;  %v9491_v48 = vld [vmem:[#allocation5 + $0x798] sm:$0xff]   ;;  %v9494_v50 = vld [vmem:[#allocation5 + $0x720] sm:$0xff]  }
 0x11d   :  { %8545 = vmatprep.subr.bf16.mxu1 %v9445_v51  ;;  %v9496_v51 = vld [vmem:[#allocation5 + $0x768] sm:$0xff]  }
 0x11e   :  { %6238 = vmatmul.mubr.bf16.vlgmr.msra.gmra.mrb[20].mxu0 %v1523_v49  ;;  %v9493_v49 = vld [vmem:[#allocation5 + $0x7e0] sm:$0xff]  }
 0x11f   :  { %8524 = vmatpush3.bf16.msra.mxu0 %v9446_v52  ;;  %6278 = vmatmul.mubr.bf16.vlgmr.msra.gmra.mrb[20].mxu1 %v1539_v54  ;;  %v9495_v52 = vld [vmem:[#allocation5 + $0x7a0] sm:$0xff]  }
 0x120   :  { %8525 = vmatprep.subr.bf16.mxu0 %v9448_v55  ;;  %8546 = vmatpush3.bf16.msra.mxu1 %v9447_v53  ;;  %v9497_v53 = vld [vmem:[#allocation5 + $0x7e8] sm:$0xff]   ;;  %v7615_v54 = vld [vmem:[#allocation7] ss:$0 sm:$0xff] }
 0x121   :  { %8547 = vmatprep.subr.bf16.mxu1 %v9449_v56  ;;  %6317 = vmatprep.mubr.bf16.mxu0 %v1579_v27  ;;  %v9498_v55 = vld [vmem:[#allocation5 + $0x728] sm:$0xff]   ;;  %v9521_v27 = vld [vmem:[#allocation5 + $0x858] sm:$0xff]  }
 0x122   :  { %6357 = vmatprep.mubr.bf16.mxu1 %v1589_v32  ;;  %v9526_v32 = vld [vmem:[#allocation5 + $0x8e0] sm:$0xff]  }
 0x123   :  { %8526 = vmatpush3.bf16.msra.mxu0 %v9450_v57  ;;  %v9500_v57 = vld [vmem:[#allocation5 + $0x770] sm:$0xff]  }
 0x124   :  { %8527 = vmatprep.subr.bf16.mxu0 %v9452_v59  ;;  %8548 = vmatpush3.bf16.msra.mxu1 %v9451_v58  ;;  %v9499_v59 = vld [vmem:[#allocation5 + $0x7a8] sm:$0xff]  }
 0x125   :  { %8549 = vmatprep.subr.bf16.mxu1 %v9453_v60 }
 0x127   :  { %8528 = vmatpush3.bf16.msra.mxu0 %v9454_v61 }
 0x128   :  { %8529 = vmatprep.subr.bf16.mxu0 %v9456_v63  ;;  %8550 = vmatpush3.bf16.msra.mxu1 %v9455_v62  ;;  %v9501_v63 = vld [vmem:[#allocation5 + $0x7f0] sm:$0xff]  }
 0x129   :  { %8551 = vmatprep.subr.bf16.mxu1 %v9457_v0  ;;  %v9502_v0 = vld [vmem:[#allocation5 + $0x730] sm:$0xff]  }
 0x12b   :  { %8530 = vmatpush3.bf16.msra.mxu0 %v9458_v1 }
 0x12c   :  { %8531 = vmatprep.subr.bf16.mxu0 %v9460_v3  ;;  %8552 = vmatpush3.bf16.msra.mxu1 %v9459_v2  ;;  %v9503_v3 = vld [vmem:[#allocation5 + $0x7b0] sm:$0xff]  }
 0x12d   :  { %8553 = vmatprep.subr.bf16.mxu1 %v9461_v4 }
 0x12f   :  { %8532 = vmatpush3.bf16.msra.mxu0 %v9462_v5 }
 0x130   :  { %8533 = vmatprep.subr.bf16.mxu0 %v9464_v7  ;;  %8554 = vmatpush3.bf16.msra.mxu1 %v9463_v6  ;;  %v9504_v7 = vld [vmem:[#allocation5 + $0x778] sm:$0xff]  }
 0x131   :  { %8555 = vmatprep.subr.bf16.mxu1 %v9465_v8 }
 0x133   :  { %8534 = vmatpush3.bf16.msra.mxu0 %v9466_v9  ;;  %v9505_v9 = vld [vmem:[#allocation5 + $0x7f8] sm:$0xff]  }
 0x134   :  { %8535 = vmatprep.subr.bf16.mxu0 %v9468_v11  ;;  %8556 = vmatpush3.bf16.msra.mxu1 %v9467_v10  ;;  %v9506_v11 = vld [vmem:[#allocation5 + $0x738] sm:$0xff]  }
 0x135   :  { %8557 = vmatprep.subr.bf16.mxu1 %v9469_v12  ;;  %v9507_v12 = vld [vmem:[#allocation5 + $0x7b8] sm:$0xff]  }
 0x137   :  { %8536 = vmatpush3.bf16.msra.mxu0 %v9470_v13  ;;  %v1572_v13 = vrot.slane %v10193_v26, %v10155_v35  ;;  %v9520_v26 = vld [vmem:[#allocation5 + $0x890] sm:$0xff]  }
 0x138   :  { %8537 = vmatprep.subr.bf16.mxu0 %v9472_v15  ;;  %8558 = vmatpush3.bf16.msra.mxu1 %v9471_v14  ;;  %v9509_v14 = vld [vmem:[#allocation5 + $0x840] sm:$0xff]  }
 0x139   :  { %8559 = vmatprep.subr.bf16.mxu1 %v9473_v16  ;;  %v9510_v15 = vld [vmem:[#allocation5 + $0x8c0] sm:$0xff]   ;;  %v1588_v18 = vcombine.high %v1572_v13, %v1572_v13 }
 0x13a   :  { %v9511_v16 = vld [vmem:[#allocation5 + $0x800] sm:$0xff]  }
 0x13b   :  { %8538 = vmatpush3.bf16.msra.mxu0 %v9474_v17  ;;  %v9512_v17 = vld [vmem:[#allocation5 + $0x880] sm:$0xff]  }
 0x13c   :  { %8567 = vmatprep.subr.bf16.mxu0 %v9476_v20  ;;  %8560 = vmatpush3.bf16.msra.mxu1 %v9475_v22  ;;  %v9514_v20 = vld [vmem:[#allocation5 + $0x8c8] sm:$0xff]  }
 0x13d   :  { %8589 = vmatprep.subr.bf16.mxu1 %v9477_v25  ;;  %v9516_v22 = vld [vmem:[#allocation5 + $0x888] sm:$0xff]   ;;  %v9519_v25 = vld [vmem:[#allocation5 + $0x810] sm:$0xff]  }
 0x13e   :  { %6318 = vmatmul.mubr.bf16.vlgmr.msra.gmra.mrb[24].mxu0 %v1565_v24  ;;  %v9518_v24 = vld [vmem:[#allocation5 + $0x8d0] sm:$0xff]  }
 0x13f   :  { %8568 = vmatpush3.bf16.msra.mxu0 %v9478_v28  ;;  %6358 = vmatmul.mubr.bf16.vlgmr.msra.gmra.mrb[24].mxu1 %v1587_v30  ;;  %v9522_v28 = vld [vmem:[#allocation5 + $0x8d8] sm:$0xff]  }
 0x140   :  { %8569 = vmatprep.subr.bf16.mxu0 %v9480_v31  ;;  %8590 = vmatpush3.bf16.msra.mxu1 %v9479_v33  ;;  %v9524_v30 = vld [vmem:[#allocation5 + $0x898] sm:$0xff]   ;;  %v9525_v31 = vld [vmem:[#allocation5 + $0x860] sm:$0xff]  }
 0x141   :  { %6397 = vmatprep.mubr.bf16.mxu0 %v1586_v34  ;;  %8591 = vmatprep.subr.bf16.mxu1 %v9481_v36  ;;  %v9527_v33 = vld [vmem:[#allocation5 + $0x820] sm:$0xff]   ;;  %v9529_v36 = vld [vmem:[#allocation5 + $0x868] sm:$0xff]  }
 0x142   :  { %6437 = vmatprep.mubr.bf16.mxu1 %v1590_v38  ;;  %v9528_v34 = vld [vmem:[#allocation5 + $0x8a0] sm:$0xff]   ;;  %v9531_v38 = vld [vmem:[#allocation5 + $0x828] sm:$0xff]  }
 0x143   :  { %8570 = vmatpush3.bf16.msra.mxu0 %v9482_v37  ;;  %v9530_v37 = vld [vmem:[#allocation5 + $0x8e8] sm:$0xff]  }
 0x144   :  { %8571 = vmatprep.subr.bf16.mxu0 %v9484_v39  ;;  %8592 = vmatpush3.bf16.msra.mxu1 %v9483_v40  ;;  %v9532_v39 = vld [vmem:[#allocation5 + $0x8a8] sm:$0xff]  }
 0x145   :  { %8593 = vmatprep.subr.bf16.mxu1 %v9485_v41  ;;  %v9533_v41 = vld [vmem:[#allocation5 + $0x870] sm:$0xff]  }
 0x147   :  { %8572 = vmatpush3.bf16.msra.mxu0 %v9486_v42 }
 0x148   :  { %8573 = vmatprep.subr.bf16.mxu0 %v9488_v43  ;;  %8594 = vmatpush3.bf16.msra.mxu1 %v9487_v44  ;;  %v9534_v43 = vld [vmem:[#allocation5 + $0x8f0] sm:$0xff]  }
 0x149   :  { %8595 = vmatprep.subr.bf16.mxu1 %v9489_v45 }
 0x14b   :  { %8574 = vmatpush3.bf16.msra.mxu0 %v9490_v46 }
 0x14c   :  { %8575 = vmatprep.subr.bf16.mxu0 %v9492_v47  ;;  %8596 = vmatpush3.bf16.msra.mxu1 %v9491_v48 }
 0x14d   :  { %8597 = vmatprep.subr.bf16.mxu1 %v9493_v49  ;;  %v9535_v49 = vld [vmem:[#allocation5 + $0x830] sm:$0xff]  }
 0x14f   :  { %8576 = vmatpush3.bf16.msra.mxu0 %v9494_v50  ;;  %v9536_v50 = vld [vmem:[#allocation5 + $0x8b0] sm:$0xff]  }
 0x150   :  { %8577 = vmatprep.subr.bf16.mxu0 %v9496_v51  ;;  %8598 = vmatpush3.bf16.msra.mxu1 %v9495_v52 }
 0x151   :  { %v8275_v56 = vpop.f32.mrb[0].mxu0  ;;  %8599 = vmatprep.subr.bf16.mxu1 %v9497_v53 }
 0x152   :  { %v8276_v58 = vpop.f32.mrb[1].mxu0  ;;  %v8297_v60 = vpop.f32.mrb[0].mxu1 }
 0x153   :  { %v8277_v61 = vadd.f32 %v8276_v58, %v8275_v56  ;;  %v8278_v62 = vpop.f32.mrb[2].mxu0  ;;  %v8298_v1 = vpop.f32.mrb[1].mxu1  ;;  %8578 = vmatpush3.bf16.msra.mxu0 %v9498_v55  ;;  %v9538_v56 = vld [vmem:[#allocation5 + $0x8f8] sm:$0xff]  }
 0x154   :  { %v8279_v2 = vpop.f32.mrb[3].mxu0  ;;  %v8299_v5 = vadd.f32 %v8298_v1, %v8297_v60  ;;  %v8300_v6 = vpop.f32.mrb[2].mxu1  ;;  %8579 = vmatprep.subr.bf16.mxu0 %v9500_v57  ;;  %8600 = vmatpush3.bf16.msra.mxu1 %v9499_v59  ;;  %v9539_v58 = vld [vmem:[#allocation5 + $0x838] sm:$0xff]   ;;  %v92_v59 = vld [vmem:[#allocation2 + $0x20] sm:$0xff] }
 0x155   :  { %v5840_v4 = vadd.f32 %v8277_v61, %v7615_v54  ;;  %v8301_v8 = vpop.f32.mrb[3].mxu1  ;;  %8601 = vmatprep.subr.bf16.mxu1 %v9501_v63  ;;  %v9537_v54 = vld [vmem:[#allocation5 + $0x878] sm:$0xff]   ;;  %v1598_v60 = vrot.slane %v92_v59, %v10155_v35  ;;  %v9541_v61 = vld [vmem:[#allocation5 + $0x940] sm:$0xff]   ;;  %v1591_v62 = vcombine.high %v92_v59, %v92_v59  ;;  %v9578_v59 = vld [vmem:[#allocation5 + $0xa48] sm:$0xff]  }
 0x156   :  { %v9540_v63 = vld [vmem:[#allocation5 + $0x8b8] sm:$0xff]   ;;  %v9542_v2 = vld [vmem:[#allocation5 + $0x9c0] sm:$0xff]  }
 0x157   :  { %v10199_v10 = vadd.f32 %v8299_v5, %v5840_v4  ;;  %8580 = vmatpush3.bf16.msra.mxu0 %v9502_v0  ;;  %v1606_v0 = vcombine.high %v1598_v60, %v1598_v60  ;;  %v1614_v1 = vrot.slane %v1598_v60, %v10155_v35  ;;  %v9543_v4 = vld [vmem:[#allocation5 + $0x900] sm:$0xff]   ;;  %v9579_v60 = vld [vmem:[#allocation5 + $0xac8] sm:$0xff]  }
 0x158   :  { %8581 = vmatprep.subr.bf16.mxu0 %v9504_v7  ;;  %8602 = vmatpush3.bf16.msra.mxu1 %v9503_v3  ;;  %v10209_v3 = vrot.slane %v1591_v62, %v10155_v35  ;;  %v9544_v6 = vld [vmem:[#allocation5 + $0x980] sm:$0xff]   ;;  %v9581_v62 = vld [vmem:[#allocation5 + $0xa88] sm:$0xff]  }
 0x159   :  { %8603 = vmatprep.subr.bf16.mxu1 %v9505_v9  ;;  %v1628_v5 = vrot.slane %v1606_v0, %v10155_v35  ;;  %v1636_v8 = vcombine.high %v1614_v1, %v1614_v1  ;;  %v9545_v9 = vld [vmem:[#allocation5 + $0x948] sm:$0xff]   ;;  %v9583_v0 = vld [vmem:[#allocation5 + $0xad0] sm:$0xff]  }
 0x15a   :  { %v1607_v7 = vcombine.high %v10209_v3, %v10209_v3 }
 0x15b   :  { %8582 = vmatpush3.bf16.msra.mxu0 %v9506_v11  ;;  %v9546_v11 = vld [vmem:[#allocation5 + $0x9c8] sm:$0xff]  }
 0x15c   :  { %8611 = vmatprep.subr.bf16.mxu0 %v9509_v14  ;;  %8604 = vmatpush3.bf16.msra.mxu1 %v9507_v12  ;;  %v1635_v12 = vrot.slane %v1607_v7, %v10155_v35  ;;  %v9548_v14 = vld [vmem:[#allocation5 + $0x988] sm:$0xff]   ;;  %v9590_v7 = vld [vmem:[#allocation5 + $0xa60] sm:$0xff]  }
 0x15d   :  { %8633 = vmatprep.subr.bf16.mxu1 %v9510_v15 }
 0x15e   :  { %6398 = vmatmul.mubr.bf16.vlgmr.msra.gmra.mrb[28].mxu0 %v1572_v13  ;;  %v9547_v13 = vld [vmem:[#allocation5 + $0x908] sm:$0xff]   ;;  %v1639_v15 = vcombine.high %v1635_v12, %v1635_v12 }
 0x15f   :  { %8612 = vmatpush3.bf16.msra.mxu0 %v9511_v16  ;;  %6438 = vmatmul.mubr.bf16.vlgmr.msra.gmra.mrb[28].mxu1 %v1588_v18  ;;  %v9549_v16 = vld [vmem:[#allocation5 + $0x950] sm:$0xff]  }
 0x160   :  { %8613 = vmatprep.subr.bf16.mxu0 %v9513_v19  ;;  %8634 = vmatpush3.bf16.msra.mxu1 %v9512_v17  ;;  %v9550_v17 = vld [vmem:[#allocation5 + $0x9d0] sm:$0xff]  }
 0x161   :  { %8635 = vmatprep.subr.bf16.mxu1 %v9514_v20  ;;  %6477 = vmatprep.mubr.bf16.mxu0 %v1628_v5  ;;  %v9551_v18 = vld [vmem:[#allocation5 + $0x910] sm:$0xff]   ;;  %v9553_v20 = vld [vmem:[#allocation5 + $0x958] sm:$0xff]  }
 0x162   :  { %v9552_v19 = vld [vmem:[#allocation5 + $0x990] sm:$0xff]  }
 0x163   :  { %8614 = vmatpush3.bf16.msra.mxu0 %v9515_v21  ;;  %v9554_v21 = vld [vmem:[#allocation5 + $0x9d8] sm:$0xff]  }
 0x164   :  { %8615 = vmatprep.subr.bf16.mxu0 %v9517_v23  ;;  %8636 = vmatpush3.bf16.msra.mxu1 %v9516_v22  ;;  %v9555_v22 = vld [vmem:[#allocation5 + $0x918] sm:$0xff]  }
 0x165   :  { %8637 = vmatprep.subr.bf16.mxu1 %v9518_v24  ;;  %v9556_v23 = vld [vmem:[#allocation5 + $0x998] sm:$0xff]   ;;  %v9557_v24 = vld [vmem:[#allocation5 + $0x960] sm:$0xff]  }
 0x167   :  { %8616 = vmatpush3.bf16.msra.mxu0 %v9519_v25  ;;  %v9558_v25 = vld [vmem:[#allocation5 + $0x9e0] sm:$0xff]  }
 0x168   :  { %8617 = vmatprep.subr.bf16.mxu0 %v9521_v27  ;;  %8638 = vmatpush3.bf16.msra.mxu1 %v9520_v26  ;;  %v9559_v26 = vld [vmem:[#allocation5 + $0x920] sm:$0xff]  }
 0x169   :  { %8639 = vmatprep.subr.bf16.mxu1 %v9522_v28  ;;  %v9560_v27 = vld [vmem:[#allocation5 + $0x9a0] sm:$0xff]   ;;  %v9561_v28 = vld [vmem:[#allocation5 + $0x968] sm:$0xff]  }
 0x16b   :  { %8618 = vmatpush3.bf16.msra.mxu0 %v9523_v29  ;;  %v9562_v29 = vld [vmem:[#allocation5 + $0x9e8] sm:$0xff]  }
 0x16c   :  { %8619 = vmatprep.subr.bf16.mxu0 %v9525_v31  ;;  %8640 = vmatpush3.bf16.msra.mxu1 %v9524_v30  ;;  %v9563_v30 = vld [vmem:[#allocation5 + $0x928] sm:$0xff]  }
 0x16d   :  { %8641 = vmatprep.subr.bf16.mxu1 %v9526_v32  ;;  %v9564_v32 = vld [vmem:[#allocation5 + $0x9a8] sm:$0xff]  }
 0x16f   :  { %8620 = vmatpush3.bf16.msra.mxu0 %v9527_v33 }
 0x170   :  { %8621 = vmatprep.subr.bf16.mxu0 %v9529_v36  ;;  %8642 = vmatpush3.bf16.msra.mxu1 %v9528_v34  ;;  %v9565_v34 = vld [vmem:[#allocation5 + $0x970] sm:$0xff]  }
 0x171   :  { %v8319_v40 = vpop.f32.mrb[4].mxu0  ;;  %8643 = vmatprep.subr.bf16.mxu1 %v9530_v37 }
 0x172   :  { %v8320_v42 = vpop.f32.mrb[5].mxu0  ;;  %v8341_v44 = vpop.f32.mrb[4].mxu1 }
 0x173   :  { %v8321_v45 = vadd.f32 %v8320_v42, %v8319_v40  ;;  %v8322_v46 = vpop.f32.mrb[6].mxu0  ;;  %v8342_v47 = vpop.f32.mrb[5].mxu1  ;;  %8622 = vmatpush3.bf16.msra.mxu0 %v9531_v38  ;;  %v9567_v40 = vld [vmem:[#allocation5 + $0x930] sm:$0xff]  }
 0x174   :  { %v8323_v48 = vpop.f32.mrb[7].mxu0  ;;  %v8343_v52 = vadd.f32 %v8342_v47, %v8341_v44  ;;  %v8344_v53 = vpop.f32.mrb[6].mxu1  ;;  %8623 = vmatprep.subr.bf16.mxu0 %v9533_v41  ;;  %8644 = vmatpush3.bf16.msra.mxu1 %v9532_v39  ;;  %v9566_v39 = vld [vmem:[#allocation5 + $0x9f0] sm:$0xff]  }
 0x175   :  { %v5920_v51 = vadd.f32 %v8321_v45, %v10199_v10  ;;  %v8345_v55 = vpop.f32.mrb[7].mxu1  ;;  %8645 = vmatprep.subr.bf16.mxu1 %v9534_v43  ;;  %v1638_v10 = vcombine.high %v1628_v5, %v1628_v5  ;;  %v9568_v46 = vld [vmem:[#allocation5 + $0x9b0] sm:$0xff]   ;;  %v9569_v48 = vld [vmem:[#allocation5 + $0x978] sm:$0xff]   ;;  %v1621_v53 = vrot.slane %v10209_v3, %v10155_v35 }
 0x176   :  { %v9575_v55 = vld [vmem:[#allocation5 + $0xac0] sm:$0xff]   ;;  %v9586_v3 = vld [vmem:[#allocation5 + $0xa58] sm:$0xff]  }
 0x177   :  { %v10204_v57 = vadd.f32 %v8343_v52, %v5920_v51  ;;  %8624 = vmatpush3.bf16.msra.mxu0 %v9535_v49  ;;  %6517 = vmatprep.mubr.bf16.mxu1 %v1638_v10  ;;  %v9571_v51 = vld [vmem:[#allocation5 + $0x938] sm:$0xff]   ;;  %v9593_v10 = vld [vmem:[#allocation5 + $0xaa0] sm:$0xff]  }
 0x178   :  { %8625 = vmatprep.subr.bf16.mxu0 %v9537_v54  ;;  %8646 = vmatpush3.bf16.msra.mxu1 %v9536_v50  ;;  %v9570_v50 = vld [vmem:[#allocation5 + $0x9f8] sm:$0xff]   ;;  %v9574_v54 = vld [vmem:[#allocation5 + $0xa40] sm:$0xff]  }
 0x179   :  { %8647 = vmatprep.subr.bf16.mxu1 %v9538_v56  ;;  %v9572_v52 = vld [vmem:[#allocation5 + $0x9b8] sm:$0xff]   ;;  %v9576_v56 = vld [vmem:[#allocation5 + $0xa00] sm:$0xff]  }
 0x17a   :  { %v9588_v5 = vld [vmem:[#allocation5 + $0xa18] sm:$0xff]  }
 0x17b   :  { %8626 = vmatpush3.bf16.msra.mxu0 %v9539_v58  ;;  %v1637_v58 = vcombine.high %v1621_v53, %v1621_v53 }
 0x17c   :  { %8655 = vmatprep.subr.bf16.mxu0 %v9541_v61  ;;  %8648 = vmatpush3.bf16.msra.mxu1 %v9540_v63  ;;  %v9580_v61 = vld [vmem:[#allocation5 + $0xa08] sm:$0xff]   ;;  %v9582_v63 = vld [vmem:[#allocation5 + $0xa50] sm:$0xff]  }
 0x17d   :  { %8677 = vmatprep.subr.bf16.mxu1 %v9542_v2  ;;  %v9585_v2 = vld [vmem:[#allocation5 + $0xa90] sm:$0xff]  }
 0x17e   :  { %6478 = vmatmul.mubr.bf16.vlgmr.msra.gmra.mrb[32].mxu0 %v1614_v1  ;;  %v9584_v1 = vld [vmem:[#allocation5 + $0xa10] sm:$0xff]  }
 0x17f   :  { %8656 = vmatpush3.bf16.msra.mxu0 %v9543_v4  ;;  %6518 = vmatmul.mubr.bf16.vlgmr.msra.gmra.mrb[32].mxu1 %v1636_v8  ;;  %v9587_v4 = vld [vmem:[#allocation5 + $0xad8] sm:$0xff]   ;;  %v9591_v8 = vld [vmem:[#allocation5 + $0xae0] sm:$0xff]  }
 0x180   :  { %8657 = vmatprep.subr.bf16.mxu0 %v9545_v9  ;;  %8678 = vmatpush3.bf16.msra.mxu1 %v9544_v6  ;;  %v9589_v6 = vld [vmem:[#allocation5 + $0xa98] sm:$0xff]   ;;  %v9592_v9 = vld [vmem:[#allocation5 + $0xa20] sm:$0xff]  }
 0x181   :  { %6557 = vmatprep.mubr.bf16.mxu0 %v1635_v12  ;;  %8679 = vmatprep.subr.bf16.mxu1 %v9546_v11  ;;  %v9594_v11 = vld [vmem:[#allocation5 + $0xa68] sm:$0xff]  }
 0x182   :  { %6597 = vmatprep.mubr.bf16.mxu1 %v1639_v15  ;;  %v9595_v12 = vld [vmem:[#allocation5 + $0xae8] sm:$0xff]  }
 0x183   :  { %8658 = vmatpush3.bf16.msra.mxu0 %v9547_v13  ;;  %v9596_v13 = vld [vmem:[#allocation5 + $0xa28] sm:$0xff]  }
 0x184   :  { %8659 = vmatprep.subr.bf16.mxu0 %v9549_v16  ;;  %8680 = vmatpush3.bf16.msra.mxu1 %v9548_v14  ;;  %v9597_v15 = vld [vmem:[#allocation5 + $0xaa8] sm:$0xff]  }
 0x185   :  { %8681 = vmatprep.subr.bf16.mxu1 %v9550_v17  ;;  %v9598_v17 = vld [vmem:[#allocation5 + $0xa70] sm:$0xff]  }
 0x187   :  { %8660 = vmatpush3.bf16.msra.mxu0 %v9551_v18 }
 0x188   :  { %8661 = vmatprep.subr.bf16.mxu0 %v9553_v20  ;;  %8682 = vmatpush3.bf16.msra.mxu1 %v9552_v19 }
 0x189   :  { %8683 = vmatprep.subr.bf16.mxu1 %v9554_v21 }
 0x18b   :  { %8662 = vmatpush3.bf16.msra.mxu0 %v9555_v22 }
 0x18c   :  { %8663 = vmatprep.subr.bf16.mxu0 %v9557_v24  ;;  %8684 = vmatpush3.bf16.msra.mxu1 %v9556_v23  ;;  %v9599_v23 = vld [vmem:[#allocation5 + $0xaf0] sm:$0xff]  }
 0x18d   :  { %8685 = vmatprep.subr.bf16.mxu1 %v9558_v25  ;;  %v9600_v24 = vld [vmem:[#allocation5 + $0xa30] sm:$0xff]  }
 0x18f   :  { %8664 = vmatpush3.bf16.msra.mxu0 %v9559_v26 }
 0x190   :  { %8665 = vmatprep.subr.bf16.mxu0 %v9561_v28  ;;  %8686 = vmatpush3.bf16.msra.mxu1 %v9560_v27  ;;  %v9601_v28 = vld [vmem:[#allocation5 + $0xab0] sm:$0xff]  }
 0x191   :  { %v8363_v31 = vpop.f32.mrb[8].mxu0  ;;  %8687 = vmatprep.subr.bf16.mxu1 %v9562_v29 }
 0x192   :  { %v8364_v33 = vpop.f32.mrb[9].mxu0  ;;  %v8385_v36 = vpop.f32.mrb[8].mxu1 }
 0x193   :  { %v8365_v37 = vadd.f32 %v8364_v33, %v8363_v31  ;;  %v8366_v38 = vpop.f32.mrb[10].mxu0  ;;  %v8386_v41 = vpop.f32.mrb[9].mxu1  ;;  %8666 = vmatpush3.bf16.msra.mxu0 %v9563_v30  ;;  %v9602_v30 = vld [vmem:[#allocation5 + $0xa78] sm:$0xff]  }
 0x194   :  { %v8367_v42 = vpop.f32.mrb[11].mxu0  ;;  %v8387_v44 = vadd.f32 %v8386_v41, %v8385_v36  ;;  %v8388_v45 = vpop.f32.mrb[10].mxu1  ;;  %8667 = vmatprep.subr.bf16.mxu0 %v9565_v34  ;;  %8688 = vmatpush3.bf16.msra.mxu1 %v9564_v32  ;;  %v9603_v32 = vld [vmem:[#allocation5 + $0xaf8] sm:$0xff]  }
 0x195   :  { %v6000_v43 = vadd.f32 %v8365_v37, %v10204_v57  ;;  %v8389_v47 = vpop.f32.mrb[11].mxu1  ;;  %8689 = vmatprep.subr.bf16.mxu1 %v9566_v39  ;;  %v9577_v57 = vld [vmem:[#allocation5 + $0xa80] sm:$0xff]   ;;  %v9604_v33 = vld [vmem:[#allocation5 + $0xa38] sm:$0xff]  }
 0x196   :  { %v93_v34 = vld [vmem:[#allocation2 + $0x28] sm:$0xff]  ;;  %v9606_v37 = vld [vmem:[#allocation5 + $0xb40] sm:$0xff]  }
 0x197   :  { %v10216_v49 = vadd.f32 %v8387_v44, %v6000_v43  ;;  %8668 = vmatpush3.bf16.msra.mxu0 %v9567_v40  ;;  %v1647_v36 = vrot.slane %v93_v34, %v10155_v35  ;;  %v1640_v38 = vcombine.high %v93_v34, %v93_v34  ;;  %v9605_v39 = vld [vmem:[#allocation5 + $0xab8] sm:$0xff]   ;;  %v9607_v42 = vld [vmem:[#allocation5 + $0xbc0] sm:$0xff]   ;;  %v9643_v34 = vld [vmem:[#allocation5 + $0xc48] sm:$0xff]  }
 0x198   :  { %8669 = vmatprep.subr.bf16.mxu0 %v9569_v48  ;;  %8690 = vmatpush3.bf16.msra.mxu1 %v9568_v46  ;;  %v9608_v44 = vld [vmem:[#allocation5 + $0xb00] sm:$0xff]  }
 0x199   :  { %8691 = vmatprep.subr.bf16.mxu1 %v9570_v50  ;;  %v1655_v40 = vcombine.high %v1647_v36, %v1647_v36  ;;  %v1663_v41 = vrot.slane %v1647_v36, %v10155_v35  ;;  %v10226_v43 = vrot.slane %v1640_v38, %v10155_v35  ;;  %v9609_v46 = vld [vmem:[#allocation5 + $0xb80] sm:$0xff]   ;;  %v9644_v36 = vld [vmem:[#allocation5 + $0xcc8] sm:$0xff]  }
 0x19a   :  { %v9646_v38 = vld [vmem:[#allocation5 + $0xc88] sm:$0xff]  }
 0x19b   :  { %8670 = vmatpush3.bf16.msra.mxu0 %v9571_v51  ;;  %v1677_v45 = vrot.slane %v1655_v40, %v10155_v35  ;;  %v1656_v47 = vcombine.high %v10226_v43, %v10226_v43  ;;  %v1685_v48 = vcombine.high %v1663_v41, %v1663_v41  ;;  %v9611_v51 = vld [vmem:[#allocation5 + $0xbc8] sm:$0xff]   ;;  %v9648_v40 = vld [vmem:[#allocation5 + $0xcd0] sm:$0xff]  }
 0x19c   :  { %8699 = vmatprep.subr.bf16.mxu0 %v9574_v54  ;;  %8692 = vmatpush3.bf16.msra.mxu1 %v9572_v52  ;;  %v9613_v54 = vld [vmem:[#allocation5 + $0xb88] sm:$0xff]  }
 0x19d   :  { %8721 = vmatprep.subr.bf16.mxu1 %v9575_v55  ;;  %v1687_v50 = vcombine.high %v1677_v45, %v1677_v45  ;;  %v1684_v52 = vrot.slane %v1656_v47, %v10155_v35  ;;  %v9655_v47 = vld [vmem:[#allocation5 + $0xc60] sm:$0xff]  }
 0x19e   :  { %6558 = vmatmul.mubr.bf16.vlgmr.msra.gmra.mrb[36].mxu0 %v1621_v53  ;;  %v9612_v53 = vld [vmem:[#allocation5 + $0xb08] sm:$0xff]  }
 0x19f   :  { %8700 = vmatpush3.bf16.msra.mxu0 %v9576_v56  ;;  %6598 = vmatmul.mubr.bf16.vlgmr.msra.gmra.mrb[36].mxu1 %v1637_v58  ;;  %v1688_v55 = vcombine.high %v1684_v52, %v1684_v52  ;;  %v9614_v56 = vld [vmem:[#allocation5 + $0xb50] sm:$0xff]  }
 0x1a0   :  { %8701 = vmatprep.subr.bf16.mxu0 %v9578_v59  ;;  %8722 = vmatpush3.bf16.msra.mxu1 %v9577_v57  ;;  %v9615_v57 = vld [vmem:[#allocation5 + $0xbd0] sm:$0xff]  }
 0x1a1   :  { %8723 = vmatprep.subr.bf16.mxu1 %v9579_v60  ;;  %6637 = vmatprep.mubr.bf16.mxu0 %v1677_v45  ;;  %v9616_v58 = vld [vmem:[#allocation5 + $0xb10] sm:$0xff]   ;;  %v9618_v60 = vld [vmem:[#allocation5 + $0xb58] sm:$0xff]  }
 0x1a2   :  { %6677 = vmatprep.mubr.bf16.mxu1 %v1687_v50  ;;  %v9617_v59 = vld [vmem:[#allocation5 + $0xb90] sm:$0xff]   ;;  %v9653_v45 = vld [vmem:[#allocation5 + $0xc18] sm:$0xff]   ;;  %v9658_v50 = vld [vmem:[#allocation5 + $0xca0] sm:$0xff]  }
 0x1a3   :  { %8702 = vmatpush3.bf16.msra.mxu0 %v9580_v61  ;;  %v9619_v61 = vld [vmem:[#allocation5 + $0xbd8] sm:$0xff]  }
 0x1a4   :  { %8703 = vmatprep.subr.bf16.mxu0 %v9582_v63  ;;  %8724 = vmatpush3.bf16.msra.mxu1 %v9581_v62  ;;  %v9620_v62 = vld [vmem:[#allocation5 + $0xb18] sm:$0xff]  }
 0x1a5   :  { %8725 = vmatprep.subr.bf16.mxu1 %v9583_v0  ;;  %v9621_v63 = vld [vmem:[#allocation5 + $0xb98] sm:$0xff]   ;;  %v9622_v0 = vld [vmem:[#allocation5 + $0xb60] sm:$0xff]  }
 0x1a7   :  { %8704 = vmatpush3.bf16.msra.mxu0 %v9584_v1  ;;  %v9623_v1 = vld [vmem:[#allocation5 + $0xbe0] sm:$0xff]  }
 0x1a8   :  { %8705 = vmatprep.subr.bf16.mxu0 %v9586_v3  ;;  %8726 = vmatpush3.bf16.msra.mxu1 %v9585_v2  ;;  %v9624_v2 = vld [vmem:[#allocation5 + $0xb20] sm:$0xff]  }
 0x1a9   :  { %8727 = vmatprep.subr.bf16.mxu1 %v9587_v4  ;;  %v9625_v3 = vld [vmem:[#allocation5 + $0xba0] sm:$0xff]   ;;  %v9626_v4 = vld [vmem:[#allocation5 + $0xb68] sm:$0xff]  }
 0x1ab   :  { %8706 = vmatpush3.bf16.msra.mxu0 %v9588_v5  ;;  %v9627_v5 = vld [vmem:[#allocation5 + $0xbe8] sm:$0xff]  }
 0x1ac   :  { %8707 = vmatprep.subr.bf16.mxu0 %v9590_v7  ;;  %8728 = vmatpush3.bf16.msra.mxu1 %v9589_v6  ;;  %v9628_v7 = vld [vmem:[#allocation5 + $0xb28] sm:$0xff]  }
 0x1ad   :  { %8729 = vmatprep.subr.bf16.mxu1 %v9591_v8 }
 0x1af   :  { %8708 = vmatpush3.bf16.msra.mxu0 %v9592_v9  ;;  %v9629_v9 = vld [vmem:[#allocation5 + $0xba8] sm:$0xff]  }
 0x1b0   :  { %8709 = vmatprep.subr.bf16.mxu0 %v9594_v11  ;;  %8730 = vmatpush3.bf16.msra.mxu1 %v9593_v10 }
 0x1b1   :  { %v8407_v14 = vpop.f32.mrb[12].mxu0  ;;  %8731 = vmatprep.subr.bf16.mxu1 %v9595_v12 }
 0x1b2   :  { %v8408_v16 = vpop.f32.mrb[13].mxu0  ;;  %v8429_v18 = vpop.f32.mrb[12].mxu1 }
 0x1b3   :  { %v8409_v19 = vadd.f32 %v8408_v16, %v8407_v14  ;;  %v8410_v20 = vpop.f32.mrb[14].mxu0  ;;  %v8430_v21 = vpop.f32.mrb[13].mxu1  ;;  %8710 = vmatpush3.bf16.msra.mxu0 %v9596_v13  ;;  %v9630_v13 = vld [vmem:[#allocation5 + $0xb70] sm:$0xff]  }
 0x1b4   :  { %v8411_v22 = vpop.f32.mrb[15].mxu0  ;;  %v8431_v26 = vadd.f32 %v8430_v21, %v8429_v18  ;;  %v8432_v27 = vpop.f32.mrb[14].mxu1  ;;  %8711 = vmatprep.subr.bf16.mxu0 %v9598_v17  ;;  %8732 = vmatpush3.bf16.msra.mxu1 %v9597_v15  ;;  %v9631_v14 = vld [vmem:[#allocation5 + $0xbf0] sm:$0xff]  }
 0x1b5   :  { %v6080_v25 = vadd.f32 %v8409_v19, %v10216_v49  ;;  %v8433_v29 = vpop.f32.mrb[15].mxu1  ;;  %8733 = vmatprep.subr.bf16.mxu1 %v9599_v23  ;;  %v9610_v49 = vld [vmem:[#allocation5 + $0xb48] sm:$0xff]   ;;  %v9632_v20 = vld [vmem:[#allocation5 + $0xb30] sm:$0xff]   ;;  %v9637_v27 = vld [vmem:[#allocation5 + $0xbb8] sm:$0xff]  }
 0x1b6   :  { %v9633_v22 = vld [vmem:[#allocation5 + $0xbb0] sm:$0xff]   ;;  %v9639_v29 = vld [vmem:[#allocation5 + $0xc40] sm:$0xff]  }
 0x1b7   :  { %v10221_v31 = vadd.f32 %v8431_v26, %v6080_v25  ;;  %8712 = vmatpush3.bf16.msra.mxu0 %v9600_v24  ;;  %v9634_v24 = vld [vmem:[#allocation5 + $0xb78] sm:$0xff]  }
 0x1b8   :  { %8713 = vmatprep.subr.bf16.mxu0 %v9602_v30  ;;  %8734 = vmatpush3.bf16.msra.mxu1 %v9601_v28  ;;  %v9635_v25 = vld [vmem:[#allocation5 + $0xbf8] sm:$0xff]   ;;  %v1670_v28 = vrot.slane %v10226_v43, %v10155_v35  ;;  %v9640_v30 = vld [vmem:[#allocation5 + $0xcc0] sm:$0xff]  }
 0x1b9   :  { %8735 = vmatprep.subr.bf16.mxu1 %v9603_v32  ;;  %v9636_v26 = vld [vmem:[#allocation5 + $0xb38] sm:$0xff]   ;;  %v9642_v32 = vld [vmem:[#allocation5 + $0xc80] sm:$0xff]  }
 0x1ba   :  { %v9651_v43 = vld [vmem:[#allocation5 + $0xc58] sm:$0xff]  }
 0x1bb   :  { %8714 = vmatpush3.bf16.msra.mxu0 %v9604_v33  ;;  %v1686_v33 = vcombine.high %v1670_v28, %v1670_v28 }
 0x1bc   :  { %8743 = vmatprep.subr.bf16.mxu0 %v9606_v37  ;;  %8736 = vmatpush3.bf16.msra.mxu1 %v9605_v39  ;;  %v9645_v37 = vld [vmem:[#allocation5 + $0xc08] sm:$0xff]   ;;  %v9647_v39 = vld [vmem:[#allocation5 + $0xc50] sm:$0xff]  }
 0x1bd   :  { %8765 = vmatprep.subr.bf16.mxu1 %v9607_v42  ;;  %v9650_v42 = vld [vmem:[#allocation5 + $0xc90] sm:$0xff]  }
 0x1be   :  { %6638 = vmatmul.mubr.bf16.vlgmr.msra.gmra.mrb[40].mxu0 %v1663_v41  ;;  %v9649_v41 = vld [vmem:[#allocation5 + $0xc10] sm:$0xff]  }
 0x1bf   :  { %8744 = vmatpush3.bf16.msra.mxu0 %v9608_v44  ;;  %6678 = vmatmul.mubr.bf16.vlgmr.msra.gmra.mrb[40].mxu1 %v1685_v48  ;;  %v9652_v44 = vld [vmem:[#allocation5 + $0xcd8] sm:$0xff]   ;;  %v9656_v48 = vld [vmem:[#allocation5 + $0xce0] sm:$0xff]  }
 0x1c0   :  { %8745 = vmatprep.subr.bf16.mxu0 %v9610_v49  ;;  %8766 = vmatpush3.bf16.msra.mxu1 %v9609_v46  ;;  %v9654_v46 = vld [vmem:[#allocation5 + $0xc98] sm:$0xff]   ;;  %v9657_v49 = vld [vmem:[#allocation5 + $0xc20] sm:$0xff]  }
 0x1c1   :  { %6717 = vmatprep.mubr.bf16.mxu0 %v1684_v52  ;;  %8767 = vmatprep.subr.bf16.mxu1 %v9611_v51  ;;  %v9659_v51 = vld [vmem:[#allocation5 + $0xc68] sm:$0xff]  }
 0x1c2   :  { %6757 = vmatprep.mubr.bf16.mxu1 %v1688_v55  ;;  %v9660_v52 = vld [vmem:[#allocation5 + $0xce8] sm:$0xff]  }
 0x1c3   :  { %8746 = vmatpush3.bf16.msra.mxu0 %v9612_v53 }
 0x1c4   :  { %8747 = vmatprep.subr.bf16.mxu0 %v9614_v56  ;;  %8768 = vmatpush3.bf16.msra.mxu1 %v9613_v54  ;;  %v9661_v54 = vld [vmem:[#allocation5 + $0xc28] sm:$0xff]   ;;  %v9663_v56 = vld [vmem:[#allocation5 + $0xc70] sm:$0xff]  }
 0x1c5   :  { %8769 = vmatprep.subr.bf16.mxu1 %v9615_v57 }
 0x1c7   :  { %8748 = vmatpush3.bf16.msra.mxu0 %v9616_v58 }
 0x1c8   :  { %8749 = vmatprep.subr.bf16.mxu0 %v9618_v60  ;;  %8770 = vmatpush3.bf16.msra.mxu1 %v9617_v59 }
 0x1c9   :  { %8771 = vmatprep.subr.bf16.mxu1 %v9619_v61  ;;  %v9662_v61 = vld [vmem:[#allocation5 + $0xca8] sm:$0xff]  }
 0x1cb   :  { %8750 = vmatpush3.bf16.msra.mxu0 %v9620_v62 }
 0x1cc   :  { %8751 = vmatprep.subr.bf16.mxu0 %v9622_v0  ;;  %8772 = vmatpush3.bf16.msra.mxu1 %v9621_v63  ;;  %v9664_v63 = vld [vmem:[#allocation5 + $0xcf0] sm:$0xff]  }
 0x1cd   :  { %8773 = vmatprep.subr.bf16.mxu1 %v9623_v1 }
 0x1cf   :  { %8752 = vmatpush3.bf16.msra.mxu0 %v9624_v2 }
 0x1d0   :  { %8753 = vmatprep.subr.bf16.mxu0 %v9626_v4  ;;  %8774 = vmatpush3.bf16.msra.mxu1 %v9625_v3  ;;  %v9665_v3 = vld [vmem:[#allocation5 + $0xc30] sm:$0xff]  }
 0x1d1   :  { %v8451_v6 = vpop.f32.mrb[16].mxu0  ;;  %8775 = vmatprep.subr.bf16.mxu1 %v9627_v5  ;;  %v9667_v5 = vld [vmem:[#allocation5 + $0xc78] sm:$0xff]  }
 0x1d2   :  { %v8452_v8 = vpop.f32.mrb[17].mxu0  ;;  %v8473_v10 = vpop.f32.mrb[16].mxu1 }
 0x1d3   :  { %v8453_v11 = vadd.f32 %v8452_v8, %v8451_v6  ;;  %v8454_v12 = vpop.f32.mrb[18].mxu0  ;;  %v8474_v15 = vpop.f32.mrb[17].mxu1  ;;  %8754 = vmatpush3.bf16.msra.mxu0 %v9628_v7  ;;  %v9666_v7 = vld [vmem:[#allocation5 + $0xcb0] sm:$0xff]   ;;  %v9668_v8 = vld [vmem:[#allocation5 + $0xcf8] sm:$0xff]  }
 0x1d4   :  { %v8455_v16 = vpop.f32.mrb[19].mxu0  ;;  %v8475_v18 = vadd.f32 %v8474_v15, %v8473_v10  ;;  %v8476_v19 = vpop.f32.mrb[18].mxu1  ;;  %8755 = vmatprep.subr.bf16.mxu0 %v9630_v13  ;;  %8776 = vmatpush3.bf16.msra.mxu1 %v9629_v9  ;;  %v9669_v9 = vld [vmem:[#allocation5 + $0xc38] sm:$0xff]   ;;  %v94_v10 = vld [vmem:[#allocation2 + $0x30] sm:$0xff] }
 0x1d5   :  { %v6160_v17 = vadd.f32 %v8453_v11, %v10221_v31  ;;  %v8477_v21 = vpop.f32.mrb[19].mxu1  ;;  %8777 = vmatprep.subr.bf16.mxu1 %v9631_v14  ;;  %v9641_v31 = vld [vmem:[#allocation5 + $0xc00] sm:$0xff]   ;;  %v1696_v11 = vrot.slane %v94_v10, %v10155_v35  ;;  %v1689_v13 = vcombine.high %v94_v10, %v94_v10  ;;  %v9670_v14 = vld [vmem:[#allocation5 + $0xcb8] sm:$0xff]   ;;  %v9708_v10 = vld [vmem:[#allocation5 + $0xe48] sm:$0xff]  }
 0x1d6   :  { %v9671_v12 = vld [vmem:[#allocation5 + $0xd40] sm:$0xff]  }
 0x1d7   :  { %v10233_v23 = vadd.f32 %v8475_v18, %v6160_v17  ;;  %8756 = vmatpush3.bf16.msra.mxu0 %v9632_v20  ;;  %v1704_v15 = vcombine.high %v1696_v11, %v1696_v11  ;;  %v1712_v16 = vrot.slane %v1696_v11, %v10155_v35  ;;  %v9672_v17 = vld [vmem:[#allocation5 + $0xdc0] sm:$0xff]   ;;  %v10243_v18 = vrot.slane %v1689_v13, %v10155_v35  ;;  %v9709_v11 = vld [vmem:[#allocation5 + $0xec8] sm:$0xff]  }
 0x1d8   :  { %8757 = vmatprep.subr.bf16.mxu0 %v9634_v24  ;;  %8778 = vmatpush3.bf16.msra.mxu1 %v9633_v22  ;;  %v9673_v19 = vld [vmem:[#allocation5 + $0xd00] sm:$0xff]   ;;  %v9675_v24 = vld [vmem:[#allocation5 + $0xd48] sm:$0xff]  }
 0x1d9   :  { %8779 = vmatprep.subr.bf16.mxu1 %v9635_v25  ;;  %v1726_v20 = vrot.slane %v1704_v15, %v10155_v35  ;;  %v9674_v21 = vld [vmem:[#allocation5 + $0xd80] sm:$0xff]   ;;  %v1705_v22 = vcombine.high %v10243_v18, %v10243_v18  ;;  %v9711_v13 = vld [vmem:[#allocation5 + $0xe88] sm:$0xff]   ;;  %v9713_v15 = vld [vmem:[#allocation5 + $0xed0] sm:$0xff]  }
 0x1db   :  { %8758 = vmatpush3.bf16.msra.mxu0 %v9636_v26  ;;  %v1736_v25 = vcombine.high %v1726_v20, %v1726_v20  ;;  %v9676_v26 = vld [vmem:[#allocation5 + $0xdc8] sm:$0xff]  }
 0x1dc   :  { %8787 = vmatprep.subr.bf16.mxu0 %v9639_v29  ;;  %8780 = vmatpush3.bf16.msra.mxu1 %v9637_v27  ;;  %v1733_v27 = vrot.slane %v1705_v22, %v10155_v35  ;;  %v9678_v29 = vld [vmem:[#allocation5 + $0xd88] sm:$0xff]   ;;  %v9720_v22 = vld [vmem:[#allocation5 + $0xe60] sm:$0xff]  }
 0x1dd   :  { %8809 = vmatprep.subr.bf16.mxu1 %v9640_v30 }
 0x1de   :  { %6718 = vmatmul.mubr.bf16.vlgmr.msra.gmra.mrb[44].mxu0 %v1670_v28  ;;  %v9677_v28 = vld [vmem:[#allocation5 + $0xd08] sm:$0xff]   ;;  %v1737_v30 = vcombine.high %v1733_v27, %v1733_v27 }
 0x1df   :  { %8788 = vmatpush3.bf16.msra.mxu0 %v9641_v31  ;;  %6758 = vmatmul.mubr.bf16.vlgmr.msra.gmra.mrb[44].mxu1 %v1686_v33  ;;  %v9679_v31 = vld [vmem:[#allocation5 + $0xd50] sm:$0xff]  }
 0x1e0   :  { %8789 = vmatprep.subr.bf16.mxu0 %v9643_v34  ;;  %8810 = vmatpush3.bf16.msra.mxu1 %v9642_v32  ;;  %v9680_v32 = vld [vmem:[#allocation5 + $0xdd0] sm:$0xff]  }
 0x1e1   :  { %8811 = vmatprep.subr.bf16.mxu1 %v9644_v36  ;;  %6797 = vmatprep.mubr.bf16.mxu0 %v1726_v20  ;;  %v9681_v33 = vld [vmem:[#allocation5 + $0xd10] sm:$0xff]   ;;  %v9683_v36 = vld [vmem:[#allocation5 + $0xd58] sm:$0xff]  }
 0x1e2   :  { %6837 = vmatprep.mubr.bf16.mxu1 %v1736_v25  ;;  %v9682_v34 = vld [vmem:[#allocation5 + $0xd90] sm:$0xff]   ;;  %v9718_v20 = vld [vmem:[#allocation5 + $0xe18] sm:$0xff]   ;;  %v9723_v25 = vld [vmem:[#allocation5 + $0xea0] sm:$0xff]  }
 0x1e3   :  { %8790 = vmatpush3.bf16.msra.mxu0 %v9645_v37  ;;  %v9684_v37 = vld [vmem:[#allocation5 + $0xdd8] sm:$0xff]  }
 0x1e4   :  { %8791 = vmatprep.subr.bf16.mxu0 %v9647_v39  ;;  %8812 = vmatpush3.bf16.msra.mxu1 %v9646_v38  ;;  %v9685_v38 = vld [vmem:[#allocation5 + $0xd18] sm:$0xff]  }
 0x1e5   :  { %8813 = vmatprep.subr.bf16.mxu1 %v9648_v40  ;;  %v9686_v39 = vld [vmem:[#allocation5 + $0xd98] sm:$0xff]   ;;  %v9687_v40 = vld [vmem:[#allocation5 + $0xd60] sm:$0xff]  }
 0x1e7   :  { %8792 = vmatpush3.bf16.msra.mxu0 %v9649_v41  ;;  %v9688_v41 = vld [vmem:[#allocation5 + $0xde0] sm:$0xff]  }
 0x1e8   :  { %8793 = vmatprep.subr.bf16.mxu0 %v9651_v43  ;;  %8814 = vmatpush3.bf16.msra.mxu1 %v9650_v42  ;;  %v9689_v42 = vld [vmem:[#allocation5 + $0xd20] sm:$0xff]  }
 0x1e9   :  { %8815 = vmatprep.subr.bf16.mxu1 %v9652_v44  ;;  %v9690_v43 = vld [vmem:[#allocation5 + $0xda0] sm:$0xff]   ;;  %v9691_v44 = vld [vmem:[#allocation5 + $0xd68] sm:$0xff]  }
 0x1eb   :  { %8794 = vmatpush3.bf16.msra.mxu0 %v9653_v45  ;;  %v9692_v45 = vld [vmem:[#allocation5 + $0xde8] sm:$0xff]  }
 0x1ec   :  { %8795 = vmatprep.subr.bf16.mxu0 %v9655_v47  ;;  %8816 = vmatpush3.bf16.msra.mxu1 %v9654_v46  ;;  %v9693_v47 = vld [vmem:[#allocation5 + $0xd28] sm:$0xff]  }
 0x1ed   :  { %8817 = vmatprep.subr.bf16.mxu1 %v9656_v48 }
 0x1ef   :  { %8796 = vmatpush3.bf16.msra.mxu0 %v9657_v49  ;;  %v9694_v49 = vld [vmem:[#allocation5 + $0xda8] sm:$0xff]  }
 0x1f0   :  { %8797 = vmatprep.subr.bf16.mxu0 %v9659_v51  ;;  %8818 = vmatpush3.bf16.msra.mxu1 %v9658_v50 }
 0x1f1   :  { %v8495_v53 = vpop.f32.mrb[20].mxu0  ;;  %8819 = vmatprep.subr.bf16.mxu1 %v9660_v52 }
 0x1f2   :  { %v8496_v55 = vpop.f32.mrb[21].mxu0  ;;  %v8517_v57 = vpop.f32.mrb[20].mxu1 }
 0x1f3   :  { %v8497_v58 = vadd.f32 %v8496_v55, %v8495_v53  ;;  %v8498_v59 = vpop.f32.mrb[22].mxu0  ;;  %v8518_v60 = vpop.f32.mrb[21].mxu1  ;;  %8798 = vmatpush3.bf16.msra.mxu0 %v9661_v54  ;;  %v9695_v53 = vld [vmem:[#allocation5 + $0xd70] sm:$0xff]  }
 0x1f4   :  { %v8499_v62 = vpop.f32.mrb[23].mxu0  ;;  %v8519_v1 = vadd.f32 %v8518_v60, %v8517_v57  ;;  %v8520_v2 = vpop.f32.mrb[22].mxu1  ;;  %8799 = vmatprep.subr.bf16.mxu0 %v9663_v56  ;;  %8820 = vmatpush3.bf16.msra.mxu1 %v9662_v61  ;;  %v9696_v54 = vld [vmem:[#allocation5 + $0xdf0] sm:$0xff]  }
 0x1f5   :  { %v6240_v0 = vadd.f32 %v8497_v58, %v10233_v23  ;;  %v8521_v4 = vpop.f32.mrb[23].mxu1  ;;  %8821 = vmatprep.subr.bf16.mxu1 %v9664_v63  ;;  %v1734_v23 = vcombine.high %v1712_v16, %v1712_v16  ;;  %v9697_v60 = vld [vmem:[#allocation5 + $0xd30] sm:$0xff]   ;;  %v9701_v2 = vld [vmem:[#allocation5 + $0xd38] sm:$0xff]  }
 0x1f6   :  { %v9698_v62 = vld [vmem:[#allocation5 + $0xdb0] sm:$0xff]   ;;  %v1719_v4 = vrot.slane %v10243_v18, %v10155_v35  ;;  %v9716_v18 = vld [vmem:[#allocation5 + $0xe58] sm:$0xff]  }
 0x1f7   :  { %v10238_v6 = vadd.f32 %v8519_v1, %v6240_v0  ;;  %8800 = vmatpush3.bf16.msra.mxu0 %v9665_v3  ;;  %v9699_v0 = vld [vmem:[#allocation5 + $0xd78] sm:$0xff]  }
 0x1f8   :  { %8801 = vmatprep.subr.bf16.mxu0 %v9667_v5  ;;  %8822 = vmatpush3.bf16.msra.mxu1 %v9666_v7  ;;  %v9700_v1 = vld [vmem:[#allocation5 + $0xdf8] sm:$0xff]   ;;  %v9704_v5 = vld [vmem:[#allocation5 + $0xe40] sm:$0xff]  }
 0x1f9   :  { %8823 = vmatprep.subr.bf16.mxu1 %v9668_v8  ;;  %v9702_v3 = vld [vmem:[#allocation5 + $0xdb8] sm:$0xff]   ;;  %v9706_v7 = vld [vmem:[#allocation5 + $0xe00] sm:$0xff]  }
 0x1fa   :  { %v9707_v8 = vld [vmem:[#allocation5 + $0xe80] sm:$0xff]  }
 0x1fb   :  { %8802 = vmatpush3.bf16.msra.mxu0 %v9669_v9  ;;  %v1735_v9 = vcombine.high %v1719_v4, %v1719_v4 }
 0x1fc   :  { %8831 = vmatprep.subr.bf16.mxu0 %v9671_v12  ;;  %8824 = vmatpush3.bf16.msra.mxu1 %v9670_v14  ;;  %v9710_v12 = vld [vmem:[#allocation5 + $0xe08] sm:$0xff]   ;;  %v9712_v14 = vld [vmem:[#allocation5 + $0xe50] sm:$0xff]  }
 0x1fd   :  { %8853 = vmatprep.subr.bf16.mxu1 %v9672_v17  ;;  %v9715_v17 = vld [vmem:[#allocation5 + $0xe90] sm:$0xff]  }
 0x1fe   :  { %6798 = vmatmul.mubr.bf16.vlgmr.msra.gmra.mrb[48].mxu0 %v1712_v16  ;;  %v9714_v16 = vld [vmem:[#allocation5 + $0xe10] sm:$0xff]  }
 0x1ff   :  { %8832 = vmatpush3.bf16.msra.mxu0 %v9673_v19  ;;  %6838 = vmatmul.mubr.bf16.vlgmr.msra.gmra.mrb[48].mxu1 %v1734_v23  ;;  %v9717_v19 = vld [vmem:[#allocation5 + $0xed8] sm:$0xff]   ;;  %v9721_v23 = vld [vmem:[#allocation5 + $0xee0] sm:$0xff]  }
 0x200   :  { %8833 = vmatprep.subr.bf16.mxu0 %v9675_v24  ;;  %8854 = vmatpush3.bf16.msra.mxu1 %v9674_v21  ;;  %v9719_v21 = vld [vmem:[#allocation5 + $0xe98] sm:$0xff]   ;;  %v9722_v24 = vld [vmem:[#allocation5 + $0xe20] sm:$0xff]  }
 0x201   :  { %6877 = vmatprep.mubr.bf16.mxu0 %v1733_v27  ;;  %8855 = vmatprep.subr.bf16.mxu1 %v9676_v26  ;;  %v9724_v26 = vld [vmem:[#allocation5 + $0xe68] sm:$0xff]  }
 0x202   :  { %6917 = vmatprep.mubr.bf16.mxu1 %v1737_v30  ;;  %v9725_v27 = vld [vmem:[#allocation5 + $0xee8] sm:$0xff]  }
 0x203   :  { %8834 = vmatpush3.bf16.msra.mxu0 %v9677_v28 }
 0x204   :  { %8835 = vmatprep.subr.bf16.mxu0 %v9679_v31  ;;  %8856 = vmatpush3.bf16.msra.mxu1 %v9678_v29  ;;  %v9726_v29 = vld [vmem:[#allocation5 + $0xe28] sm:$0xff]   ;;  %v9728_v31 = vld [vmem:[#allocation5 + $0xe70] sm:$0xff]  }
 0x205   :  { %8857 = vmatprep.subr.bf16.mxu1 %v9680_v32 }
 0x207   :  { %8836 = vmatpush3.bf16.msra.mxu0 %v9681_v33 }
 0x208   :  { %8837 = vmatprep.subr.bf16.mxu0 %v9683_v36  ;;  %8858 = vmatpush3.bf16.msra.mxu1 %v9682_v34 }
 0x209   :  { %8859 = vmatprep.subr.bf16.mxu1 %v9684_v37  ;;  %v9727_v37 = vld [vmem:[#allocation5 + $0xea8] sm:$0xff]  }
 0x20b   :  { %8838 = vmatpush3.bf16.msra.mxu0 %v9685_v38 }
 0x20c   :  { %8839 = vmatprep.subr.bf16.mxu0 %v9687_v40  ;;  %8860 = vmatpush3.bf16.msra.mxu1 %v9686_v39  ;;  %v9729_v39 = vld [vmem:[#allocation5 + $0xef0] sm:$0xff]  }
 0x20d   :  { %8861 = vmatprep.subr.bf16.mxu1 %v9688_v41 }
 0x20f   :  { %8840 = vmatpush3.bf16.msra.mxu0 %v9689_v42 }
 0x210   :  { %8841 = vmatprep.subr.bf16.mxu0 %v9691_v44  ;;  %8862 = vmatpush3.bf16.msra.mxu1 %v9690_v43  ;;  %v9730_v43 = vld [vmem:[#allocation5 + $0xe30] sm:$0xff]  }
 0x211   :  { %v8539_v46 = vpop.f32.mrb[24].mxu0  ;;  %8863 = vmatprep.subr.bf16.mxu1 %v9692_v45  ;;  %v9732_v45 = vld [vmem:[#allocation5 + $0xe78] sm:$0xff]  }
 0x212   :  { %v8540_v48 = vpop.f32.mrb[25].mxu0  ;;  %v8561_v50 = vpop.f32.mrb[24].mxu1 }
 0x213   :  { %v8541_v51 = vadd.f32 %v8540_v48, %v8539_v46  ;;  %v8542_v52 = vpop.f32.mrb[26].mxu0  ;;  %v8562_v55 = vpop.f32.mrb[25].mxu1  ;;  %8842 = vmatpush3.bf16.msra.mxu0 %v9693_v47  ;;  %v9731_v47 = vld [vmem:[#allocation5 + $0xeb0] sm:$0xff]   ;;  %v9733_v48 = vld [vmem:[#allocation5 + $0xef8] sm:$0xff]  }
 0x214   :  { %v8543_v56 = vpop.f32.mrb[27].mxu0  ;;  %v8563_v58 = vadd.f32 %v8562_v55, %v8561_v50  ;;  %v8564_v59 = vpop.f32.mrb[26].mxu1  ;;  %8843 = vmatprep.subr.bf16.mxu0 %v9695_v53  ;;  %8864 = vmatpush3.bf16.msra.mxu1 %v9694_v49  ;;  %v9734_v49 = vld [vmem:[#allocation5 + $0xe38] sm:$0xff]   ;;  %v95_v50 = vld [vmem:[#allocation2 + $0x38] sm:$0xff]  ;;  %v9736_v52 = vld [vmem:[#allocation5 + $0xf40] sm:$0xff]  }
 0x215   :  { %v6320_v57 = vadd.f32 %v8541_v51, %v10238_v6  ;;  %v8565_v61 = vpop.f32.mrb[27].mxu1  ;;  %8865 = vmatprep.subr.bf16.mxu1 %v9696_v54  ;;  %v9705_v6 = vld [vmem:[#allocation5 + $0xec0] sm:$0xff]   ;;  %v1745_v51 = vrot.slane %v95_v50, %v10155_v35  ;;  %v1738_v53 = vcombine.high %v95_v50, %v95_v50  ;;  %v9735_v54 = vld [vmem:[#allocation5 + $0xeb8] sm:$0xff]   ;;  %v9773_v50 = vld [vmem:[#allocation5 + $0x1048] sm:$0xff]  }
 0x216   :  { %v9738_v59 = vld [vmem:[#allocation5 + $0xf00] sm:$0xff]  }
 0x217   :  { %v10250_v63 = vadd.f32 %v8563_v58, %v6320_v57  ;;  %8844 = vmatpush3.bf16.msra.mxu0 %v9697_v60  ;;  %v1753_v55 = vcombine.high %v1745_v51, %v1745_v51  ;;  %v1761_v56 = vrot.slane %v1745_v51, %v10155_v35  ;;  %v9737_v57 = vld [vmem:[#allocation5 + $0xfc0] sm:$0xff]   ;;  %v10260_v58 = vrot.slane %v1738_v53, %v10155_v35  ;;  %v9774_v51 = vld [vmem:[#allocation5 + $0x10c8] sm:$0xff]  }
 0x218   :  { %8845 = vmatprep.subr.bf16.mxu0 %v9699_v0  ;;  %8866 = vmatpush3.bf16.msra.mxu1 %v9698_v62  ;;  %v9739_v61 = vld [vmem:[#allocation5 + $0xf80] sm:$0xff]   ;;  %v9740_v0 = vld [vmem:[#allocation5 + $0xf48] sm:$0xff]  }
 0x219   :  { %8867 = vmatprep.subr.bf16.mxu1 %v9700_v1  ;;  %v1775_v60 = vrot.slane %v1753_v55, %v10155_v35  ;;  %v1754_v62 = vcombine.high %v10260_v58, %v10260_v58  ;;  %v9776_v53 = vld [vmem:[#allocation5 + $0x1088] sm:$0xff]   ;;  %v9778_v55 = vld [vmem:[#allocation5 + $0x10d0] sm:$0xff]  }
 0x21b   :  { %8846 = vmatpush3.bf16.msra.mxu0 %v9701_v2  ;;  %v1785_v1 = vcombine.high %v1775_v60, %v1775_v60  ;;  %v9741_v2 = vld [vmem:[#allocation5 + $0xfc8] sm:$0xff]  }
 0x21c   :  { %8875 = vmatprep.subr.bf16.mxu0 %v9704_v5  ;;  %8868 = vmatpush3.bf16.msra.mxu1 %v9702_v3  ;;  %v1782_v3 = vrot.slane %v1754_v62, %v10155_v35  ;;  %v9743_v5 = vld [vmem:[#allocation5 + $0xf88] sm:$0xff]   ;;  %v9785_v62 = vld [vmem:[#allocation5 + $0x1060] sm:$0xff]  }
 0x21d   :  { %8897 = vmatprep.subr.bf16.mxu1 %v9705_v6 }
 0x21e   :  { %6878 = vmatmul.mubr.bf16.vlgmr.msra.gmra.mrb[52].mxu0 %v1719_v4  ;;  %v9742_v4 = vld [vmem:[#allocation5 + $0xf08] sm:$0xff]   ;;  %v1786_v6 = vcombine.high %v1782_v3, %v1782_v3 }
 0x21f   :  { %8876 = vmatpush3.bf16.msra.mxu0 %v9706_v7  ;;  %6918 = vmatmul.mubr.bf16.vlgmr.msra.gmra.mrb[52].mxu1 %v1735_v9  ;;  %v9744_v7 = vld [vmem:[#allocation5 + $0xf50] sm:$0xff]  }
 0x220   :  { %8877 = vmatprep.subr.bf16.mxu0 %v9708_v10  ;;  %8898 = vmatpush3.bf16.msra.mxu1 %v9707_v8  ;;  %v9745_v8 = vld [vmem:[#allocation5 + $0xfd0] sm:$0xff]  }
 0x221   :  { %8899 = vmatprep.subr.bf16.mxu1 %v9709_v11  ;;  %6957 = vmatprep.mubr.bf16.mxu0 %v1775_v60  ;;  %v9746_v9 = vld [vmem:[#allocation5 + $0xf10] sm:$0xff]   ;;  %v9748_v11 = vld [vmem:[#allocation5 + $0xf58] sm:$0xff]  }
 0x222   :  { %6997 = vmatprep.mubr.bf16.mxu1 %v1785_v1  ;;  %v9747_v10 = vld [vmem:[#allocation5 + $0xf90] sm:$0xff]   ;;  %v9783_v60 = vld [vmem:[#allocation5 + $0x1018] sm:$0xff]   ;;  %v9788_v1 = vld [vmem:[#allocation5 + $0x10a0] sm:$0xff]  }
 0x223   :  { %8878 = vmatpush3.bf16.msra.mxu0 %v9710_v12  ;;  %v9749_v12 = vld [vmem:[#allocation5 + $0xfd8] sm:$0xff]  }
 0x224   :  { %8879 = vmatprep.subr.bf16.mxu0 %v9712_v14  ;;  %8900 = vmatpush3.bf16.msra.mxu1 %v9711_v13  ;;  %v9750_v13 = vld [vmem:[#allocation5 + $0xf18] sm:$0xff]  }
 0x225   :  { %8901 = vmatprep.subr.bf16.mxu1 %v9713_v15  ;;  %v9751_v14 = vld [vmem:[#allocation5 + $0xf98] sm:$0xff]   ;;  %v9752_v15 = vld [vmem:[#allocation5 + $0xf60] sm:$0xff]  }
 0x227   :  { %8880 = vmatpush3.bf16.msra.mxu0 %v9714_v16  ;;  %v9753_v16 = vld [vmem:[#allocation5 + $0xfe0] sm:$0xff]  }
 0x228   :  { %8881 = vmatprep.subr.bf16.mxu0 %v9716_v18  ;;  %8902 = vmatpush3.bf16.msra.mxu1 %v9715_v17  ;;  %v9754_v17 = vld [vmem:[#allocation5 + $0xf20] sm:$0xff]  }
 0x229   :  { %8903 = vmatprep.subr.bf16.mxu1 %v9717_v19  ;;  %v9755_v18 = vld [vmem:[#allocation5 + $0xfa0] sm:$0xff]   ;;  %v9756_v19 = vld [vmem:[#allocation5 + $0xf68] sm:$0xff]  }
 0x22b   :  { %8882 = vmatpush3.bf16.msra.mxu0 %v9718_v20  ;;  %v9757_v20 = vld [vmem:[#allocation5 + $0xfe8] sm:$0xff]  }
 0x22c   :  { %8883 = vmatprep.subr.bf16.mxu0 %v9720_v22  ;;  %8904 = vmatpush3.bf16.msra.mxu1 %v9719_v21  ;;  %v9758_v22 = vld [vmem:[#allocation5 + $0xf28] sm:$0xff]  }
 0x22d   :  { %8905 = vmatprep.subr.bf16.mxu1 %v9721_v23 }
 0x22f   :  { %8884 = vmatpush3.bf16.msra.mxu0 %v9722_v24  ;;  %v9759_v24 = vld [vmem:[#allocation5 + $0xfa8] sm:$0xff]  }
 0x230   :  { %8885 = vmatprep.subr.bf16.mxu0 %v9724_v26  ;;  %8906 = vmatpush3.bf16.msra.mxu1 %v9723_v25 }
 0x231   :  { %v8583_v28 = vpop.f32.mrb[28].mxu0  ;;  %8907 = vmatprep.subr.bf16.mxu1 %v9725_v27 }
 0x232   :  { %v8584_v30 = vpop.f32.mrb[29].mxu0  ;;  %v8605_v32 = vpop.f32.mrb[28].mxu1 }
 0x233   :  { %v8585_v33 = vadd.f32 %v8584_v30, %v8583_v28  ;;  %v8586_v34 = vpop.f32.mrb[30].mxu0  ;;  %v8606_v36 = vpop.f32.mrb[29].mxu1  ;;  %8886 = vmatpush3.bf16.msra.mxu0 %v9726_v29  ;;  %v9760_v28 = vld [vmem:[#allocation5 + $0xf70] sm:$0xff]  }
 0x234   :  { %v8587_v38 = vpop.f32.mrb[31].mxu0  ;;  %v8607_v41 = vadd.f32 %v8606_v36, %v8605_v32  ;;  %v8608_v42 = vpop.f32.mrb[30].mxu1  ;;  %8887 = vmatprep.subr.bf16.mxu0 %v9728_v31  ;;  %8908 = vmatpush3.bf16.msra.mxu1 %v9727_v37  ;;  %v9761_v29 = vld [vmem:[#allocation5 + $0xff0] sm:$0xff]  }
 0x235   :  { %v6400_v40 = vadd.f32 %v8585_v33, %v10250_v63  ;;  %v8609_v44 = vpop.f32.mrb[31].mxu1  ;;  %8909 = vmatprep.subr.bf16.mxu1 %v9729_v39  ;;  %v1783_v63 = vcombine.high %v1761_v56, %v1761_v56  ;;  %v9762_v36 = vld [vmem:[#allocation5 + $0xf30] sm:$0xff]   ;;  %v9766_v42 = vld [vmem:[#allocation5 + $0xf38] sm:$0xff]  }
 0x236   :  { %v9763_v38 = vld [vmem:[#allocation5 + $0xfb0] sm:$0xff]   ;;  %v1768_v44 = vrot.slane %v10260_v58, %v10155_v35  ;;  %v9781_v58 = vld [vmem:[#allocation5 + $0x1058] sm:$0xff]  }
 0x237   :  { %v10255_v46 = vadd.f32 %v8607_v41, %v6400_v40  ;;  %8888 = vmatpush3.bf16.msra.mxu0 %v9730_v43  ;;  %v9764_v40 = vld [vmem:[#allocation5 + $0xf78] sm:$0xff]  }
 0x238   :  { %8889 = vmatprep.subr.bf16.mxu0 %v9732_v45  ;;  %8910 = vmatpush3.bf16.msra.mxu1 %v9731_v47  ;;  %v9765_v41 = vld [vmem:[#allocation5 + $0xff8] sm:$0xff]   ;;  %v9769_v45 = vld [vmem:[#allocation5 + $0x1040] sm:$0xff]  }
 0x239   :  { %8911 = vmatprep.subr.bf16.mxu1 %v9733_v48  ;;  %v9767_v43 = vld [vmem:[#allocation5 + $0xfb8] sm:$0xff]   ;;  %v9771_v47 = vld [vmem:[#allocation5 + $0x1000] sm:$0xff]  }
 0x23a   :  { %v9772_v48 = vld [vmem:[#allocation5 + $0x1080] sm:$0xff]  }
 0x23b   :  { %8890 = vmatpush3.bf16.msra.mxu0 %v9734_v49  ;;  %v1784_v49 = vcombine.high %v1768_v44, %v1768_v44 }
 0x23c   :  { %8919 = vmatprep.subr.bf16.mxu0 %v9736_v52  ;;  %8912 = vmatpush3.bf16.msra.mxu1 %v9735_v54  ;;  %v9775_v52 = vld [vmem:[#allocation5 + $0x1008] sm:$0xff]   ;;  %v9777_v54 = vld [vmem:[#allocation5 + $0x1050] sm:$0xff]  }
 0x23d   :  { %8941 = vmatprep.subr.bf16.mxu1 %v9737_v57  ;;  %v9780_v57 = vld [vmem:[#allocation5 + $0x1090] sm:$0xff]  }
 0x23e   :  { %6958 = vmatmul.mubr.bf16.vlgmr.msra.gmra.mrb[56].mxu0 %v1761_v56  ;;  %v9779_v56 = vld [vmem:[#allocation5 + $0x1010] sm:$0xff]  }
 0x23f   :  { %8920 = vmatpush3.bf16.msra.mxu0 %v9738_v59  ;;  %6998 = vmatmul.mubr.bf16.vlgmr.msra.gmra.mrb[56].mxu1 %v1783_v63  ;;  %v9782_v59 = vld [vmem:[#allocation5 + $0x10d8] sm:$0xff]   ;;  %v9786_v63 = vld [vmem:[#allocation5 + $0x10e0] sm:$0xff]  }
 0x240   :  { %8921 = vmatprep.subr.bf16.mxu0 %v9740_v0  ;;  %8942 = vmatpush3.bf16.msra.mxu1 %v9739_v61  ;;  %v9784_v61 = vld [vmem:[#allocation5 + $0x1098] sm:$0xff]   ;;  %v9787_v0 = vld [vmem:[#allocation5 + $0x1020] sm:$0xff]  }
 0x241   :  { %7037 = vmatprep.mubr.bf16.mxu0 %v1782_v3  ;;  %8943 = vmatprep.subr.bf16.mxu1 %v9741_v2  ;;  %v9789_v2 = vld [vmem:[#allocation5 + $0x1068] sm:$0xff]  }
 0x242   :  { %7077 = vmatprep.mubr.bf16.mxu1 %v1786_v6  ;;  %v9790_v3 = vld [vmem:[#allocation5 + $0x10e8] sm:$0xff]  }
 0x243   :  { %8922 = vmatpush3.bf16.msra.mxu0 %v9742_v4 }
 0x244   :  { %8923 = vmatprep.subr.bf16.mxu0 %v9744_v7  ;;  %8944 = vmatpush3.bf16.msra.mxu1 %v9743_v5  ;;  %v9791_v5 = vld [vmem:[#allocation5 + $0x1028] sm:$0xff]   ;;  %v9793_v7 = vld [vmem:[#allocation5 + $0x1070] sm:$0xff]  }
 0x245   :  { %8945 = vmatprep.subr.bf16.mxu1 %v9745_v8 }
 0x247   :  { %8924 = vmatpush3.bf16.msra.mxu0 %v9746_v9 }
 0x248   :  { %8925 = vmatprep.subr.bf16.mxu0 %v9748_v11  ;;  %8946 = vmatpush3.bf16.msra.mxu1 %v9747_v10 }
 0x249   :  { %8947 = vmatprep.subr.bf16.mxu1 %v9749_v12  ;;  %v9792_v12 = vld [vmem:[#allocation5 + $0x10a8] sm:$0xff]  }
 0x24b   :  { %8926 = vmatpush3.bf16.msra.mxu0 %v9750_v13 }
 0x24c   :  { %8927 = vmatprep.subr.bf16.mxu0 %v9752_v15  ;;  %8948 = vmatpush3.bf16.msra.mxu1 %v9751_v14  ;;  %v9794_v14 = vld [vmem:[#allocation5 + $0x10f0] sm:$0xff]  }
 0x24d   :  { %8949 = vmatprep.subr.bf16.mxu1 %v9753_v16 }
 0x24f   :  { %8928 = vmatpush3.bf16.msra.mxu0 %v9754_v17 }
 0x250   :  { %8929 = vmatprep.subr.bf16.mxu0 %v9756_v19  ;;  %8950 = vmatpush3.bf16.msra.mxu1 %v9755_v18  ;;  %v9795_v18 = vld [vmem:[#allocation5 + $0x1030] sm:$0xff]  }
 0x251   :  { %v8627_v21 = vpop.f32.mrb[32].mxu0  ;;  %8951 = vmatprep.subr.bf16.mxu1 %v9757_v20  ;;  %v9797_v20 = vld [vmem:[#allocation5 + $0x1078] sm:$0xff]  }
 0x252   :  { %v8628_v23 = vpop.f32.mrb[33].mxu0  ;;  %v8649_v25 = vpop.f32.mrb[32].mxu1 }
 0x253   :  { %v8629_v26 = vadd.f32 %v8628_v23, %v8627_v21  ;;  %v8630_v27 = vpop.f32.mrb[34].mxu0  ;;  %v8650_v30 = vpop.f32.mrb[33].mxu1  ;;  %8930 = vmatpush3.bf16.msra.mxu0 %v9758_v22  ;;  %v9796_v22 = vld [vmem:[#allocation5 + $0x10b0] sm:$0xff]   ;;  %v9798_v23 = vld [vmem:[#allocation5 + $0x10f8] sm:$0xff]  }
 0x254   :  { %v8631_v31 = vpop.f32.mrb[35].mxu0  ;;  %v8651_v33 = vadd.f32 %v8650_v30, %v8649_v25  ;;  %v8652_v34 = vpop.f32.mrb[34].mxu1  ;;  %8931 = vmatprep.subr.bf16.mxu0 %v9760_v28  ;;  %8952 = vmatpush3.bf16.msra.mxu1 %v9759_v24  ;;  %v9799_v24 = vld [vmem:[#allocation5 + $0x1038] sm:$0xff]   ;;  %v96_v25 = vld [vmem:[#allocation2 + $0x40] sm:$0xff]  ;;  %v9801_v27 = vld [vmem:[#allocation5 + $0x1140] sm:$0xff]  }
 0x255   :  { %v6480_v32 = vadd.f32 %v8629_v26, %v10255_v46  ;;  %v8653_v37 = vpop.f32.mrb[35].mxu1  ;;  %8953 = vmatprep.subr.bf16.mxu1 %v9761_v29  ;;  %v9770_v46 = vld [vmem:[#allocation5 + $0x10c0] sm:$0xff]   ;;  %v1794_v26 = vrot.slane %v96_v25, %v10155_v35  ;;  %v1787_v28 = vcombine.high %v96_v25, %v96_v25  ;;  %v9800_v29 = vld [vmem:[#allocation5 + $0x10b8] sm:$0xff]   ;;  %v9838_v25 = vld [vmem:[#allocation5 + $0x1248] sm:$0xff]  }
 0x256   :  { %v9803_v34 = vld [vmem:[#allocation5 + $0x1100] sm:$0xff]  }
 0x257   :  { %v10267_v39 = vadd.f32 %v8651_v33, %v6480_v32  ;;  %8932 = vmatpush3.bf16.msra.mxu0 %v9762_v36  ;;  %v1802_v30 = vcombine.high %v1794_v26, %v1794_v26  ;;  %v1810_v31 = vrot.slane %v1794_v26, %v10155_v35  ;;  %v9802_v32 = vld [vmem:[#allocation5 + $0x11c0] sm:$0xff]   ;;  %v10277_v33 = vrot.slane %v1787_v28, %v10155_v35  ;;  %v9839_v26 = vld [vmem:[#allocation5 + $0x12c8] sm:$0xff]  }
 0x258   :  { %8933 = vmatprep.subr.bf16.mxu0 %v9764_v40  ;;  %8954 = vmatpush3.bf16.msra.mxu1 %v9763_v38  ;;  %v9804_v37 = vld [vmem:[#allocation5 + $0x1180] sm:$0xff]   ;;  %v9805_v40 = vld [vmem:[#allocation5 + $0x1148] sm:$0xff]  }
 0x259   :  { %8955 = vmatprep.subr.bf16.mxu1 %v9765_v41  ;;  %v1824_v36 = vrot.slane %v1802_v30, %v10155_v35  ;;  %v1803_v38 = vcombine.high %v10277_v33, %v10277_v33  ;;  %v9841_v28 = vld [vmem:[#allocation5 + $0x1288] sm:$0xff]   ;;  %v9843_v30 = vld [vmem:[#allocation5 + $0x12d0] sm:$0xff]  }
 0x25b   :  { %8934 = vmatpush3.bf16.msra.mxu0 %v9766_v42  ;;  %v1834_v41 = vcombine.high %v1824_v36, %v1824_v36  ;;  %v9806_v42 = vld [vmem:[#allocation5 + $0x11c8] sm:$0xff]  }
 0x25c   :  { %8963 = vmatprep.subr.bf16.mxu0 %v9769_v45  ;;  %8956 = vmatpush3.bf16.msra.mxu1 %v9767_v43  ;;  %v1831_v43 = vrot.slane %v1803_v38, %v10155_v35  ;;  %v9808_v45 = vld [vmem:[#allocation5 + $0x1188] sm:$0xff]   ;;  %v9850_v38 = vld [vmem:[#allocation5 + $0x1260] sm:$0xff]  }
 0x25d   :  { %8985 = vmatprep.subr.bf16.mxu1 %v9770_v46 }
 0x25e   :  { %7038 = vmatmul.mubr.bf16.vlgmr.msra.gmra.mrb[60].mxu0 %v1768_v44  ;;  %v9807_v44 = vld [vmem:[#allocation5 + $0x1108] sm:$0xff]   ;;  %v1835_v46 = vcombine.high %v1831_v43, %v1831_v43 }
 0x25f   :  { %8964 = vmatpush3.bf16.msra.mxu0 %v9771_v47  ;;  %7078 = vmatmul.mubr.bf16.vlgmr.msra.gmra.mrb[60].mxu1 %v1784_v49  ;;  %v9809_v47 = vld [vmem:[#allocation5 + $0x1150] sm:$0xff]  }
 0x260   :  { %8965 = vmatprep.subr.bf16.mxu0 %v9773_v50  ;;  %8986 = vmatpush3.bf16.msra.mxu1 %v9772_v48  ;;  %v9810_v48 = vld [vmem:[#allocation5 + $0x11d0] sm:$0xff]  }
 0x261   :  { %8987 = vmatprep.subr.bf16.mxu1 %v9774_v51  ;;  %7117 = vmatprep.mubr.bf16.mxu0 %v1824_v36  ;;  %v9811_v49 = vld [vmem:[#allocation5 + $0x1110] sm:$0xff]   ;;  %v9813_v51 = vld [vmem:[#allocation5 + $0x1158] sm:$0xff]  }
 0x262   :  { %7157 = vmatprep.mubr.bf16.mxu1 %v1834_v41  ;;  %v9812_v50 = vld [vmem:[#allocation5 + $0x1190] sm:$0xff]   ;;  %v9848_v36 = vld [vmem:[#allocation5 + $0x1218] sm:$0xff]   ;;  %v9853_v41 = vld [vmem:[#allocation5 + $0x12a0] sm:$0xff]  }
 0x263   :  { %8966 = vmatpush3.bf16.msra.mxu0 %v9775_v52  ;;  %v9814_v52 = vld [vmem:[#allocation5 + $0x11d8] sm:$0xff]  }
 0x264   :  { %8967 = vmatprep.subr.bf16.mxu0 %v9777_v54  ;;  %8988 = vmatpush3.bf16.msra.mxu1 %v9776_v53  ;;  %v9815_v53 = vld [vmem:[#allocation5 + $0x1118] sm:$0xff]  }
 0x265   :  { %8989 = vmatprep.subr.bf16.mxu1 %v9778_v55  ;;  %v9816_v54 = vld [vmem:[#allocation5 + $0x1198] sm:$0xff]   ;;  %v9817_v55 = vld [vmem:[#allocation5 + $0x1160] sm:$0xff]  }
 0x267   :  { %8968 = vmatpush3.bf16.msra.mxu0 %v9779_v56  ;;  %v9818_v56 = vld [vmem:[#allocation5 + $0x11e0] sm:$0xff]  }
 0x268   :  { %8969 = vmatprep.subr.bf16.mxu0 %v9781_v58  ;;  %8990 = vmatpush3.bf16.msra.mxu1 %v9780_v57  ;;  %v9819_v57 = vld [vmem:[#allocation5 + $0x1120] sm:$0xff]  }
 0x269   :  { %8991 = vmatprep.subr.bf16.mxu1 %v9782_v59  ;;  %v9820_v58 = vld [vmem:[#allocation5 + $0x11a0] sm:$0xff]   ;;  %v9821_v59 = vld [vmem:[#allocation5 + $0x1168] sm:$0xff]  }
 0x26b   :  { %8970 = vmatpush3.bf16.msra.mxu0 %v9783_v60  ;;  %v9822_v60 = vld [vmem:[#allocation5 + $0x11e8] sm:$0xff]  }
 0x26c   :  { %8971 = vmatprep.subr.bf16.mxu0 %v9785_v62  ;;  %8992 = vmatpush3.bf16.msra.mxu1 %v9784_v61  ;;  %v9823_v62 = vld [vmem:[#allocation5 + $0x1128] sm:$0xff]  }
 0x26d   :  { %8993 = vmatprep.subr.bf16.mxu1 %v9786_v63 }
 0x26f   :  { %8972 = vmatpush3.bf16.msra.mxu0 %v9787_v0  ;;  %v9824_v0 = vld [vmem:[#allocation5 + $0x11a8] sm:$0xff]  }
 0x270   :  { %8973 = vmatprep.subr.bf16.mxu0 %v9789_v2  ;;  %8994 = vmatpush3.bf16.msra.mxu1 %v9788_v1 }
 0x271   :  { %v8671_v4 = vpop.f32.mrb[36].mxu0  ;;  %8995 = vmatprep.subr.bf16.mxu1 %v9790_v3 }
 0x272   :  { %v8672_v6 = vpop.f32.mrb[37].mxu0  ;;  %v8693_v8 = vpop.f32.mrb[36].mxu1 }
 0x273   :  { %v8673_v9 = vadd.f32 %v8672_v6, %v8671_v4  ;;  %v8674_v10 = vpop.f32.mrb[38].mxu0  ;;  %v8694_v11 = vpop.f32.mrb[37].mxu1  ;;  %8974 = vmatpush3.bf16.msra.mxu0 %v9791_v5  ;;  %v9825_v4 = vld [vmem:[#allocation5 + $0x1170] sm:$0xff]  }
 0x274   :  { %v8675_v13 = vpop.f32.mrb[39].mxu0  ;;  %v8695_v16 = vadd.f32 %v8694_v11, %v8693_v8  ;;  %v8696_v17 = vpop.f32.mrb[38].mxu1  ;;  %8975 = vmatprep.subr.bf16.mxu0 %v9793_v7  ;;  %8996 = vmatpush3.bf16.msra.mxu1 %v9792_v12  ;;  %v9826_v5 = vld [vmem:[#allocation5 + $0x11f0] sm:$0xff]  }
 0x275   :  { %v6560_v15 = vadd.f32 %v8673_v9, %v10267_v39  ;;  %v8697_v19 = vpop.f32.mrb[39].mxu1  ;;  %8997 = vmatprep.subr.bf16.mxu1 %v9794_v14  ;;  %v1832_v39 = vcombine.high %v1810_v31, %v1810_v31  ;;  %v9827_v11 = vld [vmem:[#allocation5 + $0x1130] sm:$0xff]   ;;  %v9831_v17 = vld [vmem:[#allocation5 + $0x1138] sm:$0xff]  }
 0x276   :  { %v9828_v13 = vld [vmem:[#allocation5 + $0x11b0] sm:$0xff]   ;;  %v1817_v19 = vrot.slane %v10277_v33, %v10155_v35  ;;  %v9846_v33 = vld [vmem:[#allocation5 + $0x1258] sm:$0xff]  }
 0x277   :  { %v10272_v21 = vadd.f32 %v8695_v16, %v6560_v15  ;;  %8976 = vmatpush3.bf16.msra.mxu0 %v9795_v18  ;;  %v9829_v15 = vld [vmem:[#allocation5 + $0x1178] sm:$0xff]  }
 0x278   :  { %8977 = vmatprep.subr.bf16.mxu0 %v9797_v20  ;;  %8998 = vmatpush3.bf16.msra.mxu1 %v9796_v22  ;;  %v9830_v16 = vld [vmem:[#allocation5 + $0x11f8] sm:$0xff]   ;;  %v9834_v20 = vld [vmem:[#allocation5 + $0x1240] sm:$0xff]  }
 0x279   :  { %8999 = vmatprep.subr.bf16.mxu1 %v9798_v23  ;;  %v9832_v18 = vld [vmem:[#allocation5 + $0x11b8] sm:$0xff]   ;;  %v9836_v22 = vld [vmem:[#allocation5 + $0x1200] sm:$0xff]  }
 0x27a   :  { %v9837_v23 = vld [vmem:[#allocation5 + $0x1280] sm:$0xff]  }
 0x27b   :  { %8978 = vmatpush3.bf16.msra.mxu0 %v9799_v24  ;;  %v1833_v24 = vcombine.high %v1817_v19, %v1817_v19 }
 0x27c   :  { %9007 = vmatprep.subr.bf16.mxu0 %v9801_v27  ;;  %9000 = vmatpush3.bf16.msra.mxu1 %v9800_v29  ;;  %v9840_v27 = vld [vmem:[#allocation5 + $0x1208] sm:$0xff]   ;;  %v9842_v29 = vld [vmem:[#allocation5 + $0x1250] sm:$0xff]  }
 0x27d   :  { %9029 = vmatprep.subr.bf16.mxu1 %v9802_v32  ;;  %v9845_v32 = vld [vmem:[#allocation5 + $0x1290] sm:$0xff]  }
 0x27e   :  { %7118 = vmatmul.mubr.bf16.vlgmr.msra.gmra.mrb[64].mxu0 %v1810_v31  ;;  %v9844_v31 = vld [vmem:[#allocation5 + $0x1210] sm:$0xff]  }
 0x27f   :  { %9008 = vmatpush3.bf16.msra.mxu0 %v9803_v34  ;;  %7158 = vmatmul.mubr.bf16.vlgmr.msra.gmra.mrb[64].mxu1 %v1832_v39  ;;  %v9847_v34 = vld [vmem:[#allocation5 + $0x12d8] sm:$0xff]   ;;  %v9851_v39 = vld [vmem:[#allocation5 + $0x12e0] sm:$0xff]  }
 0x280   :  { %9009 = vmatprep.subr.bf16.mxu0 %v9805_v40  ;;  %9030 = vmatpush3.bf16.msra.mxu1 %v9804_v37  ;;  %v9849_v37 = vld [vmem:[#allocation5 + $0x1298] sm:$0xff]   ;;  %v9852_v40 = vld [vmem:[#allocation5 + $0x1220] sm:$0xff]  }
 0x281   :  { %7197 = vmatprep.mubr.bf16.mxu0 %v1831_v43  ;;  %9031 = vmatprep.subr.bf16.mxu1 %v9806_v42  ;;  %v9854_v42 = vld [vmem:[#allocation5 + $0x1268] sm:$0xff]  }
 0x282   :  { %7237 = vmatprep.mubr.bf16.mxu1 %v1835_v46  ;;  %v9855_v43 = vld [vmem:[#allocation5 + $0x12e8] sm:$0xff]  }
 0x283   :  { %9010 = vmatpush3.bf16.msra.mxu0 %v9807_v44 }
 0x284   :  { %9011 = vmatprep.subr.bf16.mxu0 %v9809_v47  ;;  %9032 = vmatpush3.bf16.msra.mxu1 %v9808_v45  ;;  %v9856_v45 = vld [vmem:[#allocation5 + $0x1228] sm:$0xff]   ;;  %v9858_v47 = vld [vmem:[#allocation5 + $0x1270] sm:$0xff]  }
 0x285   :  { %9033 = vmatprep.subr.bf16.mxu1 %v9810_v48 }
 0x287   :  { %9012 = vmatpush3.bf16.msra.mxu0 %v9811_v49 }
 0x288   :  { %9013 = vmatprep.subr.bf16.mxu0 %v9813_v51  ;;  %9034 = vmatpush3.bf16.msra.mxu1 %v9812_v50 }
 0x289   :  { %9035 = vmatprep.subr.bf16.mxu1 %v9814_v52  ;;  %v9857_v52 = vld [vmem:[#allocation5 + $0x12a8] sm:$0xff]  }
 0x28b   :  { %9014 = vmatpush3.bf16.msra.mxu0 %v9815_v53 }
 0x28c   :  { %9015 = vmatprep.subr.bf16.mxu0 %v9817_v55  ;;  %9036 = vmatpush3.bf16.msra.mxu1 %v9816_v54  ;;  %v9859_v54 = vld [vmem:[#allocation5 + $0x12f0] sm:$0xff]  }
 0x28d   :  { %9037 = vmatprep.subr.bf16.mxu1 %v9818_v56 }
 0x28f   :  { %9016 = vmatpush3.bf16.msra.mxu0 %v9819_v57 }
 0x290   :  { %9017 = vmatprep.subr.bf16.mxu0 %v9821_v59  ;;  %9038 = vmatpush3.bf16.msra.mxu1 %v9820_v58  ;;  %v9860_v58 = vld [vmem:[#allocation5 + $0x1230] sm:$0xff]  }
 0x291   :  { %v8715_v61 = vpop.f32.mrb[40].mxu0  ;;  %9039 = vmatprep.subr.bf16.mxu1 %v9822_v60  ;;  %v9862_v60 = vld [vmem:[#allocation5 + $0x1278] sm:$0xff]  }
 0x292   :  { %v8716_v63 = vpop.f32.mrb[41].mxu0  ;;  %v8737_v1 = vpop.f32.mrb[40].mxu1 }
 0x293   :  { %v8717_v2 = vadd.f32 %v8716_v63, %v8715_v61  ;;  %v8718_v3 = vpop.f32.mrb[42].mxu0  ;;  %v8738_v6 = vpop.f32.mrb[41].mxu1  ;;  %9018 = vmatpush3.bf16.msra.mxu0 %v9823_v62  ;;  %v9861_v62 = vld [vmem:[#allocation5 + $0x12b0] sm:$0xff]   ;;  %v9863_v63 = vld [vmem:[#allocation5 + $0x12f8] sm:$0xff]  }
 0x294   :  { %v8719_v7 = vpop.f32.mrb[43].mxu0  ;;  %v8739_v9 = vadd.f32 %v8738_v6, %v8737_v1  ;;  %v8740_v10 = vpop.f32.mrb[42].mxu1  ;;  %9019 = vmatprep.subr.bf16.mxu0 %v9825_v4  ;;  %9040 = vmatpush3.bf16.msra.mxu1 %v9824_v0  ;;  %v9864_v0 = vld [vmem:[#allocation5 + $0x1238] sm:$0xff]   ;;  %v9866_v3 = vld [vmem:[#allocation5 + $0x1340] sm:$0xff]  }
 0x295   :  { %v6640_v8 = vadd.f32 %v8717_v2, %v10272_v21  ;;  %v8741_v12 = vpop.f32.mrb[43].mxu1  ;;  %9041 = vmatprep.subr.bf16.mxu1 %v9826_v5  ;;  %v9835_v21 = vld [vmem:[#allocation5 + $0x12c0] sm:$0xff]   ;;  %v97_v1 = vld [vmem:[#allocation2 + $0x48] sm:$0xff] }
 0x296   :  { %v1843_v2 = vrot.slane %v97_v1, %v10155_v35  ;;  %v1836_v4 = vcombine.high %v97_v1, %v97_v1  ;;  %v9865_v5 = vld [vmem:[#allocation5 + $0x12b8] sm:$0xff]  }
 0x297   :  { %v10284_v14 = vadd.f32 %v8739_v9, %v6640_v8  ;;  %9020 = vmatpush3.bf16.msra.mxu0 %v9827_v11  ;;  %v9867_v8 = vld [vmem:[#allocation5 + $0x13c0] sm:$0xff]  }
 0x298   :  { %9021 = vmatprep.subr.bf16.mxu0 %v9829_v15  ;;  %9042 = vmatpush3.bf16.msra.mxu1 %v9828_v13  ;;  %v1851_v6 = vcombine.high %v1843_v2, %v1843_v2  ;;  %v1859_v7 = vrot.slane %v1843_v2, %v10155_v35  ;;  %v10294_v9 = vrot.slane %v1836_v4, %v10155_v35  ;;  %v9868_v11 = vld [vmem:[#allocation5 + $0x1300] sm:$0xff]  }
 0x299   :  { %9043 = vmatprep.subr.bf16.mxu1 %v9830_v16  ;;  %v9869_v16 = vld [vmem:[#allocation5 + $0x1380] sm:$0xff]  }
 0x29a   :  { %v1873_v10 = vrot.slane %v1851_v6, %v10155_v35  ;;  %v1852_v12 = vcombine.high %v10294_v9, %v10294_v9  ;;  %v1881_v13 = vcombine.high %v1859_v7, %v1859_v7 }
 0x29b   :  { %9022 = vmatpush3.bf16.msra.mxu0 %v9831_v17 }
 0x29c   :  { %9051 = vmatprep.subr.bf16.mxu0 %v9834_v20  ;;  %9044 = vmatpush3.bf16.msra.mxu1 %v9832_v18  ;;  %v1883_v15 = vcombine.high %v1873_v10, %v1873_v10  ;;  %v1880_v17 = vrot.slane %v1852_v12, %v10155_v35  ;;  %v9871_v18 = vld [vmem:[#allocation5 + $0x13c8] sm:$0xff]  }
 0x29d   :  { %9073 = vmatprep.subr.bf16.mxu1 %v9835_v21  ;;  %v9874_v21 = vld [vmem:[#allocation5 + $0x1350] sm:$0xff]  }
 0x29e   :  { %7198 = vmatmul.mubr.bf16.vlgmr.msra.gmra.mrb[68].mxu0 %v1817_v19  ;;  %v9872_v19 = vld [vmem:[#allocation5 + $0x1308] sm:$0xff]   ;;  %v1884_v20 = vcombine.high %v1880_v17, %v1880_v17 }
 0x29f   :  { %9052 = vmatpush3.bf16.msra.mxu0 %v9836_v22  ;;  %7238 = vmatmul.mubr.bf16.vlgmr.msra.gmra.mrb[68].mxu1 %v1833_v24  ;;  %v9873_v22 = vld [vmem:[#allocation5 + $0x1388] sm:$0xff]   ;;  %v9876_v24 = vld [vmem:[#allocation5 + $0x1310] sm:$0xff]  }
 0x2a0   :  { %9053 = vmatprep.subr.bf16.mxu0 %v9838_v25  ;;  %9074 = vmatpush3.bf16.msra.mxu1 %v9837_v23  ;;  %v9875_v23 = vld [vmem:[#allocation5 + $0x13d0] sm:$0xff]   ;;  %v9878_v25 = vld [vmem:[#allocation5 + $0x1358] sm:$0xff]  }
 0x2a1   :  { %9075 = vmatprep.subr.bf16.mxu1 %v9839_v26  ;;  %7277 = vmatprep.mubr.bf16.mxu0 %v1873_v10  ;;  %v9877_v26 = vld [vmem:[#allocation5 + $0x1390] sm:$0xff]  }
 0x2a2   :  { %7317 = vmatprep.mubr.bf16.mxu1 %v1883_v15 }
 0x2a3   :  { %9054 = vmatpush3.bf16.msra.mxu0 %v9840_v27  ;;  %v9879_v27 = vld [vmem:[#allocation5 + $0x13d8] sm:$0xff]  }
 0x2a4   :  { %9055 = vmatprep.subr.bf16.mxu0 %v9842_v29  ;;  %9076 = vmatpush3.bf16.msra.mxu1 %v9841_v28  ;;  %v9880_v28 = vld [vmem:[#allocation5 + $0x1318] sm:$0xff]   ;;  %v9882_v29 = vld [vmem:[#allocation5 + $0x1360] sm:$0xff]  }
 0x2a5   :  { %9077 = vmatprep.subr.bf16.mxu1 %v9843_v30  ;;  %v9881_v30 = vld [vmem:[#allocation5 + $0x1398] sm:$0xff]  }
 0x2a7   :  { %9056 = vmatpush3.bf16.msra.mxu0 %v9844_v31  ;;  %v9883_v31 = vld [vmem:[#allocation5 + $0x13e0] sm:$0xff]  }
 0x2a8   :  { %9057 = vmatprep.subr.bf16.mxu0 %v9846_v33  ;;  %9078 = vmatpush3.bf16.msra.mxu1 %v9845_v32  ;;  %v9884_v32 = vld [vmem:[#allocation5 + $0x1320] sm:$0xff]   ;;  %v9886_v33 = vld [vmem:[#allocation5 + $0x1368] sm:$0xff]  }
 0x2a9   :  { %9079 = vmatprep.subr.bf16.mxu1 %v9847_v34  ;;  %v9885_v34 = vld [vmem:[#allocation5 + $0x13a0] sm:$0xff]  }
 0x2ab   :  { %9058 = vmatpush3.bf16.msra.mxu0 %v9848_v36 }
 0x2ac   :  { %9059 = vmatprep.subr.bf16.mxu0 %v9850_v38  ;;  %9080 = vmatpush3.bf16.msra.mxu1 %v9849_v37  ;;  %v9887_v37 = vld [vmem:[#allocation5 + $0x13e8] sm:$0xff]  }
 0x2ad   :  { %9081 = vmatprep.subr.bf16.mxu1 %v9851_v39  ;;  %v9888_v39 = vld [vmem:[#allocation5 + $0x1328] sm:$0xff]  }
 0x2af   :  { %9060 = vmatpush3.bf16.msra.mxu0 %v9852_v40 }
 0x2b0   :  { %9061 = vmatprep.subr.bf16.mxu0 %v9854_v42  ;;  %9082 = vmatpush3.bf16.msra.mxu1 %v9853_v41 }
 0x2b1   :  { %v8759_v44 = vpop.f32.mrb[44].mxu0  ;;  %9083 = vmatprep.subr.bf16.mxu1 %v9855_v43  ;;  %v9889_v43 = vld [vmem:[#allocation5 + $0x13a8] sm:$0xff]  }
 0x2b2   :  { %v8760_v46 = vpop.f32.mrb[45].mxu0  ;;  %v8781_v48 = vpop.f32.mrb[44].mxu1 }
 0x2b3   :  { %v8761_v49 = vadd.f32 %v8760_v46, %v8759_v44  ;;  %v8762_v50 = vpop.f32.mrb[46].mxu0  ;;  %v8782_v51 = vpop.f32.mrb[45].mxu1  ;;  %9062 = vmatpush3.bf16.msra.mxu0 %v9856_v45  ;;  %v9890_v44 = vld [vmem:[#allocation5 + $0x1370] sm:$0xff]  }
 0x2b4   :  { %v8763_v53 = vpop.f32.mrb[47].mxu0  ;;  %v8783_v56 = vadd.f32 %v8782_v51, %v8781_v48  ;;  %v8784_v57 = vpop.f32.mrb[46].mxu1  ;;  %9063 = vmatprep.subr.bf16.mxu0 %v9858_v47  ;;  %9084 = vmatpush3.bf16.msra.mxu1 %v9857_v52  ;;  %v9891_v50 = vld [vmem:[#allocation5 + $0x13f0] sm:$0xff]  }
 0x2b5   :  { %v6720_v55 = vadd.f32 %v8761_v49, %v10284_v14  ;;  %v8785_v59 = vpop.f32.mrb[47].mxu1  ;;  %9085 = vmatprep.subr.bf16.mxu1 %v9859_v54  ;;  %v9870_v14 = vld [vmem:[#allocation5 + $0x1348] sm:$0xff]   ;;  %v9892_v52 = vld [vmem:[#allocation5 + $0x1330] sm:$0xff]   ;;  %v9894_v54 = vld [vmem:[#allocation5 + $0x1378] sm:$0xff]  }
 0x2b6   :  { %v9896_v57 = vld [vmem:[#allocation5 + $0x1338] sm:$0xff]  }
 0x2b7   :  { %v10289_v61 = vadd.f32 %v8783_v56, %v6720_v55  ;;  %9064 = vmatpush3.bf16.msra.mxu0 %v9860_v58  ;;  %v9893_v55 = vld [vmem:[#allocation5 + $0x13b0] sm:$0xff]   ;;  %v9895_v56 = vld [vmem:[#allocation5 + $0x13f8] sm:$0xff]   ;;  %v1866_v58 = vrot.slane %v10294_v9, %v10155_v35 }
 0x2b8   :  { %9065 = vmatprep.subr.bf16.mxu0 %v9862_v60  ;;  %9086 = vmatpush3.bf16.msra.mxu1 %v9861_v62  ;;  %v9897_v59 = vld [vmem:[#allocation5 + $0x13b8] sm:$0xff]  }
 0x2b9   :  { %9087 = vmatprep.subr.bf16.mxu1 %v9863_v63  ;;  %v1882_v60 = vcombine.high %v1866_v58, %v1866_v58 }
 0x2bb   :  { %9066 = vmatpush3.bf16.msra.mxu0 %v9864_v0 }
 0x2bc   :  { %9095 = vmatprep.subr.bf16.mxu0 %v9866_v3  ;;  %9088 = vmatpush3.bf16.msra.mxu1 %v9865_v5 }
 0x2bd   :  { %9117 = vmatprep.subr.bf16.mxu1 %v9867_v8 }
 0x2be   :  { %7278 = vmatmul.mubr.bf16.vlgmr.msra.gmra.mrb[72].mxu0 %v1859_v7 }
 0x2bf   :  { %9096 = vmatpush3.bf16.msra.mxu0 %v9868_v11  ;;  %7318 = vmatmul.mubr.bf16.vlgmr.msra.gmra.mrb[72].mxu1 %v1881_v13 }
 0x2c0   :  { %9097 = vmatprep.subr.bf16.mxu0 %v9870_v14  ;;  %9118 = vmatpush3.bf16.msra.mxu1 %v9869_v16 }
 0x2c1   :  { %7357 = vmatprep.mubr.bf16.mxu0 %v1880_v17  ;;  %9119 = vmatprep.subr.bf16.mxu1 %v9871_v18 }
 0x2c2   :  { %7397 = vmatprep.mubr.bf16.mxu1 %v1884_v20  ;;  %v7406_v20 = vld [vmem:[%s10381_s3] sm:$0xff] }
 0x2c3   :  { %9098 = vmatpush3.bf16.msra.mxu0 %v9872_v19 }
 0x2c4   :  { %9099 = vmatprep.subr.bf16.mxu0 %v9874_v21  ;;  %9120 = vmatpush3.bf16.msra.mxu1 %v9873_v22  ;;  %v7407_v21 = vld [vmem:[%s10381_s3 + $0x8] sm:$0xff]  ;;  %v7408_v22 = vld [vmem:[%s10381_s3 + $0x10] sm:$0xff] }
 0x2c5   :  { %9121 = vmatprep.subr.bf16.mxu1 %v9875_v23  ;;  %v10051_v23 = vmov 0.0|0.0  }
 0x2c7   :  { %9100 = vmatpush3.bf16.msra.mxu0 %v9876_v24  ;;  %v9208_v24 = vpack.c.bf16 %v7407_v21, %v7406_v20 }
 0x2c8   :  { %9101 = vmatprep.subr.bf16.mxu0 %v9878_v25  ;;  %9122 = vmatpush3.bf16.msra.mxu1 %v9877_v26  ;;  %v7409_v25 = vld [vmem:[%s10381_s3 + $0x18] sm:$0xff] }
 0x2c9   :  { %9123 = vmatprep.subr.bf16.mxu1 %v9879_v27  ;;  %v9211_v26 = vpack.c.bf16 %v7409_v25, %v7408_v22  ;;  %v7410_v27 = vld [vmem:[%s10381_s3 + $0x20] sm:$0xff] }
 0x2cb   :  { %9102 = vmatpush3.bf16.msra.mxu0 %v9880_v28  ;;  %v7411_v28 = vld [vmem:[%s10381_s3 + $0x28] sm:$0xff] }
 0x2cc   :  { %9103 = vmatprep.subr.bf16.mxu0 %v9882_v29  ;;  %9124 = vmatpush3.bf16.msra.mxu1 %v9881_v30  ;;  %v9214_v29 = vpack.c.bf16 %v7411_v28, %v7410_v27  ;;  %v7412_v30 = vld [vmem:[%s10381_s3 + $0x30] sm:$0xff] }
 0x2cd   :  { %9125 = vmatprep.subr.bf16.mxu1 %v9883_v31  ;;  %v7413_v31 = vld [vmem:[%s10381_s3 + $0x38] sm:$0xff] }
 0x2cf   :  { %9104 = vmatpush3.bf16.msra.mxu0 %v9884_v32  ;;  %v9217_v32 = vpack.c.bf16 %v7413_v31, %v7412_v30 }
 0x2d0   :  { %9105 = vmatprep.subr.bf16.mxu0 %v9886_v33  ;;  %9126 = vmatpush3.bf16.msra.mxu1 %v9885_v34  ;;  %v7414_v33 = vld [vmem:[%s10381_s3 + $0x40] sm:$0xff]  ;;  %v7415_v34 = vld [vmem:[%s10381_s3 + $0x48] sm:$0xff] }
 0x2d1   :  { %v8803_v36 = vpop.f32.mrb[48].mxu0  ;;  %9127 = vmatprep.subr.bf16.mxu1 %v9887_v37  ;;  %v7416_v37 = vld [vmem:[%s10381_s3 + $0x50] sm:$0xff] }
 0x2d2   :  { %v8804_v38 = vpop.f32.mrb[49].mxu0  ;;  %v8825_v40 = vpop.f32.mrb[48].mxu1 }
 0x2d3   :  { %v8805_v41 = vadd.f32 %v8804_v38, %v8803_v36  ;;  %v8806_v42 = vpop.f32.mrb[50].mxu0  ;;  %v8826_v45 = vpop.f32.mrb[49].mxu1  ;;  %9106 = vmatpush3.bf16.msra.mxu0 %v9888_v39  ;;  %v9220_v36 = vpack.c.bf16 %v7415_v34, %v7414_v33  ;;  %v7417_v38 = vld [vmem:[%s10381_s3 + $0x58] sm:$0xff] }
 0x2d4   :  { %v8807_v46 = vpop.f32.mrb[51].mxu0  ;;  %v8827_v48 = vadd.f32 %v8826_v45, %v8825_v40  ;;  %v8828_v49 = vpop.f32.mrb[50].mxu1  ;;  %9107 = vmatprep.subr.bf16.mxu0 %v9890_v44  ;;  %9128 = vmatpush3.bf16.msra.mxu1 %v9889_v43  ;;  %v9223_v39 = vpack.c.bf16 %v7417_v38, %v7416_v37 }
 0x2d5   :  { %v6800_v47 = vadd.f32 %v8805_v41, %v10289_v61  ;;  %v8829_v51 = vpop.f32.mrb[51].mxu1  ;;  %9129 = vmatprep.subr.bf16.mxu1 %v9891_v50  ;;  %v7418_v50 = vld [vmem:[%s10381_s3 + $0x60] sm:$0xff] }
 0x2d6   :  { %v7419_v51 = vld [vmem:[%s10381_s3 + $0x68] sm:$0xff] }
 0x2d7   :  { %v6840_v53 = vadd.f32 %v8827_v48, %v6800_v47  ;;  %9108 = vmatpush3.bf16.msra.mxu0 %v9892_v52 }
 0x2d8   :  { %9109 = vmatprep.subr.bf16.mxu0 %v9894_v54  ;;  %9130 = vmatpush3.bf16.msra.mxu1 %v9893_v55  ;;  %v7420_v55 = vld [vmem:[%s10381_s3 + $0x70] sm:$0xff] }
 0x2d9   :  { %9131 = vmatprep.subr.bf16.mxu1 %v9895_v56  ;;  %v7421_v56 = vld [vmem:[%s10381_s3 + $0x78] sm:$0xff] }
 0x2db   :  { %9110 = vmatpush3.bf16.msra.mxu0 %v9896_v57  ;;  %v9229_v57 = vpack.c.bf16 %v7421_v56, %v7420_v55  ;;  %v8257_v55 = vld [vmem:[#allocation10] ss:$0 sm:$0xff] }
 0x2dc   :  { %9132 = vmatpush3.bf16.msra.mxu1 %v9897_v59  ;;  %9207 = vmatprep.subr.bf16.mxu0 %v10051_v23  ;;  %v7500_v59 = vld [vmem:[%s10383_s5] sm:$0xff] }
 0x2dd   :  { %9231 = vmatprep.subr.bf16.mxu1 %v10051_v23 }
 0x2de   :  { %7358 = vmatmul.mubr.bf16.vlgmr.msra.gmra.mrb[76].mxu0 %v1866_v58  ;;  %v10053_v58 = vmov 0.0  }
 0x2df   :  { %7398 = vmatmul.mubr.bf16.vlgmr.msra.gmra.mrb[76].mxu1 %v1882_v60  ;;  %9209 = vmatpush3.bf16.msra.mxu0 %v9208_v24  ;;  %v7501_v60 = vld [vmem:[%s10383_s5 + $0x8] sm:$0xff] }
 0x2e0   :  { %9210 = vmatprep.subr.bf16.mxu0 %v10051_v23  ;;  %9193 = vmatprep.mubr.msk.f32.mxu0 %vm10052_vm0, %v10053_v58 }
 0x2e1   :  { %9204 = vmatprep.mubr.msk.f32.mxu1 %vm10052_vm0, %v10053_v58 }
 0x2e3   :  { %9212 = vmatpush3.bf16.msra.mxu0 %v9211_v26 }
 0x2e4   :  { %9213 = vmatprep.subr.bf16.mxu0 %v10051_v23 }
 0x2e7   :  { %9215 = vmatpush3.bf16.msra.mxu0 %v9214_v29 }
 0x2e8   :  { %9216 = vmatprep.subr.bf16.mxu0 %v10051_v23 }
 0x2eb   :  { %9218 = vmatpush3.bf16.msra.mxu0 %v9217_v32 }
 0x2ec   :  { %9219 = vmatprep.subr.bf16.mxu0 %v10051_v23 }
 0x2ef   :  { %9221 = vmatpush3.bf16.msra.mxu0 %v9220_v36 }
 0x2f0   :  { %9222 = vmatprep.subr.bf16.mxu0 %v10051_v23 }
 0x2f1   :  { %v8847_v61 = vpop.f32.mrb[52].mxu0 }
 0x2f2   :  { %v8848_v62 = vpop.f32.mrb[53].mxu0  ;;  %v8869_v63 = vpop.f32.mrb[52].mxu1 }
 0x2f3   :  { %v8849_v0 = vadd.f32 %v8848_v62, %v8847_v61  ;;  %v8850_v1 = vpop.f32.mrb[54].mxu0  ;;  %v8870_v2 = vpop.f32.mrb[53].mxu1  ;;  %9224 = vmatpush3.bf16.msra.mxu0 %v9223_v39  ;;  %v9232_v61 = vpack.c.bf16 %v7501_v60, %v7500_v59 }
 0x2f4   :  { %v8851_v3 = vpop.f32.mrb[55].mxu0  ;;  %v8871_v5 = vadd.f32 %v8870_v2, %v8869_v63  ;;  %v8872_v6 = vpop.f32.mrb[54].mxu1  ;;  %9225 = vmatprep.subr.bf16.mxu0 %v10051_v23 }
 0x2f5   :  { %v6880_v4 = vadd.f32 %v8849_v0, %v6840_v53  ;;  %v8873_v7 = vpop.f32.mrb[55].mxu1  ;;  %v9226_v53 = vpack.c.bf16 %v7419_v51, %v7418_v50  ;;  %9233 = vmatpush3.bf16.msra.mxu1 %v9232_v61  ;;  %v8256_v50 = vld [vmem:[#allocation8] ss:$0 sm:$0xff] }
 0x2f6   :  { %9234 = vmatprep.subr.bf16.mxu1 %v10051_v23 }
 0x2f7   :  { %v6920_v35 = vadd.f32 %v8871_v5, %v6880_v4  ;;  %9227 = vmatpush3.bf16.msra.mxu0 %v9226_v53 }
 0x2f8   :  { %9228 = vmatprep.subr.bf16.mxu0 %v10051_v23 }
 0x2fb   :  { %9230 = vmatpush3.bf16.msra.mxu0 %v9229_v57 }
 0x311   :  { %v8891_v8 = vpop.f32.mrb[56].mxu0 }
 0x312   :  { %v8892_v9 = vpop.f32.mrb[57].mxu0  ;;  %v8913_v10 = vpop.f32.mrb[56].mxu1 }
 0x313   :  { %v8893_v11 = vadd.f32 %v8892_v9, %v8891_v8  ;;  %v8894_v12 = vpop.f32.mrb[58].mxu0  ;;  %v8914_v13 = vpop.f32.mrb[57].mxu1 }
 0x314   :  { %v8895_v14 = vpop.f32.mrb[59].mxu0  ;;  %v8915_v16 = vadd.f32 %v8914_v13, %v8913_v10  ;;  %v8916_v17 = vpop.f32.mrb[58].mxu1 }
 0x315   :  { %v6960_v15 = vadd.f32 %v8893_v11, %v6920_v35  ;;  %v8917_v18 = vpop.f32.mrb[59].mxu1 }
 0x317   :  { %v7000_v19 = vadd.f32 %v8915_v16, %v6960_v15 }
 0x331   :  { %v8935_v40 = vpop.f32.mrb[60].mxu0 }
 0x332   :  { %v8936_v41 = vpop.f32.mrb[61].mxu0  ;;  %v8957_v42 = vpop.f32.mrb[60].mxu1 }
 0x333   :  { %v8937_v43 = vadd.f32 %v8936_v41, %v8935_v40  ;;  %v8938_v44 = vpop.f32.mrb[62].mxu0  ;;  %v8958_v45 = vpop.f32.mrb[61].mxu1 }
 0x334   :  { %v8939_v46 = vpop.f32.mrb[63].mxu0  ;;  %v8959_v48 = vadd.f32 %v8958_v45, %v8957_v42  ;;  %v8960_v49 = vpop.f32.mrb[62].mxu1 }
 0x335   :  { %v7040_v47 = vadd.f32 %v8937_v43, %v7000_v19  ;;  %v8961_v52 = vpop.f32.mrb[63].mxu1 }
 0x337   :  { %v7080_v54 = vadd.f32 %v8959_v48, %v7040_v47  ;;  %v7502_v47 = vld [vmem:[%s10383_s5 + $0x10] sm:$0xff]  ;;  %v7503_v48 = vld [vmem:[%s10383_s5 + $0x18] sm:$0xff]  ;;  %s10054_s5 = smov [#allocation11]  }
 0x338   :  { %v9235_v49 = vpack.c.bf16 %v7503_v48, %v7502_v47  ;;  %s7604_s26 = sshll.u32 %s10054_s5, 4  ;;  %s7605_s26 = int_to_ptr.vmem [resolvable:$true] %s7604_s26 }
 0x339   :  { %s10013_s1 = scalar_lea.vmem %s7605_s26, 32  ;;  %p10018_p13 = scmp.lt.s32.totalorder %s7605_s26, %s7605_s26 }
 0x33a   :  { %9236 = vmatpush3.bf16.msra.mxu1 %v9235_v49  ;;  %p10014_p12 = scmp.ne.s32.totalorder %s7605_s26, %s10013_s1  ;;  %p10019_p0 = scmp.lt.s32.totalorder %s10013_s1, %s10013_s1 }
 0x33c   :  { %p10020_p1 = por %p10019_p0, %p10018_p13 }
 0x33e   :  { %p10021_p2 = pnand %p10020_p1, %p10014_p12 }
 0x351   :  { %v8979_v62 = vpop.f32.mrb[64].mxu0 }
 0x352   :  { %v8980_v63 = vpop.f32.mrb[65].mxu0  ;;  %v9001_v0 = vpop.f32.mrb[64].mxu1 }
 0x353   :  { %v8981_v1 = vadd.f32 %v8980_v63, %v8979_v62  ;;  %v8982_v2 = vpop.f32.mrb[66].mxu0  ;;  %v9002_v3 = vpop.f32.mrb[65].mxu1 }
 0x354   :  { %v8983_v4 = vpop.f32.mrb[67].mxu0  ;;  %v9003_v6 = vadd.f32 %v9002_v3, %v9001_v0  ;;  %v9004_v7 = vpop.f32.mrb[66].mxu1 }
 0x355   :  { %v7120_v5 = vadd.f32 %v8981_v1, %v7080_v54  ;;  %v9005_v35 = vpop.f32.mrb[67].mxu1 }
 0x357   :  { %v7160_v8 = vadd.f32 %v9003_v6, %v7120_v5 }
 0x371   :  { %v9023_v9 = vpop.f32.mrb[68].mxu0 }
 0x372   :  { %v9024_v10 = vpop.f32.mrb[69].mxu0  ;;  %v9045_v11 = vpop.f32.mrb[68].mxu1 }
 0x373   :  { %v9025_v12 = vadd.f32 %v9024_v10, %v9023_v9  ;;  %v9026_v13 = vpop.f32.mrb[70].mxu0  ;;  %v9046_v14 = vpop.f32.mrb[69].mxu1 }
 0x374   :  { %v9027_v15 = vpop.f32.mrb[71].mxu0  ;;  %v9047_v17 = vadd.f32 %v9046_v14, %v9045_v11  ;;  %v9048_v18 = vpop.f32.mrb[70].mxu1 }
 0x375   :  { %v7200_v16 = vadd.f32 %v9025_v12, %v7160_v8  ;;  %v9049_v19 = vpop.f32.mrb[71].mxu1 }
 0x377   :  { %v7240_v20 = vadd.f32 %v9047_v17, %v7200_v16 }
 0x391   :  { %v9067_v21 = vpop.f32.mrb[72].mxu0 }
 0x392   :  { %v9068_v22 = vpop.f32.mrb[73].mxu0  ;;  %v9089_v23 = vpop.f32.mrb[72].mxu1 }
 0x393   :  { %v9069_v24 = vadd.f32 %v9068_v22, %v9067_v21  ;;  %v9070_v25 = vpop.f32.mrb[74].mxu0  ;;  %v9090_v26 = vpop.f32.mrb[73].mxu1 }
 0x394   :  { %v9071_v27 = vpop.f32.mrb[75].mxu0  ;;  %v9091_v29 = vadd.f32 %v9090_v26, %v9089_v23  ;;  %v9092_v30 = vpop.f32.mrb[74].mxu1 }
 0x395   :  { %v7280_v28 = vadd.f32 %v9069_v24, %v7240_v20  ;;  %v9093_v31 = vpop.f32.mrb[75].mxu1 }
 0x397   :  { %v7320_v32 = vadd.f32 %v9091_v29, %v7280_v28 }
 0x3b1   :  { %v9111_v33 = vpop.f32.mrb[76].mxu0 }
 0x3b2   :  { %v9112_v34 = vpop.f32.mrb[77].mxu0  ;;  %v9133_v36 = vpop.f32.mrb[76].mxu1 }
 0x3b3   :  { %v9113_v37 = vadd.f32 %v9112_v34, %v9111_v33  ;;  %v9114_v38 = vpop.f32.mrb[78].mxu0  ;;  %v9134_v39 = vpop.f32.mrb[77].mxu1 }
 0x3b4   :  { %v9115_v40 = vpop.f32.mrb[79].mxu0  ;;  %v9135_v42 = vadd.f32 %v9134_v39, %v9133_v36  ;;  %v9136_v43 = vpop.f32.mrb[78].mxu1 }
 0x3b5   :  { %v7360_v41 = vadd.f32 %v9113_v37, %v7320_v32  ;;  %v9137_v44 = vpop.f32.mrb[79].mxu1 }
 0x3b7   :  { %v7400_v45 = vadd.f32 %v9135_v42, %v7360_v41 }
 0x3b9   :  { %v7405_v46 = vmax.f32 %v7400_v45, 0.0 }
 0x3bb   :  { %9194 = vmatmul.mubr.f32.vlgmr.msra.gmra.mrb[80].mxu0 %v7405_v46 }
 0x48e   :  { %v7495_v51 = vpop.f32.mrb[80].mxu0 }
 0x48f   :  { %v7496_v52 = vadd.f32 %v8256_v50, %v7495_v51  ;;  %v9195_v53 = vpop.f32.mrb[81].mxu0 }
 0x491   :  { %v7499_v54 = vmax.f32 %v7496_v52, 0.0 }
 0x493   :  { %9205 = vmatmul.mubr.msk.f32.vlgmr.msra.gmra.mrb[80].mxu1 %vm7511_vm1, %v7499_v54 }
 0x566   :  { %v7581_v56 = vpop.f32.mrb[80].mxu1 }
 0x567   :  { %v7582_v57 = vadd.f32 %v8257_v55, %v7581_v56  ;;  %v9206_v58 = vpop.f32.mrb[81].mxu1 }
 0x569   :  { %v7586_v59 = vsel %vm7585_vm2, %v7582_v57, -inf }
 0x56a   :  { %7587 = vmax.xlane.f32.xlu0 %v7586_v59 }
 0x5f7   :  { %v7588_v60 = vpop.xlane.xlu0 %7587 }
 0x5f8   :  { %v7589_v61 = vsub.f32 %v7582_v57, %v7588_v60 }
 0x5fa   :  { %v7590_v62 = vmul.f32 1.442695, %v7589_v61 }
 0x5fc   :  { %9899 = vpow2.f32 %v7590_v62 }
 0x606   :  { %v9900_v63 = vpop.eup %9899 }
 0x607   :  { %v7592_v0 = vsel %vm7585_vm2, %v9900_v63, 0.0 }
 0x608   :  { %7593 = vadd.xlane.f32.xlu0 %v7592_v0 }
 0x695   :  { %v7594_v1 = vpop.xlane.xlu0 %7593 }
 0x696   :  { %9901 = vrcp.f32 %v7594_v1 }
 0x6a0   :  { %v9902_v2 = vpop.eup %9901 }
 0x6a1   :  { %v7596_v3 = vmul.f32 %v9902_v2, %v9900_v63 }
 0x6a3   :  { %7597 = vst.msk [vmem:[#allocation11] sm:$0x3] %vm7585_vm2, %v7596_v3 }
 0x6a4   :  { %10024 = shalt.err (!%p10021_p2)
}
 0x6a5   :  { %s10025_s25 = scalar_lea.hbm %s10385_s7, 32 }
 0x6a6   :  { %p10026_p3 = scmp.ne.s32.totalorder %s10385_s7, %s10025_s25  ;;  %p10029_p4 = scmp.lt.u32.totalorder %s10025_s25, %s10385_s7 }
 0x6a8   :  { %p10031_p5 = pnand %p10029_p4, %p10026_p3 }
 0x6aa   :  { %10034 = shalt.err (!%p10031_p5)
}
 0x6ab   :  { %7607 = dma.vmem_to_hbm [thread:$0]  %s7605_s26, 32, %s10385_s7, [#allocation4]  }
 0x6ac   :  { %10041 = dma.done.wait [#allocation4], 32  }
 0x6ad   :  { %10042 = vsyncadd [#allocation4], 4294967264 }
 0x6ae   :  { %7611 = vsyncpa [#allocation3], 1 }
 0x6af   :  { %7612 = vsyncpa [#allocation6], 1 }
 0x6b0   :  { %7613 = vsyncpa [#allocation9], 1 }
 0x6b1   :  { %7614 = vsyncpa [#allocation4], 1 }

</bundles_post_ra>
